<compile_context>
chip_gen: v7x
topology: tpu7x:2x2x1
jax: 0.10.0
libtpu: 0.0.40
codegen_flags: <defaults>
</compile_context>

<pallas_src>
import jax
import jax.numpy as jnp
from jax.experimental import pallas as pl
from jax.experimental.pallas import tpu as pltpu


_B_TILE = 8  # batch tile (sublane-aligned); batch grid axis is "parallel"


# ----------------------------------------------------------------------------
# Fused kernel: layer-0 LSTM -> layer-1 LSTM -> fc1 -> ReLU -> fc2.
# Gate order follows PyTorch: [i, f, g, o].
# ----------------------------------------------------------------------------
def _fused_lstm_head_kernel(
    x_ref,       # (S, Bt, I)   time-major input slab for this batch tile
    wih0_ref,    # (4, I, H)    gate-major W_ih^T, layer 0
    whh0_ref,    # (4, H, H)    gate-major W_hh^T, layer 0
    b0_ref,      # (4, 1, H)    gate-major (b_ih + b_hh), layer 0
    wih1_ref,    # (4, H, H)    layer 1
    whh1_ref,    # (4, H, H)
    b1_ref,      # (4, 1, H)
    wf1_ref,     # (H, H//2)    fc1 weight^T
    bf1_ref,     # (1, H//2)
    wf2_ref,     # (H//2, O)    fc2 weight^T
    bf2_ref,     # (1, O)
    out_ref,     # (Bt, O)
    xflat_scr,   # VMEM (S*Bt, I)  time-major flattened x
    seq_scr,     # VMEM (S*Bt, H)  layer-0 hidden sequence (never leaves VMEM)
):
    S, Bt, I = x_ref.shape
    H = whh0_ref.shape[-1]
    f32 = jnp.float32

    # Flatten x into a 2D time-major slab (row = t*Bt + b) with S aligned
    # (Bt, I) stores so the hoisted projection below is a single 2D matmul.
    for t in range(S):
        xflat_scr[t * Bt:(t + 1) * Bt, :] = x_ref[t]

    def input_proj(x2, wih_ref, b_ref):
        # Hoisted input projection: one MXU matmul per gate covering ALL
        # timesteps; removes x @ W_ih and the bias add from the serial path.
        return [
            jnp.dot(x2, wih_ref[g], preferred_element_type=f32) + b_ref[g]
            for g in range(4)
        ]

    def recurrence(gates_in, whh_ref, store_seq):
        # Gate-major: each gate is a separate lane-contiguous (Bt, H) tile, so
        # no sub-vreg lane slicing of a 4H-wide tensor inside the serial loop.
        whh = [whh_ref[g] for g in range(4)]          # hoist weight loads
        h = jnp.zeros((Bt, H), f32)
        c = jnp.zeros((Bt, H), f32)
        for t in range(S):                            # S small & static
            lo = t * Bt
            pre = [
                gates_in[g][lo:lo + Bt, :]
                + jnp.dot(h, whh[g], preferred_element_type=f32)
                for g in range(4)
            ]
            i_g = jax.nn.sigmoid(pre[0])
            f_g = jax.nn.sigmoid(pre[1])
            g_g = jnp.tanh(pre[2])
            o_g = jax.nn.sigmoid(pre[3])
            c = f_g * c + i_g * g_g
            h = o_g * jnp.tanh(c)
            if store_seq:
                seq_scr[lo:lo + Bt, :] = h
        return h

    # ---- LSTM layer 0 ------------------------------------------------------
    g_in0 = input_proj(xflat_scr[...], wih0_ref, b0_ref)
    recurrence(g_in0, whh0_ref, store_seq=True)

    # ---- LSTM layer 1 (input projection hoisted over stored layer-0 seq) ---
    # TODO(synk): inter-layer LSTM dropout (training mode) omitted; eval => id.
    g_in1 = input_proj(seq_scr[...], wih1_ref, b1_ref)
    h_last = recurrence(g_in1, whh1_ref, store_seq=False)

    # ---- head: dropout(eval=id) -> fc1 -> ReLU -> fc2 -----------------------
    z = jnp.dot(h_last, wf1_ref[...], preferred_element_type=f32) + bf1_ref[...]
    z = jnp.maximum(z, 0.0)
    out_ref[...] = (
        jnp.dot(z, wf2_ref[...], preferred_element_type=f32) + bf2_ref[...]
    )


# ----------------------------------------------------------------------------
# Parameter construction (PyTorch-shaped) and one-time kernel-layout prep.
# ----------------------------------------------------------------------------
def init_params(key, input_size, hidden_size, num_layers=2, output_size=1):
    H = hidden_size
    bound = 1.0 / jnp.sqrt(jnp.float32(H))
    params = {"lstm": []}
    for layer in range(num_layers):
        in_sz = input_size if layer == 0 else H
        key, k1, k2, k3, k4 = jax.random.split(key, 5)
        w_ih = jax.random.uniform(k1, (4 * H, in_sz), jnp.float32, -bound, bound)
        w_hh = jax.random.uniform(k2, (4 * H, H), jnp.float32, -bound, bound)
        b_ih = jax.random.uniform(k3, (4 * H,), jnp.float32, -bound, bound)
        b_hh = jax.random.uniform(k4, (4 * H,), jnp.float32, -bound, bound)
        params["lstm"].append((w_ih, w_hh, b_ih, b_hh))
    key, k1, k2, k3, k4 = jax.random.split(key, 5)
    b1 = 1.0 / jnp.sqrt(jnp.float32(H))
    params["fc1_w"] = jax.random.uniform(k1, (H // 2, H), jnp.float32, -b1, b1)
    params["fc1_b"] = jax.random.uniform(k2, (H // 2,), jnp.float32, -b1, b1)
    b2 = 1.0 / jnp.sqrt(jnp.float32(H // 2))
    params["fc2_w"] = jax.random.uniform(k3, (output_size, H // 2), jnp.float32, -b2, b2)
    params["fc2_b"] = jax.random.uniform(k4, (output_size,), jnp.float32, -b2, b2)
    return params


def prepare_params(params):
    """One-time conversion of PyTorch-shaped params to kernel layout
    (gate-major, pre-transposed, biases pre-combined). Kernel supports the
    module's default num_layers=2."""
    assert len(params["lstm"]) == 2, "fused kernel is built for num_layers=2"
    prep = {}
    H = params["lstm"][0][1].shape[1]
    for idx, (w_ih, w_hh, b_ih, b_hh) in enumerate(params["lstm"]):
        in_sz = w_ih.shape[1]
        # PyTorch packs gates [i, f, g, o] along the 4H axis.
        prep[f"wih{idx}"] = jnp.transpose(w_ih.reshape(4, H, in_sz), (0, 2, 1))
        prep[f"whh{idx}"] = jnp.transpose(w_hh.reshape(4, H, H), (0, 2, 1))
        prep[f"b{idx}"] = (b_ih + b_hh).reshape(4, 1, H)
    prep["wf1"] = jnp.transpose(params["fc1_w"])      # (H, H//2)
    prep["bf1"] = params["fc1_b"][None, :]            # (1, H//2)
    prep["wf2"] = jnp.transpose(params["fc2_w"])      # (H//2, O)
    prep["bf2"] = params["fc2_b"][None, :]            # (1, O)
    return prep


# ----------------------------------------------------------------------------
# Forward pass: one fused pallas_call, batch tiled on a "parallel" grid axis.
# ----------------------------------------------------------------------------
@jax.jit
def lstm_model_forward(x_bsi, prep):
    """x_bsi: (B, S, input_size) -> (B, output_size). Inference (dropout=id)."""
    B, S, I = x_bsi.shape
    H = prep["whh0"].shape[-1]
    Hh = prep["wf1"].shape[-1]
    O = prep["wf2"].shape[-1]
    Bt = _B_TILE

    x = jnp.transpose(x_bsi.astype(jnp.float32), (1, 0, 2))  # time-major (S, B, I)
    B_pad = ((B + Bt - 1) // Bt) * Bt
    if B_pad != B:
        x = jnp.pad(x, ((0, 0), (0, B_pad - B), (0, 0)))
    nb = B_pad // Bt

    out = pl.pallas_call(
        _fused_lstm_head_kernel,
        out_shape=jax.ShapeDtypeStruct((B_pad, O), jnp.float32),
        grid_spec=pltpu.PrefetchScalarGridSpec(
            num_scalar_prefetch=0,
            grid=(nb,),
            in_specs=[
                pl.BlockSpec((S, Bt, I), lambda b: (0, b, 0)),
                pl.BlockSpec((4, I, H), lambda b: (0, 0, 0)),
                pl.BlockSpec((4, H, H), lambda b: (0, 0, 0)),
                pl.BlockSpec((4, 1, H), lambda b: (0, 0, 0)),
                pl.BlockSpec((4, H, H), lambda b: (0, 0, 0)),
                pl.BlockSpec((4, H, H), lambda b: (0, 0, 0)),
                pl.BlockSpec((4, 1, H), lambda b: (0, 0, 0)),
                pl.BlockSpec((H, Hh), lambda b: (0, 0)),
                pl.BlockSpec((1, Hh), lambda b: (0, 0)),
                pl.BlockSpec((Hh, O), lambda b: (0, 0)),
                pl.BlockSpec((1, O), lambda b: (0, 0)),
            ],
            out_specs=pl.BlockSpec((Bt, O), lambda b: (b, 0)),
            scratch_shapes=[
                pltpu.VMEM((S * Bt, I), jnp.float32),   # flattened x
                pltpu.VMEM((S * Bt, H), jnp.float32),   # layer-0 hidden seq
            ],
        ),
        compiler_params=pltpu.CompilerParams(
            # Batch tiles are independent -> "parallel" (megacore split on v7x).
            # Time is handled entirely inside the kernel body (serial).
            dimension_semantics=("parallel",),
        ),
    )(x, prep["wih0"], prep["whh0"], prep["b0"],
      prep["wih1"], prep["whh1"], prep["b1"],
      prep["wf1"], prep["bf1"], prep["wf2"], prep["bf2"])
    return out[:B]


# ----------------------------------------------------------------------------
# Pure-JAX reference (sanity check).
# ----------------------------------------------------------------------------
def _reference_forward(x_bsi, params):
    x = jnp.transpose(x_bsi, (1, 0, 2)).astype(jnp.float32)
    for (w_ih, w_hh, b_ih, b_hh) in params["lstm"]:
        H = w_hh.shape[1]
        B = x.shape[1]

        def step(carry, x_t):
            h, c = carry
            gates = x_t @ w_ih.T + h @ w_hh.T + b_ih + b_hh
            i = jax.nn.sigmoid(gates[:, 0 * H:1 * H])
            f = jax.nn.sigmoid(gates[:, 1 * H:2 * H])
            g = jnp.tanh(gates[:, 2 * H:3 * H])
            o = jax.nn.sigmoid(gates[:, 3 * H:4 * H])
            c = f * c + i * g
            h = o * jnp.tanh(c)
            return (h, c), h

        init = (jnp.zeros((B, H), jnp.float32), jnp.zeros((B, H), jnp.float32))
        _, x = jax.lax.scan(step, init, x)
    h_last = x[-1]
    z = jnp.maximum(h_last @ params["fc1_w"].T + params["fc1_b"], 0.0)
    return z @ params["fc2_w"].T + params["fc2_b"]


if __name__ == "__main__":
    B, S, INPUT, HIDDEN, OUT = 4, 8, 8, 32, 1

    key = jax.random.PRNGKey(0)
    key, kx, kp = jax.random.split(key, 3)
    x = jax.random.normal(kx, (B, S, INPUT), jnp.float32)
    params = init_params(kp, INPUT, HIDDEN, num_layers=2, output_size=OUT)
    prep = prepare_params(params)   # one-time layout prep (not per call)

    y = lstm_model_forward(x, prep)
    jax.block_until_ready(y)
    assert y.shape == (B, OUT)

    y_ref = _reference_forward(x, params)
    assert jnp.allclose(y, y_ref, rtol=1e-4, atol=1e-4), (
        float(jnp.max(jnp.abs(y - y_ref))))

    print("KERNEL_OK")
</pallas_src>

<mosaic_0001>
module attributes {stable_mosaic.version = 11 : i64} {
  func.func @_fused_lstm_head_kernel(%arg0: i32, %arg1: memref<8x8x8xf32, #tpu.memory_space<vmem>>, %arg2: memref<4x8x32xf32, #tpu.memory_space<vmem>>, %arg3: memref<4x32x32xf32, #tpu.memory_space<vmem>>, %arg4: memref<4x1x32xf32, #tpu.memory_space<vmem>>, %arg5: memref<4x32x32xf32, #tpu.memory_space<vmem>>, %arg6: memref<4x32x32xf32, #tpu.memory_space<vmem>>, %arg7: memref<4x1x32xf32, #tpu.memory_space<vmem>>, %arg8: memref<32x16xf32, #tpu.memory_space<vmem>>, %arg9: memref<1x16xf32, #tpu.memory_space<vmem>>, %arg10: memref<16x1xf32, #tpu.memory_space<vmem>>, %arg11: memref<1x1xf32, #tpu.memory_space<vmem>>, %arg12: memref<8x1xf32, #tpu.memory_space<vmem>>, %arg13: memref<64x8xf32, #tpu.memory_space<vmem>>, %arg14: memref<64x32xf32, #tpu.memory_space<vmem>>) attributes {dimension_semantics = [#tpu.dimension_semantics<parallel>], iteration_bounds = array<i64: 1>, scalar_prefetch = 0 : i64, scratch_operands = 2 : i64, tpu.core_type = #tpu.core_type<tc>, window_params = [{transform_indices = @transform_0, window_bounds = array<i64: 8, 8, 8>}, {pipeline_mode = #tpu.pipeline_mode<synchronous>, transform_indices = @transform_1, window_bounds = array<i64: 4, 8, 32>}, {pipeline_mode = #tpu.pipeline_mode<synchronous>, transform_indices = @transform_2, window_bounds = array<i64: 4, 32, 32>}, {pipeline_mode = #tpu.pipeline_mode<synchronous>, transform_indices = @transform_3, window_bounds = array<i64: 4, 1, 32>}, {pipeline_mode = #tpu.pipeline_mode<synchronous>, transform_indices = @transform_4, window_bounds = array<i64: 4, 32, 32>}, {pipeline_mode = #tpu.pipeline_mode<synchronous>, transform_indices = @transform_5, window_bounds = array<i64: 4, 32, 32>}, {pipeline_mode = #tpu.pipeline_mode<synchronous>, transform_indices = @transform_6, window_bounds = array<i64: 4, 1, 32>}, {pipeline_mode = #tpu.pipeline_mode<synchronous>, transform_indices = @transform_7, window_bounds = array<i64: 32, 16>}, {pipeline_mode = #tpu.pipeline_mode<synchronous>, transform_indices = @transform_8, window_bounds = array<i64: 1, 16>}, {pipeline_mode = #tpu.pipeline_mode<synchronous>, transform_indices = @transform_9, window_bounds = array<i64: 16, 1>}, {pipeline_mode = #tpu.pipeline_mode<synchronous>, transform_indices = @transform_10, window_bounds = array<i64: 1, 1>}, {transform_indices = @transform_11, window_bounds = array<i64: 8, 1>}]} {
    %c0 = arith.constant 0 : index
    %c0_0 = arith.constant 0 : index
    %c0_1 = arith.constant 0 : index
    %0 = vector.load %arg1[%c0, %c0_0, %c0_1] : memref<8x8x8xf32, #tpu.memory_space<vmem>>, vector<1x8x8xf32>
    %1 = vector.shape_cast %0 : vector<1x8x8xf32> to vector<8x8xf32>
    %c0_2 = arith.constant 0 : index
    %c0_3 = arith.constant 0 : index
    %2 = vector.load %arg13[%c0_2, %c0_3] : memref<64x8xf32, #tpu.memory_space<vmem>>, vector<8x8xf32>
    tpu.vector_store %arg13[%c0_2, %c0_3], %1 {strides = array<i32>} : memref<64x8xf32, #tpu.memory_space<vmem>>, vector<8x8xf32>,
    %c1 = arith.constant 1 : index
    %c0_4 = arith.constant 0 : index
    %c0_5 = arith.constant 0 : index
    %3 = vector.load %arg1[%c1, %c0_4, %c0_5] : memref<8x8x8xf32, #tpu.memory_space<vmem>>, vector<1x8x8xf32>
    %4 = vector.shape_cast %3 : vector<1x8x8xf32> to vector<8x8xf32>
    %c8 = arith.constant 8 : index
    %c0_6 = arith.constant 0 : index
    %5 = vector.load %arg13[%c8, %c0_6] : memref<64x8xf32, #tpu.memory_space<vmem>>, vector<8x8xf32>
    tpu.vector_store %arg13[%c8, %c0_6], %4 {strides = array<i32>} : memref<64x8xf32, #tpu.memory_space<vmem>>, vector<8x8xf32>,
    %c2 = arith.constant 2 : index
    %c0_7 = arith.constant 0 : index
    %c0_8 = arith.constant 0 : index
    %6 = vector.load %arg1[%c2, %c0_7, %c0_8] : memref<8x8x8xf32, #tpu.memory_space<vmem>>, vector<1x8x8xf32>
    %7 = vector.shape_cast %6 : vector<1x8x8xf32> to vector<8x8xf32>
    %c16 = arith.constant 16 : index
    %c0_9 = arith.constant 0 : index
    %8 = vector.load %arg13[%c16, %c0_9] : memref<64x8xf32, #tpu.memory_space<vmem>>, vector<8x8xf32>
    tpu.vector_store %arg13[%c16, %c0_9], %7 {strides = array<i32>} : memref<64x8xf32, #tpu.memory_space<vmem>>, vector<8x8xf32>,
    %c3 = arith.constant 3 : index
    %c0_10 = arith.constant 0 : index
    %c0_11 = arith.constant 0 : index
    %9 = vector.load %arg1[%c3, %c0_10, %c0_11] : memref<8x8x8xf32, #tpu.memory_space<vmem>>, vector<1x8x8xf32>
    %10 = vector.shape_cast %9 : vector<1x8x8xf32> to vector<8x8xf32>
    %c24 = arith.constant 24 : index
    %c0_12 = arith.constant 0 : index
    %11 = vector.load %arg13[%c24, %c0_12] : memref<64x8xf32, #tpu.memory_space<vmem>>, vector<8x8xf32>
    tpu.vector_store %arg13[%c24, %c0_12], %10 {strides = array<i32>} : memref<64x8xf32, #tpu.memory_space<vmem>>, vector<8x8xf32>,
    %c4 = arith.constant 4 : index
    %c0_13 = arith.constant 0 : index
    %c0_14 = arith.constant 0 : index
    %12 = vector.load %arg1[%c4, %c0_13, %c0_14] : memref<8x8x8xf32, #tpu.memory_space<vmem>>, vector<1x8x8xf32>
    %13 = vector.shape_cast %12 : vector<1x8x8xf32> to vector<8x8xf32>
    %c32 = arith.constant 32 : index
    %c0_15 = arith.constant 0 : index
    %14 = vector.load %arg13[%c32, %c0_15] : memref<64x8xf32, #tpu.memory_space<vmem>>, vector<8x8xf32>
    tpu.vector_store %arg13[%c32, %c0_15], %13 {strides = array<i32>} : memref<64x8xf32, #tpu.memory_space<vmem>>, vector<8x8xf32>,
    %c5 = arith.constant 5 : index
    %c0_16 = arith.constant 0 : index
    %c0_17 = arith.constant 0 : index
    %15 = vector.load %arg1[%c5, %c0_16, %c0_17] : memref<8x8x8xf32, #tpu.memory_space<vmem>>, vector<1x8x8xf32>
    %16 = vector.shape_cast %15 : vector<1x8x8xf32> to vector<8x8xf32>
    %c40 = arith.constant 40 : index
    %c0_18 = arith.constant 0 : index
    %17 = vector.load %arg13[%c40, %c0_18] : memref<64x8xf32, #tpu.memory_space<vmem>>, vector<8x8xf32>
    tpu.vector_store %arg13[%c40, %c0_18], %16 {strides = array<i32>} : memref<64x8xf32, #tpu.memory_space<vmem>>, vector<8x8xf32>,
    %c6 = arith.constant 6 : index
    %c0_19 = arith.constant 0 : index
    %c0_20 = arith.constant 0 : index
    %18 = vector.load %arg1[%c6, %c0_19, %c0_20] : memref<8x8x8xf32, #tpu.memory_space<vmem>>, vector<1x8x8xf32>
    %19 = vector.shape_cast %18 : vector<1x8x8xf32> to vector<8x8xf32>
    %c48 = arith.constant 48 : index
    %c0_21 = arith.constant 0 : index
    %20 = vector.load %arg13[%c48, %c0_21] : memref<64x8xf32, #tpu.memory_space<vmem>>, vector<8x8xf32>
    tpu.vector_store %arg13[%c48, %c0_21], %19 {strides = array<i32>} : memref<64x8xf32, #tpu.memory_space<vmem>>, vector<8x8xf32>,
    %c7 = arith.constant 7 : index
    %c0_22 = arith.constant 0 : index
    %c0_23 = arith.constant 0 : index
    %21 = vector.load %arg1[%c7, %c0_22, %c0_23] : memref<8x8x8xf32, #tpu.memory_space<vmem>>, vector<1x8x8xf32>
    %22 = vector.shape_cast %21 : vector<1x8x8xf32> to vector<8x8xf32>
    %c56 = arith.constant 56 : index
    %c0_24 = arith.constant 0 : index
    %23 = vector.load %arg13[%c56, %c0_24] : memref<64x8xf32, #tpu.memory_space<vmem>>, vector<8x8xf32>
    tpu.vector_store %arg13[%c56, %c0_24], %22 {strides = array<i32>} : memref<64x8xf32, #tpu.memory_space<vmem>>, vector<8x8xf32>,
    %c0_25 = arith.constant 0 : index
    %c0_26 = arith.constant 0 : index
    %24 = vector.load %arg13[%c0_25, %c0_26] : memref<64x8xf32, #tpu.memory_space<vmem>>, vector<64x8xf32>
    %c0_27 = arith.constant 0 : index
    %c0_28 = arith.constant 0 : index
    %c0_29 = arith.constant 0 : index
    %25 = vector.load %arg2[%c0_27, %c0_28, %c0_29] : memref<4x8x32xf32, #tpu.memory_space<vmem>>, vector<1x8x32xf32>
    %26 = vector.shape_cast %25 : vector<1x8x32xf32> to vector<8x32xf32>
    %cst = arith.constant dense<0.000000e+00> : vector<64x32xf32>
    %27 = tpu.matmul %24, %26, %cst {dimension_numbers = #tpu.dot_dimension_numbers<[1], [0], [0], [1], [0, 0, 1, 1], [], []>} : vector<64x8xf32>, vector<8x32xf32>, vector<64x32xf32> -> vector<64x32xf32>
    %c0_30 = arith.constant 0 : index
    %c0_31 = arith.constant 0 : index
    %c0_32 = arith.constant 0 : index
    %28 = vector.load %arg4[%c0_30, %c0_31, %c0_32] : memref<4x1x32xf32, #tpu.memory_space<vmem>>, vector<1x1x32xf32>
    %29 = vector.shape_cast %28 : vector<1x1x32xf32> to vector<1x32xf32>
    %30 = vector.broadcast %29 : vector<1x32xf32> to vector<64x32xf32>
    %31 = arith.addf %27, %30 : vector<64x32xf32>
    %c1_33 = arith.constant 1 : index
    %c0_34 = arith.constant 0 : index
    %c0_35 = arith.constant 0 : index
    %32 = vector.load %arg2[%c1_33, %c0_34, %c0_35] : memref<4x8x32xf32, #tpu.memory_space<vmem>>, vector<1x8x32xf32>
    %33 = vector.shape_cast %32 : vector<1x8x32xf32> to vector<8x32xf32>
    %cst_36 = arith.constant dense<0.000000e+00> : vector<64x32xf32>
    %34 = tpu.matmul %24, %33, %cst_36 {dimension_numbers = #tpu.dot_dimension_numbers<[1], [0], [0], [1], [0, 0, 1, 1], [], []>} : vector<64x8xf32>, vector<8x32xf32>, vector<64x32xf32> -> vector<64x32xf32>
    %c1_37 = arith.constant 1 : index
    %c0_38 = arith.constant 0 : index
    %c0_39 = arith.constant 0 : index
    %35 = vector.load %arg4[%c1_37, %c0_38, %c0_39] : memref<4x1x32xf32, #tpu.memory_space<vmem>>, vector<1x1x32xf32>
    %36 = vector.shape_cast %35 : vector<1x1x32xf32> to vector<1x32xf32>
    %37 = vector.broadcast %36 : vector<1x32xf32> to vector<64x32xf32>
    %38 = arith.addf %34, %37 : vector<64x32xf32>
    %c2_40 = arith.constant 2 : index
    %c0_41 = arith.constant 0 : index
    %c0_42 = arith.constant 0 : index
    %39 = vector.load %arg2[%c2_40, %c0_41, %c0_42] : memref<4x8x32xf32, #tpu.memory_space<vmem>>, vector<1x8x32xf32>
    %40 = vector.shape_cast %39 : vector<1x8x32xf32> to vector<8x32xf32>
    %cst_43 = arith.constant dense<0.000000e+00> : vector<64x32xf32>
    %41 = tpu.matmul %24, %40, %cst_43 {dimension_numbers = #tpu.dot_dimension_numbers<[1], [0], [0], [1], [0, 0, 1, 1], [], []>} : vector<64x8xf32>, vector<8x32xf32>, vector<64x32xf32> -> vector<64x32xf32>
    %c2_44 = arith.constant 2 : index
    %c0_45 = arith.constant 0 : index
    %c0_46 = arith.constant 0 : index
    %42 = vector.load %arg4[%c2_44, %c0_45, %c0_46] : memref<4x1x32xf32, #tpu.memory_space<vmem>>, vector<1x1x32xf32>
    %43 = vector.shape_cast %42 : vector<1x1x32xf32> to vector<1x32xf32>
    %44 = vector.broadcast %43 : vector<1x32xf32> to vector<64x32xf32>
    %45 = arith.addf %41, %44 : vector<64x32xf32>
    %c3_47 = arith.constant 3 : index
    %c0_48 = arith.constant 0 : index
    %c0_49 = arith.constant 0 : index
    %46 = vector.load %arg2[%c3_47, %c0_48, %c0_49] : memref<4x8x32xf32, #tpu.memory_space<vmem>>, vector<1x8x32xf32>
    %47 = vector.shape_cast %46 : vector<1x8x32xf32> to vector<8x32xf32>
    %cst_50 = arith.constant dense<0.000000e+00> : vector<64x32xf32>
    %48 = tpu.matmul %24, %47, %cst_50 {dimension_numbers = #tpu.dot_dimension_numbers<[1], [0], [0], [1], [0, 0, 1, 1], [], []>} : vector<64x8xf32>, vector<8x32xf32>, vector<64x32xf32> -> vector<64x32xf32>
    %c3_51 = arith.constant 3 : index
    %c0_52 = arith.constant 0 : index
    %c0_53 = arith.constant 0 : index
    %49 = vector.load %arg4[%c3_51, %c0_52, %c0_53] : memref<4x1x32xf32, #tpu.memory_space<vmem>>, vector<1x1x32xf32>
    %50 = vector.shape_cast %49 : vector<1x1x32xf32> to vector<1x32xf32>
    %51 = vector.broadcast %50 : vector<1x32xf32> to vector<64x32xf32>
    %52 = arith.addf %48, %51 : vector<64x32xf32>
    %c0_54 = arith.constant 0 : index
    %c0_55 = arith.constant 0 : index
    %c0_56 = arith.constant 0 : index
    %53 = vector.load %arg3[%c0_54, %c0_55, %c0_56] : memref<4x32x32xf32, #tpu.memory_space<vmem>>, vector<1x32x32xf32>
    %54 = vector.shape_cast %53 : vector<1x32x32xf32> to vector<32x32xf32>
    %c1_57 = arith.constant 1 : index
    %c0_58 = arith.constant 0 : index
    %c0_59 = arith.constant 0 : index
    %55 = vector.load %arg3[%c1_57, %c0_58, %c0_59] : memref<4x32x32xf32, #tpu.memory_space<vmem>>, vector<1x32x32xf32>
    %56 = vector.shape_cast %55 : vector<1x32x32xf32> to vector<32x32xf32>
    %c2_60 = arith.constant 2 : index
    %c0_61 = arith.constant 0 : index
    %c0_62 = arith.constant 0 : index
    %57 = vector.load %arg3[%c2_60, %c0_61, %c0_62] : memref<4x32x32xf32, #tpu.memory_space<vmem>>, vector<1x32x32xf32>
    %58 = vector.shape_cast %57 : vector<1x32x32xf32> to vector<32x32xf32>
    %c3_63 = arith.constant 3 : index
    %c0_64 = arith.constant 0 : index
    %c0_65 = arith.constant 0 : index
    %59 = vector.load %arg3[%c3_63, %c0_64, %c0_65] : memref<4x32x32xf32, #tpu.memory_space<vmem>>, vector<1x32x32xf32>
    %60 = vector.shape_cast %59 : vector<1x32x32xf32> to vector<32x32xf32>
    %cst_66 = arith.constant 0.000000e+00 : f32
    %61 = vector.broadcast %cst_66 : f32 to vector<8x32xf32>
    %cst_67 = arith.constant 0.000000e+00 : f32
    %62 = vector.broadcast %cst_67 : f32 to vector<8x32xf32>
    %63 = vector.extract_strided_slice %31 {offsets = [0, 0], sizes = [8, 32], strides = [1, 1]} : vector<64x32xf32> to vector<8x32xf32>
    %cst_68 = arith.constant dense<0.000000e+00> : vector<8x32xf32>
    %64 = tpu.matmul %61, %54, %cst_68 {dimension_numbers = #tpu.dot_dimension_numbers<[1], [0], [0], [1], [0, 0, 1, 1], [], []>} : vector<8x32xf32>, vector<32x32xf32>, vector<8x32xf32> -> vector<8x32xf32>
    %65 = arith.addf %63, %64 : vector<8x32xf32>
    %66 = vector.extract_strided_slice %38 {offsets = [0, 0], sizes = [8, 32], strides = [1, 1]} : vector<64x32xf32> to vector<8x32xf32>
    %cst_69 = arith.constant dense<0.000000e+00> : vector<8x32xf32>
    %67 = tpu.matmul %61, %56, %cst_69 {dimension_numbers = #tpu.dot_dimension_numbers<[1], [0], [0], [1], [0, 0, 1, 1], [], []>} : vector<8x32xf32>, vector<32x32xf32>, vector<8x32xf32> -> vector<8x32xf32>
    %68 = arith.addf %66, %67 : vector<8x32xf32>
    %69 = vector.extract_strided_slice %45 {offsets = [0, 0], sizes = [8, 32], strides = [1, 1]} : vector<64x32xf32> to vector<8x32xf32>
    %cst_70 = arith.constant dense<0.000000e+00> : vector<8x32xf32>
    %70 = tpu.matmul %61, %58, %cst_70 {dimension_numbers = #tpu.dot_dimension_numbers<[1], [0], [0], [1], [0, 0, 1, 1], [], []>} : vector<8x32xf32>, vector<32x32xf32>, vector<8x32xf32> -> vector<8x32xf32>
    %71 = arith.addf %69, %70 : vector<8x32xf32>
    %72 = vector.extract_strided_slice %52 {offsets = [0, 0], sizes = [8, 32], strides = [1, 1]} : vector<64x32xf32> to vector<8x32xf32>
    %cst_71 = arith.constant dense<0.000000e+00> : vector<8x32xf32>
    %73 = tpu.matmul %61, %60, %cst_71 {dimension_numbers = #tpu.dot_dimension_numbers<[1], [0], [0], [1], [0, 0, 1, 1], [], []>} : vector<8x32xf32>, vector<32x32xf32>, vector<8x32xf32> -> vector<8x32xf32>
    %74 = arith.addf %72, %73 : vector<8x32xf32>
    %75 = arith.negf %65 : vector<8x32xf32>
    %76 = math.exp %75 : vector<8x32xf32>
    %cst_72 = arith.constant 1.000000e+00 : f32
    %77 = vector.broadcast %cst_72 : f32 to vector<8x32xf32>
    %78 = arith.addf %77, %76 : vector<8x32xf32>
    %79 = arith.divf %77, %78 : vector<8x32xf32>
    %80 = arith.negf %68 : vector<8x32xf32>
    %81 = math.exp %80 : vector<8x32xf32>
    %cst_73 = arith.constant 1.000000e+00 : f32
    %82 = vector.broadcast %cst_73 : f32 to vector<8x32xf32>
    %83 = arith.addf %82, %81 : vector<8x32xf32>
    %84 = arith.divf %82, %83 : vector<8x32xf32>
    %85 = math.tanh %71 : vector<8x32xf32>
    %86 = arith.negf %74 : vector<8x32xf32>
    %87 = math.exp %86 : vector<8x32xf32>
    %cst_74 = arith.constant 1.000000e+00 : f32
    %88 = vector.broadcast %cst_74 : f32 to vector<8x32xf32>
    %89 = arith.addf %88, %87 : vector<8x32xf32>
    %90 = arith.divf %88, %89 : vector<8x32xf32>
    %91 = arith.mulf %84, %62 : vector<8x32xf32>
    %92 = arith.mulf %79, %85 : vector<8x32xf32>
    %93 = arith.addf %91, %92 : vector<8x32xf32>
    %94 = math.tanh %93 : vector<8x32xf32>
    %95 = arith.mulf %90, %94 : vector<8x32xf32>
    %c0_75 = arith.constant 0 : index
    %c0_76 = arith.constant 0 : index
    %96 = vector.load %arg14[%c0_75, %c0_76] : memref<64x32xf32, #tpu.memory_space<vmem>>, vector<8x32xf32>
    tpu.vector_store %arg14[%c0_75, %c0_76], %95 {strides = array<i32>} : memref<64x32xf32, #tpu.memory_space<vmem>>, vector<8x32xf32>,
    %97 = vector.extract_strided_slice %31 {offsets = [8, 0], sizes = [8, 32], strides = [1, 1]} : vector<64x32xf32> to vector<8x32xf32>
    %cst_77 = arith.constant dense<0.000000e+00> : vector<8x32xf32>
    %98 = tpu.matmul %95, %54, %cst_77 {dimension_numbers = #tpu.dot_dimension_numbers<[1], [0], [0], [1], [0, 0, 1, 1], [], []>} : vector<8x32xf32>, vector<32x32xf32>, vector<8x32xf32> -> vector<8x32xf32>
    %99 = arith.addf %97, %98 : vector<8x32xf32>
    %100 = vector.extract_strided_slice %38 {offsets = [8, 0], sizes = [8, 32], strides = [1, 1]} : vector<64x32xf32> to vector<8x32xf32>
    %cst_78 = arith.constant dense<0.000000e+00> : vector<8x32xf32>
    %101 = tpu.matmul %95, %56, %cst_78 {dimension_numbers = #tpu.dot_dimension_numbers<[1], [0], [0], [1], [0, 0, 1, 1], [], []>} : vector<8x32xf32>, vector<32x32xf32>, vector<8x32xf32> -> vector<8x32xf32>
    %102 = arith.addf %100, %101 : vector<8x32xf32>
    %103 = vector.extract_strided_slice %45 {offsets = [8, 0], sizes = [8, 32], strides = [1, 1]} : vector<64x32xf32> to vector<8x32xf32>
    %cst_79 = arith.constant dense<0.000000e+00> : vector<8x32xf32>
    %104 = tpu.matmul %95, %58, %cst_79 {dimension_numbers = #tpu.dot_dimension_numbers<[1], [0], [0], [1], [0, 0, 1, 1], [], []>} : vector<8x32xf32>, vector<32x32xf32>, vector<8x32xf32> -> vector<8x32xf32>
    %105 = arith.addf %103, %104 : vector<8x32xf32>
    %106 = vector.extract_strided_slice %52 {offsets = [8, 0], sizes = [8, 32], strides = [1, 1]} : vector<64x32xf32> to vector<8x32xf32>
    %cst_80 = arith.constant dense<0.000000e+00> : vector<8x32xf32>
    %107 = tpu.matmul %95, %60, %cst_80 {dimension_numbers = #tpu.dot_dimension_numbers<[1], [0], [0], [1], [0, 0, 1, 1], [], []>} : vector<8x32xf32>, vector<32x32xf32>, vector<8x32xf32> -> vector<8x32xf32>
    %108 = arith.addf %106, %107 : vector<8x32xf32>
    %109 = arith.negf %99 : vector<8x32xf32>
    %110 = math.exp %109 : vector<8x32xf32>
    %cst_81 = arith.constant 1.000000e+00 : f32
    %111 = vector.broadcast %cst_81 : f32 to vector<8x32xf32>
    %112 = arith.addf %111, %110 : vector<8x32xf32>
    %113 = arith.divf %111, %112 : vector<8x32xf32>
    %114 = arith.negf %102 : vector<8x32xf32>
    %115 = math.exp %114 : vector<8x32xf32>
    %cst_82 = arith.constant 1.000000e+00 : f32
    %116 = vector.broadcast %cst_82 : f32 to vector<8x32xf32>
    %117 = arith.addf %116, %115 : vector<8x32xf32>
    %118 = arith.divf %116, %117 : vector<8x32xf32>
    %119 = math.tanh %105 : vector<8x32xf32>
    %120 = arith.negf %108 : vector<8x32xf32>
    %121 = math.exp %120 : vector<8x32xf32>
    %cst_83 = arith.constant 1.000000e+00 : f32
    %122 = vector.broadcast %cst_83 : f32 to vector<8x32xf32>
    %123 = arith.addf %122, %121 : vector<8x32xf32>
    %124 = arith.divf %122, %123 : vector<8x32xf32>
    %125 = arith.mulf %118, %93 : vector<8x32xf32>
    %126 = arith.mulf %113, %119 : vector<8x32xf32>
    %127 = arith.addf %125, %126 : vector<8x32xf32>
    %128 = math.tanh %127 : vector<8x32xf32>
    %129 = arith.mulf %124, %128 : vector<8x32xf32>
    %c8_84 = arith.constant 8 : index
    %c0_85 = arith.constant 0 : index
    %130 = vector.load %arg14[%c8_84, %c0_85] : memref<64x32xf32, #tpu.memory_space<vmem>>, vector<8x32xf32>
    tpu.vector_store %arg14[%c8_84, %c0_85], %129 {strides = array<i32>} : memref<64x32xf32, #tpu.memory_space<vmem>>, vector<8x32xf32>,
    %131 = vector.extract_strided_slice %31 {offsets = [16, 0], sizes = [8, 32], strides = [1, 1]} : vector<64x32xf32> to vector<8x32xf32>
    %cst_86 = arith.constant dense<0.000000e+00> : vector<8x32xf32>
    %132 = tpu.matmul %129, %54, %cst_86 {dimension_numbers = #tpu.dot_dimension_numbers<[1], [0], [0], [1], [0, 0, 1, 1], [], []>} : vector<8x32xf32>, vector<32x32xf32>, vector<8x32xf32> -> vector<8x32xf32>
    %133 = arith.addf %131, %132 : vector<8x32xf32>
    %134 = vector.extract_strided_slice %38 {offsets = [16, 0], sizes = [8, 32], strides = [1, 1]} : vector<64x32xf32> to vector<8x32xf32>
    %cst_87 = arith.constant dense<0.000000e+00> : vector<8x32xf32>
    %135 = tpu.matmul %129, %56, %cst_87 {dimension_numbers = #tpu.dot_dimension_numbers<[1], [0], [0], [1], [0, 0, 1, 1], [], []>} : vector<8x32xf32>, vector<32x32xf32>, vector<8x32xf32> -> vector<8x32xf32>
    %136 = arith.addf %134, %135 : vector<8x32xf32>
    %137 = vector.extract_strided_slice %45 {offsets = [16, 0], sizes = [8, 32], strides = [1, 1]} : vector<64x32xf32> to vector<8x32xf32>
    %cst_88 = arith.constant dense<0.000000e+00> : vector<8x32xf32>
    %138 = tpu.matmul %129, %58, %cst_88 {dimension_numbers = #tpu.dot_dimension_numbers<[1], [0], [0], [1], [0, 0, 1, 1], [], []>} : vector<8x32xf32>, vector<32x32xf32>, vector<8x32xf32> -> vector<8x32xf32>
    %139 = arith.addf %137, %138 : vector<8x32xf32>
    %140 = vector.extract_strided_slice %52 {offsets = [16, 0], sizes = [8, 32], strides = [1, 1]} : vector<64x32xf32> to vector<8x32xf32>
    %cst_89 = arith.constant dense<0.000000e+00> : vector<8x32xf32>
    %141 = tpu.matmul %129, %60, %cst_89 {dimension_numbers = #tpu.dot_dimension_numbers<[1], [0], [0], [1], [0, 0, 1, 1], [], []>} : vector<8x32xf32>, vector<32x32xf32>, vector<8x32xf32> -> vector<8x32xf32>
    %142 = arith.addf %140, %141 : vector<8x32xf32>
    %143 = arith.negf %133 : vector<8x32xf32>
    %144 = math.exp %143 : vector<8x32xf32>
    %cst_90 = arith.constant 1.000000e+00 : f32
    %145 = vector.broadcast %cst_90 : f32 to vector<8x32xf32>
    %146 = arith.addf %145, %144 : vector<8x32xf32>
    %147 = arith.divf %145, %146 : vector<8x32xf32>
    %148 = arith.negf %136 : vector<8x32xf32>
    %149 = math.exp %148 : vector<8x32xf32>
    %cst_91 = arith.constant 1.000000e+00 : f32
    %150 = vector.broadcast %cst_91 : f32 to vector<8x32xf32>
    %151 = arith.addf %150, %149 : vector<8x32xf32>
    %152 = arith.divf %150, %151 : vector<8x32xf32>
    %153 = math.tanh %139 : vector<8x32xf32>
    %154 = arith.negf %142 : vector<8x32xf32>
    %155 = math.exp %154 : vector<8x32xf32>
    %cst_92 = arith.constant 1.000000e+00 : f32
    %156 = vector.broadcast %cst_92 : f32 to vector<8x32xf32>
    %157 = arith.addf %156, %155 : vector<8x32xf32>
    %158 = arith.divf %156, %157 : vector<8x32xf32>
    %159 = arith.mulf %152, %127 : vector<8x32xf32>
    %160 = arith.mulf %147, %153 : vector<8x32xf32>
    %161 = arith.addf %159, %160 : vector<8x32xf32>
    %162 = math.tanh %161 : vector<8x32xf32>
    %163 = arith.mulf %158, %162 : vector<8x32xf32>
    %c16_93 = arith.constant 16 : index
    %c0_94 = arith.constant 0 : index
    %164 = vector.load %arg14[%c16_93, %c0_94] : memref<64x32xf32, #tpu.memory_space<vmem>>, vector<8x32xf32>
    tpu.vector_store %arg14[%c16_93, %c0_94], %163 {strides = array<i32>} : memref<64x32xf32, #tpu.memory_space<vmem>>, vector<8x32xf32>,
    %165 = vector.extract_strided_slice %31 {offsets = [24, 0], sizes = [8, 32], strides = [1, 1]} : vector<64x32xf32> to vector<8x32xf32>
    %cst_95 = arith.constant dense<0.000000e+00> : vector<8x32xf32>
    %166 = tpu.matmul %163, %54, %cst_95 {dimension_numbers = #tpu.dot_dimension_numbers<[1], [0], [0], [1], [0, 0, 1, 1], [], []>} : vector<8x32xf32>, vector<32x32xf32>, vector<8x32xf32> -> vector<8x32xf32>
    %167 = arith.addf %165, %166 : vector<8x32xf32>
    %168 = vector.extract_strided_slice %38 {offsets = [24, 0], sizes = [8, 32], strides = [1, 1]} : vector<64x32xf32> to vector<8x32xf32>
    %cst_96 = arith.constant dense<0.000000e+00> : vector<8x32xf32>
    %169 = tpu.matmul %163, %56, %cst_96 {dimension_numbers = #tpu.dot_dimension_numbers<[1], [0], [0], [1], [0, 0, 1, 1], [], []>} : vector<8x32xf32>, vector<32x32xf32>, vector<8x32xf32> -> vector<8x32xf32>
    %170 = arith.addf %168, %169 : vector<8x32xf32>
    %171 = vector.extract_strided_slice %45 {offsets = [24, 0], sizes = [8, 32], strides = [1, 1]} : vector<64x32xf32> to vector<8x32xf32>
    %cst_97 = arith.constant dense<0.000000e+00> : vector<8x32xf32>
    %172 = tpu.matmul %163, %58, %cst_97 {dimension_numbers = #tpu.dot_dimension_numbers<[1], [0], [0], [1], [0, 0, 1, 1], [], []>} : vector<8x32xf32>, vector<32x32xf32>, vector<8x32xf32> -> vector<8x32xf32>
    %173 = arith.addf %171, %172 : vector<8x32xf32>
    %174 = vector.extract_strided_slice %52 {offsets = [24, 0], sizes = [8, 32], strides = [1, 1]} : vector<64x32xf32> to vector<8x32xf32>
    %cst_98 = arith.constant dense<0.000000e+00> : vector<8x32xf32>
    %175 = tpu.matmul %163, %60, %cst_98 {dimension_numbers = #tpu.dot_dimension_numbers<[1], [0], [0], [1], [0, 0, 1, 1], [], []>} : vector<8x32xf32>, vector<32x32xf32>, vector<8x32xf32> -> vector<8x32xf32>
    %176 = arith.addf %174, %175 : vector<8x32xf32>
    %177 = arith.negf %167 : vector<8x32xf32>
    %178 = math.exp %177 : vector<8x32xf32>
    %cst_99 = arith.constant 1.000000e+00 : f32
    %179 = vector.broadcast %cst_99 : f32 to vector<8x32xf32>
    %180 = arith.addf %179, %178 : vector<8x32xf32>
    %181 = arith.divf %179, %180 : vector<8x32xf32>
    %182 = arith.negf %170 : vector<8x32xf32>
    %183 = math.exp %182 : vector<8x32xf32>
    %cst_100 = arith.constant 1.000000e+00 : f32
    %184 = vector.broadcast %cst_100 : f32 to vector<8x32xf32>
    %185 = arith.addf %184, %183 : vector<8x32xf32>
    %186 = arith.divf %184, %185 : vector<8x32xf32>
    %187 = math.tanh %173 : vector<8x32xf32>
    %188 = arith.negf %176 : vector<8x32xf32>
    %189 = math.exp %188 : vector<8x32xf32>
    %cst_101 = arith.constant 1.000000e+00 : f32
    %190 = vector.broadcast %cst_101 : f32 to vector<8x32xf32>
    %191 = arith.addf %190, %189 : vector<8x32xf32>
    %192 = arith.divf %190, %191 : vector<8x32xf32>
    %193 = arith.mulf %186, %161 : vector<8x32xf32>
    %194 = arith.mulf %181, %187 : vector<8x32xf32>
    %195 = arith.addf %193, %194 : vector<8x32xf32>
    %196 = math.tanh %195 : vector<8x32xf32>
    %197 = arith.mulf %192, %196 : vector<8x32xf32>
    %c24_102 = arith.constant 24 : index
    %c0_103 = arith.constant 0 : index
    %198 = vector.load %arg14[%c24_102, %c0_103] : memref<64x32xf32, #tpu.memory_space<vmem>>, vector<8x32xf32>
    tpu.vector_store %arg14[%c24_102, %c0_103], %197 {strides = array<i32>} : memref<64x32xf32, #tpu.memory_space<vmem>>, vector<8x32xf32>,
    %199 = vector.extract_strided_slice %31 {offsets = [32, 0], sizes = [8, 32], strides = [1, 1]} : vector<64x32xf32> to vector<8x32xf32>
    %cst_104 = arith.constant dense<0.000000e+00> : vector<8x32xf32>
    %200 = tpu.matmul %197, %54, %cst_104 {dimension_numbers = #tpu.dot_dimension_numbers<[1], [0], [0], [1], [0, 0, 1, 1], [], []>} : vector<8x32xf32>, vector<32x32xf32>, vector<8x32xf32> -> vector<8x32xf32>
    %201 = arith.addf %199, %200 : vector<8x32xf32>
    %202 = vector.extract_strided_slice %38 {offsets = [32, 0], sizes = [8, 32], strides = [1, 1]} : vector<64x32xf32> to vector<8x32xf32>
    %cst_105 = arith.constant dense<0.000000e+00> : vector<8x32xf32>
    %203 = tpu.matmul %197, %56, %cst_105 {dimension_numbers = #tpu.dot_dimension_numbers<[1], [0], [0], [1], [0, 0, 1, 1], [], []>} : vector<8x32xf32>, vector<32x32xf32>, vector<8x32xf32> -> vector<8x32xf32>
    %204 = arith.addf %202, %203 : vector<8x32xf32>
    %205 = vector.extract_strided_slice %45 {offsets = [32, 0], sizes = [8, 32], strides = [1, 1]} : vector<64x32xf32> to vector<8x32xf32>
    %cst_106 = arith.constant dense<0.000000e+00> : vector<8x32xf32>
    %206 = tpu.matmul %197, %58, %cst_106 {dimension_numbers = #tpu.dot_dimension_numbers<[1], [0], [0], [1], [0, 0, 1, 1], [], []>} : vector<8x32xf32>, vector<32x32xf32>, vector<8x32xf32> -> vector<8x32xf32>
    %207 = arith.addf %205, %206 : vector<8x32xf32>
    %208 = vector.extract_strided_slice %52 {offsets = [32, 0], sizes = [8, 32], strides = [1, 1]} : vector<64x32xf32> to vector<8x32xf32>
    %cst_107 = arith.constant dense<0.000000e+00> : vector<8x32xf32>
    %209 = tpu.matmul %197, %60, %cst_107 {dimension_numbers = #tpu.dot_dimension_numbers<[1], [0], [0], [1], [0, 0, 1, 1], [], []>} : vector<8x32xf32>, vector<32x32xf32>, vector<8x32xf32> -> vector<8x32xf32>
    %210 = arith.addf %208, %209 : vector<8x32xf32>
    %211 = arith.negf %201 : vector<8x32xf32>
    %212 = math.exp %211 : vector<8x32xf32>
    %cst_108 = arith.constant 1.000000e+00 : f32
    %213 = vector.broadcast %cst_108 : f32 to vector<8x32xf32>
    %214 = arith.addf %213, %212 : vector<8x32xf32>
    %215 = arith.divf %213, %214 : vector<8x32xf32>
    %216 = arith.negf %204 : vector<8x32xf32>
    %217 = math.exp %216 : vector<8x32xf32>
    %cst_109 = arith.constant 1.000000e+00 : f32
    %218 = vector.broadcast %cst_109 : f32 to vector<8x32xf32>
    %219 = arith.addf %218, %217 : vector<8x32xf32>
    %220 = arith.divf %218, %219 : vector<8x32xf32>
    %221 = math.tanh %207 : vector<8x32xf32>
    %222 = arith.negf %210 : vector<8x32xf32>
    %223 = math.exp %222 : vector<8x32xf32>
    %cst_110 = arith.constant 1.000000e+00 : f32
    %224 = vector.broadcast %cst_110 : f32 to vector<8x32xf32>
    %225 = arith.addf %224, %223 : vector<8x32xf32>
    %226 = arith.divf %224, %225 : vector<8x32xf32>
    %227 = arith.mulf %220, %195 : vector<8x32xf32>
    %228 = arith.mulf %215, %221 : vector<8x32xf32>
    %229 = arith.addf %227, %228 : vector<8x32xf32>
    %230 = math.tanh %229 : vector<8x32xf32>
    %231 = arith.mulf %226, %230 : vector<8x32xf32>
    %c32_111 = arith.constant 32 : index
    %c0_112 = arith.constant 0 : index
    %232 = vector.load %arg14[%c32_111, %c0_112] : memref<64x32xf32, #tpu.memory_space<vmem>>, vector<8x32xf32>
    tpu.vector_store %arg14[%c32_111, %c0_112], %231 {strides = array<i32>} : memref<64x32xf32, #tpu.memory_space<vmem>>, vector<8x32xf32>,
    %233 = vector.extract_strided_slice %31 {offsets = [40, 0], sizes = [8, 32], strides = [1, 1]} : vector<64x32xf32> to vector<8x32xf32>
    %cst_113 = arith.constant dense<0.000000e+00> : vector<8x32xf32>
    %234 = tpu.matmul %231, %54, %cst_113 {dimension_numbers = #tpu.dot_dimension_numbers<[1], [0], [0], [1], [0, 0, 1, 1], [], []>} : vector<8x32xf32>, vector<32x32xf32>, vector<8x32xf32> -> vector<8x32xf32>
    %235 = arith.addf %233, %234 : vector<8x32xf32>
    %236 = vector.extract_strided_slice %38 {offsets = [40, 0], sizes = [8, 32], strides = [1, 1]} : vector<64x32xf32> to vector<8x32xf32>
    %cst_114 = arith.constant dense<0.000000e+00> : vector<8x32xf32>
    %237 = tpu.matmul %231, %56, %cst_114 {dimension_numbers = #tpu.dot_dimension_numbers<[1], [0], [0], [1], [0, 0, 1, 1], [], []>} : vector<8x32xf32>, vector<32x32xf32>, vector<8x32xf32> -> vector<8x32xf32>
    %238 = arith.addf %236, %237 : vector<8x32xf32>
    %239 = vector.extract_strided_slice %45 {offsets = [40, 0], sizes = [8, 32], strides = [1, 1]} : vector<64x32xf32> to vector<8x32xf32>
    %cst_115 = arith.constant dense<0.000000e+00> : vector<8x32xf32>
    %240 = tpu.matmul %231, %58, %cst_115 {dimension_numbers = #tpu.dot_dimension_numbers<[1], [0], [0], [1], [0, 0, 1, 1], [], []>} : vector<8x32xf32>, vector<32x32xf32>, vector<8x32xf32> -> vector<8x32xf32>
    %241 = arith.addf %239, %240 : vector<8x32xf32>
    %242 = vector.extract_strided_slice %52 {offsets = [40, 0], sizes = [8, 32], strides = [1, 1]} : vector<64x32xf32> to vector<8x32xf32>
    %cst_116 = arith.constant dense<0.000000e+00> : vector<8x32xf32>
    %243 = tpu.matmul %231, %60, %cst_116 {dimension_numbers = #tpu.dot_dimension_numbers<[1], [0], [0], [1], [0, 0, 1, 1], [], []>} : vector<8x32xf32>, vector<32x32xf32>, vector<8x32xf32> -> vector<8x32xf32>
    %244 = arith.addf %242, %243 : vector<8x32xf32>
    %245 = arith.negf %235 : vector<8x32xf32>
    %246 = math.exp %245 : vector<8x32xf32>
    %cst_117 = arith.constant 1.000000e+00 : f32
    %247 = vector.broadcast %cst_117 : f32 to vector<8x32xf32>
    %248 = arith.addf %247, %246 : vector<8x32xf32>
    %249 = arith.divf %247, %248 : vector<8x32xf32>
    %250 = arith.negf %238 : vector<8x32xf32>
    %251 = math.exp %250 : vector<8x32xf32>
    %cst_118 = arith.constant 1.000000e+00 : f32
    %252 = vector.broadcast %cst_118 : f32 to vector<8x32xf32>
    %253 = arith.addf %252, %251 : vector<8x32xf32>
    %254 = arith.divf %252, %253 : vector<8x32xf32>
    %255 = math.tanh %241 : vector<8x32xf32>
    %256 = arith.negf %244 : vector<8x32xf32>
    %257 = math.exp %256 : vector<8x32xf32>
    %cst_119 = arith.constant 1.000000e+00 : f32
    %258 = vector.broadcast %cst_119 : f32 to vector<8x32xf32>
    %259 = arith.addf %258, %257 : vector<8x32xf32>
    %260 = arith.divf %258, %259 : vector<8x32xf32>
    %261 = arith.mulf %254, %229 : vector<8x32xf32>
    %262 = arith.mulf %249, %255 : vector<8x32xf32>
    %263 = arith.addf %261, %262 : vector<8x32xf32>
    %264 = math.tanh %263 : vector<8x32xf32>
    %265 = arith.mulf %260, %264 : vector<8x32xf32>
    %c40_120 = arith.constant 40 : index
    %c0_121 = arith.constant 0 : index
    %266 = vector.load %arg14[%c40_120, %c0_121] : memref<64x32xf32, #tpu.memory_space<vmem>>, vector<8x32xf32>
    tpu.vector_store %arg14[%c40_120, %c0_121], %265 {strides = array<i32>} : memref<64x32xf32, #tpu.memory_space<vmem>>, vector<8x32xf32>,
    %267 = vector.extract_strided_slice %31 {offsets = [48, 0], sizes = [8, 32], strides = [1, 1]} : vector<64x32xf32> to vector<8x32xf32>
    %cst_122 = arith.constant dense<0.000000e+00> : vector<8x32xf32>
    %268 = tpu.matmul %265, %54, %cst_122 {dimension_numbers = #tpu.dot_dimension_numbers<[1], [0], [0], [1], [0, 0, 1, 1], [], []>} : vector<8x32xf32>, vector<32x32xf32>, vector<8x32xf32> -> vector<8x32xf32>
    %269 = arith.addf %267, %268 : vector<8x32xf32>
    %270 = vector.extract_strided_slice %38 {offsets = [48, 0], sizes = [8, 32], strides = [1, 1]} : vector<64x32xf32> to vector<8x32xf32>
    %cst_123 = arith.constant dense<0.000000e+00> : vector<8x32xf32>
    %271 = tpu.matmul %265, %56, %cst_123 {dimension_numbers = #tpu.dot_dimension_numbers<[1], [0], [0], [1], [0, 0, 1, 1], [], []>} : vector<8x32xf32>, vector<32x32xf32>, vector<8x32xf32> -> vector<8x32xf32>
    %272 = arith.addf %270, %271 : vector<8x32xf32>
    %273 = vector.extract_strided_slice %45 {offsets = [48, 0], sizes = [8, 32], strides = [1, 1]} : vector<64x32xf32> to vector<8x32xf32>
    %cst_124 = arith.constant dense<0.000000e+00> : vector<8x32xf32>
    %274 = tpu.matmul %265, %58, %cst_124 {dimension_numbers = #tpu.dot_dimension_numbers<[1], [0], [0], [1], [0, 0, 1, 1], [], []>} : vector<8x32xf32>, vector<32x32xf32>, vector<8x32xf32> -> vector<8x32xf32>
    %275 = arith.addf %273, %274 : vector<8x32xf32>
    %276 = vector.extract_strided_slice %52 {offsets = [48, 0], sizes = [8, 32], strides = [1, 1]} : vector<64x32xf32> to vector<8x32xf32>
    %cst_125 = arith.constant dense<0.000000e+00> : vector<8x32xf32>
    %277 = tpu.matmul %265, %60, %cst_125 {dimension_numbers = #tpu.dot_dimension_numbers<[1], [0], [0], [1], [0, 0, 1, 1], [], []>} : vector<8x32xf32>, vector<32x32xf32>, vector<8x32xf32> -> vector<8x32xf32>
    %278 = arith.addf %276, %277 : vector<8x32xf32>
    %279 = arith.negf %269 : vector<8x32xf32>
    %280 = math.exp %279 : vector<8x32xf32>
    %cst_126 = arith.constant 1.000000e+00 : f32
    %281 = vector.broadcast %cst_126 : f32 to vector<8x32xf32>
    %282 = arith.addf %281, %280 : vector<8x32xf32>
    %283 = arith.divf %281, %282 : vector<8x32xf32>
    %284 = arith.negf %272 : vector<8x32xf32>
    %285 = math.exp %284 : vector<8x32xf32>
    %cst_127 = arith.constant 1.000000e+00 : f32
    %286 = vector.broadcast %cst_127 : f32 to vector<8x32xf32>
    %287 = arith.addf %286, %285 : vector<8x32xf32>
    %288 = arith.divf %286, %287 : vector<8x32xf32>
    %289 = math.tanh %275 : vector<8x32xf32>
    %290 = arith.negf %278 : vector<8x32xf32>
    %291 = math.exp %290 : vector<8x32xf32>
    %cst_128 = arith.constant 1.000000e+00 : f32
    %292 = vector.broadcast %cst_128 : f32 to vector<8x32xf32>
    %293 = arith.addf %292, %291 : vector<8x32xf32>
    %294 = arith.divf %292, %293 : vector<8x32xf32>
    %295 = arith.mulf %288, %263 : vector<8x32xf32>
    %296 = arith.mulf %283, %289 : vector<8x32xf32>
    %297 = arith.addf %295, %296 : vector<8x32xf32>
    %298 = math.tanh %297 : vector<8x32xf32>
    %299 = arith.mulf %294, %298 : vector<8x32xf32>
    %c48_129 = arith.constant 48 : index
    %c0_130 = arith.constant 0 : index
    %300 = vector.load %arg14[%c48_129, %c0_130] : memref<64x32xf32, #tpu.memory_space<vmem>>, vector<8x32xf32>
    tpu.vector_store %arg14[%c48_129, %c0_130], %299 {strides = array<i32>} : memref<64x32xf32, #tpu.memory_space<vmem>>, vector<8x32xf32>,
    %301 = vector.extract_strided_slice %31 {offsets = [56, 0], sizes = [8, 32], strides = [1, 1]} : vector<64x32xf32> to vector<8x32xf32>
    %cst_131 = arith.constant dense<0.000000e+00> : vector<8x32xf32>
    %302 = tpu.matmul %299, %54, %cst_131 {dimension_numbers = #tpu.dot_dimension_numbers<[1], [0], [0], [1], [0, 0, 1, 1], [], []>} : vector<8x32xf32>, vector<32x32xf32>, vector<8x32xf32> -> vector<8x32xf32>
    %303 = arith.addf %301, %302 : vector<8x32xf32>
    %304 = vector.extract_strided_slice %38 {offsets = [56, 0], sizes = [8, 32], strides = [1, 1]} : vector<64x32xf32> to vector<8x32xf32>
    %cst_132 = arith.constant dense<0.000000e+00> : vector<8x32xf32>
    %305 = tpu.matmul %299, %56, %cst_132 {dimension_numbers = #tpu.dot_dimension_numbers<[1], [0], [0], [1], [0, 0, 1, 1], [], []>} : vector<8x32xf32>, vector<32x32xf32>, vector<8x32xf32> -> vector<8x32xf32>
    %306 = arith.addf %304, %305 : vector<8x32xf32>
    %307 = vector.extract_strided_slice %45 {offsets = [56, 0], sizes = [8, 32], strides = [1, 1]} : vector<64x32xf32> to vector<8x32xf32>
    %cst_133 = arith.constant dense<0.000000e+00> : vector<8x32xf32>
    %308 = tpu.matmul %299, %58, %cst_133 {dimension_numbers = #tpu.dot_dimension_numbers<[1], [0], [0], [1], [0, 0, 1, 1], [], []>} : vector<8x32xf32>, vector<32x32xf32>, vector<8x32xf32> -> vector<8x32xf32>
    %309 = arith.addf %307, %308 : vector<8x32xf32>
    %310 = vector.extract_strided_slice %52 {offsets = [56, 0], sizes = [8, 32], strides = [1, 1]} : vector<64x32xf32> to vector<8x32xf32>
    %cst_134 = arith.constant dense<0.000000e+00> : vector<8x32xf32>
    %311 = tpu.matmul %299, %60, %cst_134 {dimension_numbers = #tpu.dot_dimension_numbers<[1], [0], [0], [1], [0, 0, 1, 1], [], []>} : vector<8x32xf32>, vector<32x32xf32>, vector<8x32xf32> -> vector<8x32xf32>
    %312 = arith.addf %310, %311 : vector<8x32xf32>
    %313 = arith.negf %303 : vector<8x32xf32>
    %314 = math.exp %313 : vector<8x32xf32>
    %cst_135 = arith.constant 1.000000e+00 : f32
    %315 = vector.broadcast %cst_135 : f32 to vector<8x32xf32>
    %316 = arith.addf %315, %314 : vector<8x32xf32>
    %317 = arith.divf %315, %316 : vector<8x32xf32>
    %318 = arith.negf %306 : vector<8x32xf32>
    %319 = math.exp %318 : vector<8x32xf32>
    %cst_136 = arith.constant 1.000000e+00 : f32
    %320 = vector.broadcast %cst_136 : f32 to vector<8x32xf32>
    %321 = arith.addf %320, %319 : vector<8x32xf32>
    %322 = arith.divf %320, %321 : vector<8x32xf32>
    %323 = math.tanh %309 : vector<8x32xf32>
    %324 = arith.negf %312 : vector<8x32xf32>
    %325 = math.exp %324 : vector<8x32xf32>
    %cst_137 = arith.constant 1.000000e+00 : f32
    %326 = vector.broadcast %cst_137 : f32 to vector<8x32xf32>
    %327 = arith.addf %326, %325 : vector<8x32xf32>
    %328 = arith.divf %326, %327 : vector<8x32xf32>
    %329 = arith.mulf %322, %297 : vector<8x32xf32>
    %330 = arith.mulf %317, %323 : vector<8x32xf32>
    %331 = arith.addf %329, %330 : vector<8x32xf32>
    %332 = math.tanh %331 : vector<8x32xf32>
    %333 = arith.mulf %328, %332 : vector<8x32xf32>
    %c56_138 = arith.constant 56 : index
    %c0_139 = arith.constant 0 : index
    %334 = vector.load %arg14[%c56_138, %c0_139] : memref<64x32xf32, #tpu.memory_space<vmem>>, vector<8x32xf32>
    tpu.vector_store %arg14[%c56_138, %c0_139], %333 {strides = array<i32>} : memref<64x32xf32, #tpu.memory_space<vmem>>, vector<8x32xf32>,
    %c0_140 = arith.constant 0 : index
    %c0_141 = arith.constant 0 : index
    %335 = vector.load %arg14[%c0_140, %c0_141] : memref<64x32xf32, #tpu.memory_space<vmem>>, vector<64x32xf32>
    %c0_142 = arith.constant 0 : index
    %c0_143 = arith.constant 0 : index
    %c0_144 = arith.constant 0 : index
    %336 = vector.load %arg5[%c0_142, %c0_143, %c0_144] : memref<4x32x32xf32, #tpu.memory_space<vmem>>, vector<1x32x32xf32>
    %337 = vector.shape_cast %336 : vector<1x32x32xf32> to vector<32x32xf32>
    %cst_145 = arith.constant dense<0.000000e+00> : vector<64x32xf32>
    %338 = tpu.matmul %335, %337, %cst_145 {dimension_numbers = #tpu.dot_dimension_numbers<[1], [0], [0], [1], [0, 0, 1, 1], [], []>} : vector<64x32xf32>, vector<32x32xf32>, vector<64x32xf32> -> vector<64x32xf32>
    %c0_146 = arith.constant 0 : index
    %c0_147 = arith.constant 0 : index
    %c0_148 = arith.constant 0 : index
    %339 = vector.load %arg7[%c0_146, %c0_147, %c0_148] : memref<4x1x32xf32, #tpu.memory_space<vmem>>, vector<1x1x32xf32>
    %340 = vector.shape_cast %339 : vector<1x1x32xf32> to vector<1x32xf32>
    %341 = vector.broadcast %340 : vector<1x32xf32> to vector<64x32xf32>
    %342 = arith.addf %338, %341 : vector<64x32xf32>
    %c1_149 = arith.constant 1 : index
    %c0_150 = arith.constant 0 : index
    %c0_151 = arith.constant 0 : index
    %343 = vector.load %arg5[%c1_149, %c0_150, %c0_151] : memref<4x32x32xf32, #tpu.memory_space<vmem>>, vector<1x32x32xf32>
    %344 = vector.shape_cast %343 : vector<1x32x32xf32> to vector<32x32xf32>
    %cst_152 = arith.constant dense<0.000000e+00> : vector<64x32xf32>
    %345 = tpu.matmul %335, %344, %cst_152 {dimension_numbers = #tpu.dot_dimension_numbers<[1], [0], [0], [1], [0, 0, 1, 1], [], []>} : vector<64x32xf32>, vector<32x32xf32>, vector<64x32xf32> -> vector<64x32xf32>
    %c1_153 = arith.constant 1 : index
    %c0_154 = arith.constant 0 : index
    %c0_155 = arith.constant 0 : index
    %346 = vector.load %arg7[%c1_153, %c0_154, %c0_155] : memref<4x1x32xf32, #tpu.memory_space<vmem>>, vector<1x1x32xf32>
    %347 = vector.shape_cast %346 : vector<1x1x32xf32> to vector<1x32xf32>
    %348 = vector.broadcast %347 : vector<1x32xf32> to vector<64x32xf32>
    %349 = arith.addf %345, %348 : vector<64x32xf32>
    %c2_156 = arith.constant 2 : index
    %c0_157 = arith.constant 0 : index
    %c0_158 = arith.constant 0 : index
    %350 = vector.load %arg5[%c2_156, %c0_157, %c0_158] : memref<4x32x32xf32, #tpu.memory_space<vmem>>, vector<1x32x32xf32>
    %351 = vector.shape_cast %350 : vector<1x32x32xf32> to vector<32x32xf32>
    %cst_159 = arith.constant dense<0.000000e+00> : vector<64x32xf32>
    %352 = tpu.matmul %335, %351, %cst_159 {dimension_numbers = #tpu.dot_dimension_numbers<[1], [0], [0], [1], [0, 0, 1, 1], [], []>} : vector<64x32xf32>, vector<32x32xf32>, vector<64x32xf32> -> vector<64x32xf32>
    %c2_160 = arith.constant 2 : index
    %c0_161 = arith.constant 0 : index
    %c0_162 = arith.constant 0 : index
    %353 = vector.load %arg7[%c2_160, %c0_161, %c0_162] : memref<4x1x32xf32, #tpu.memory_space<vmem>>, vector<1x1x32xf32>
    %354 = vector.shape_cast %353 : vector<1x1x32xf32> to vector<1x32xf32>
    %355 = vector.broadcast %354 : vector<1x32xf32> to vector<64x32xf32>
    %356 = arith.addf %352, %355 : vector<64x32xf32>
    %c3_163 = arith.constant 3 : index
    %c0_164 = arith.constant 0 : index
    %c0_165 = arith.constant 0 : index
    %357 = vector.load %arg5[%c3_163, %c0_164, %c0_165] : memref<4x32x32xf32, #tpu.memory_space<vmem>>, vector<1x32x32xf32>
    %358 = vector.shape_cast %357 : vector<1x32x32xf32> to vector<32x32xf32>
    %cst_166 = arith.constant dense<0.000000e+00> : vector<64x32xf32>
    %359 = tpu.matmul %335, %358, %cst_166 {dimension_numbers = #tpu.dot_dimension_numbers<[1], [0], [0], [1], [0, 0, 1, 1], [], []>} : vector<64x32xf32>, vector<32x32xf32>, vector<64x32xf32> -> vector<64x32xf32>
    %c3_167 = arith.constant 3 : index
    %c0_168 = arith.constant 0 : index
    %c0_169 = arith.constant 0 : index
    %360 = vector.load %arg7[%c3_167, %c0_168, %c0_169] : memref<4x1x32xf32, #tpu.memory_space<vmem>>, vector<1x1x32xf32>
    %361 = vector.shape_cast %360 : vector<1x1x32xf32> to vector<1x32xf32>
    %362 = vector.broadcast %361 : vector<1x32xf32> to vector<64x32xf32>
    %363 = arith.addf %359, %362 : vector<64x32xf32>
    %c0_170 = arith.constant 0 : index
    %c0_171 = arith.constant 0 : index
    %c0_172 = arith.constant 0 : index
    %364 = vector.load %arg6[%c0_170, %c0_171, %c0_172] : memref<4x32x32xf32, #tpu.memory_space<vmem>>, vector<1x32x32xf32>
    %365 = vector.shape_cast %364 : vector<1x32x32xf32> to vector<32x32xf32>
    %c1_173 = arith.constant 1 : index
    %c0_174 = arith.constant 0 : index
    %c0_175 = arith.constant 0 : index
    %366 = vector.load %arg6[%c1_173, %c0_174, %c0_175] : memref<4x32x32xf32, #tpu.memory_space<vmem>>, vector<1x32x32xf32>
    %367 = vector.shape_cast %366 : vector<1x32x32xf32> to vector<32x32xf32>
    %c2_176 = arith.constant 2 : index
    %c0_177 = arith.constant 0 : index
    %c0_178 = arith.constant 0 : index
    %368 = vector.load %arg6[%c2_176, %c0_177, %c0_178] : memref<4x32x32xf32, #tpu.memory_space<vmem>>, vector<1x32x32xf32>
    %369 = vector.shape_cast %368 : vector<1x32x32xf32> to vector<32x32xf32>
    %c3_179 = arith.constant 3 : index
    %c0_180 = arith.constant 0 : index
    %c0_181 = arith.constant 0 : index
    %370 = vector.load %arg6[%c3_179, %c0_180, %c0_181] : memref<4x32x32xf32, #tpu.memory_space<vmem>>, vector<1x32x32xf32>
    %371 = vector.shape_cast %370 : vector<1x32x32xf32> to vector<32x32xf32>
    %cst_182 = arith.constant 0.000000e+00 : f32
    %372 = vector.broadcast %cst_182 : f32 to vector<8x32xf32>
    %cst_183 = arith.constant 0.000000e+00 : f32
    %373 = vector.broadcast %cst_183 : f32 to vector<8x32xf32>
    %374 = vector.extract_strided_slice %342 {offsets = [0, 0], sizes = [8, 32], strides = [1, 1]} : vector<64x32xf32> to vector<8x32xf32>
    %cst_184 = arith.constant dense<0.000000e+00> : vector<8x32xf32>
    %375 = tpu.matmul %372, %365, %cst_184 {dimension_numbers = #tpu.dot_dimension_numbers<[1], [0], [0], [1], [0, 0, 1, 1], [], []>} : vector<8x32xf32>, vector<32x32xf32>, vector<8x32xf32> -> vector<8x32xf32>
    %376 = arith.addf %374, %375 : vector<8x32xf32>
    %377 = vector.extract_strided_slice %349 {offsets = [0, 0], sizes = [8, 32], strides = [1, 1]} : vector<64x32xf32> to vector<8x32xf32>
    %cst_185 = arith.constant dense<0.000000e+00> : vector<8x32xf32>
    %378 = tpu.matmul %372, %367, %cst_185 {dimension_numbers = #tpu.dot_dimension_numbers<[1], [0], [0], [1], [0, 0, 1, 1], [], []>} : vector<8x32xf32>, vector<32x32xf32>, vector<8x32xf32> -> vector<8x32xf32>
    %379 = arith.addf %377, %378 : vector<8x32xf32>
    %380 = vector.extract_strided_slice %356 {offsets = [0, 0], sizes = [8, 32], strides = [1, 1]} : vector<64x32xf32> to vector<8x32xf32>
    %cst_186 = arith.constant dense<0.000000e+00> : vector<8x32xf32>
    %381 = tpu.matmul %372, %369, %cst_186 {dimension_numbers = #tpu.dot_dimension_numbers<[1], [0], [0], [1], [0, 0, 1, 1], [], []>} : vector<8x32xf32>, vector<32x32xf32>, vector<8x32xf32> -> vector<8x32xf32>
    %382 = arith.addf %380, %381 : vector<8x32xf32>
    %383 = vector.extract_strided_slice %363 {offsets = [0, 0], sizes = [8, 32], strides = [1, 1]} : vector<64x32xf32> to vector<8x32xf32>
    %cst_187 = arith.constant dense<0.000000e+00> : vector<8x32xf32>
    %384 = tpu.matmul %372, %371, %cst_187 {dimension_numbers = #tpu.dot_dimension_numbers<[1], [0], [0], [1], [0, 0, 1, 1], [], []>} : vector<8x32xf32>, vector<32x32xf32>, vector<8x32xf32> -> vector<8x32xf32>
    %385 = arith.addf %383, %384 : vector<8x32xf32>
    %386 = arith.negf %376 : vector<8x32xf32>
    %387 = math.exp %386 : vector<8x32xf32>
    %cst_188 = arith.constant 1.000000e+00 : f32
    %388 = vector.broadcast %cst_188 : f32 to vector<8x32xf32>
    %389 = arith.addf %388, %387 : vector<8x32xf32>
    %390 = arith.divf %388, %389 : vector<8x32xf32>
    %391 = arith.negf %379 : vector<8x32xf32>
    %392 = math.exp %391 : vector<8x32xf32>
    %cst_189 = arith.constant 1.000000e+00 : f32
    %393 = vector.broadcast %cst_189 : f32 to vector<8x32xf32>
    %394 = arith.addf %393, %392 : vector<8x32xf32>
    %395 = arith.divf %393, %394 : vector<8x32xf32>
    %396 = math.tanh %382 : vector<8x32xf32>
    %397 = arith.negf %385 : vector<8x32xf32>
    %398 = math.exp %397 : vector<8x32xf32>
    %cst_190 = arith.constant 1.000000e+00 : f32
    %399 = vector.broadcast %cst_190 : f32 to vector<8x32xf32>
    %400 = arith.addf %399, %398 : vector<8x32xf32>
    %401 = arith.divf %399, %400 : vector<8x32xf32>
    %402 = arith.mulf %395, %373 : vector<8x32xf32>
    %403 = arith.mulf %390, %396 : vector<8x32xf32>
    %404 = arith.addf %402, %403 : vector<8x32xf32>
    %405 = math.tanh %404 : vector<8x32xf32>
    %406 = arith.mulf %401, %405 : vector<8x32xf32>
    %407 = vector.extract_strided_slice %342 {offsets = [8, 0], sizes = [8, 32], strides = [1, 1]} : vector<64x32xf32> to vector<8x32xf32>
    %cst_191 = arith.constant dense<0.000000e+00> : vector<8x32xf32>
    %408 = tpu.matmul %406, %365, %cst_191 {dimension_numbers = #tpu.dot_dimension_numbers<[1], [0], [0], [1], [0, 0, 1, 1], [], []>} : vector<8x32xf32>, vector<32x32xf32>, vector<8x32xf32> -> vector<8x32xf32>
    %409 = arith.addf %407, %408 : vector<8x32xf32>
    %410 = vector.extract_strided_slice %349 {offsets = [8, 0], sizes = [8, 32], strides = [1, 1]} : vector<64x32xf32> to vector<8x32xf32>
    %cst_192 = arith.constant dense<0.000000e+00> : vector<8x32xf32>
    %411 = tpu.matmul %406, %367, %cst_192 {dimension_numbers = #tpu.dot_dimension_numbers<[1], [0], [0], [1], [0, 0, 1, 1], [], []>} : vector<8x32xf32>, vector<32x32xf32>, vector<8x32xf32> -> vector<8x32xf32>
    %412 = arith.addf %410, %411 : vector<8x32xf32>
    %413 = vector.extract_strided_slice %356 {offsets = [8, 0], sizes = [8, 32], strides = [1, 1]} : vector<64x32xf32> to vector<8x32xf32>
    %cst_193 = arith.constant dense<0.000000e+00> : vector<8x32xf32>
    %414 = tpu.matmul %406, %369, %cst_193 {dimension_numbers = #tpu.dot_dimension_numbers<[1], [0], [0], [1], [0, 0, 1, 1], [], []>} : vector<8x32xf32>, vector<32x32xf32>, vector<8x32xf32> -> vector<8x32xf32>
    %415 = arith.addf %413, %414 : vector<8x32xf32>
    %416 = vector.extract_strided_slice %363 {offsets = [8, 0], sizes = [8, 32], strides = [1, 1]} : vector<64x32xf32> to vector<8x32xf32>
    %cst_194 = arith.constant dense<0.000000e+00> : vector<8x32xf32>
    %417 = tpu.matmul %406, %371, %cst_194 {dimension_numbers = #tpu.dot_dimension_numbers<[1], [0], [0], [1], [0, 0, 1, 1], [], []>} : vector<8x32xf32>, vector<32x32xf32>, vector<8x32xf32> -> vector<8x32xf32>
    %418 = arith.addf %416, %417 : vector<8x32xf32>
    %419 = arith.negf %409 : vector<8x32xf32>
    %420 = math.exp %419 : vector<8x32xf32>
    %cst_195 = arith.constant 1.000000e+00 : f32
    %421 = vector.broadcast %cst_195 : f32 to vector<8x32xf32>
    %422 = arith.addf %421, %420 : vector<8x32xf32>
    %423 = arith.divf %421, %422 : vector<8x32xf32>
    %424 = arith.negf %412 : vector<8x32xf32>
    %425 = math.exp %424 : vector<8x32xf32>
    %cst_196 = arith.constant 1.000000e+00 : f32
    %426 = vector.broadcast %cst_196 : f32 to vector<8x32xf32>
    %427 = arith.addf %426, %425 : vector<8x32xf32>
    %428 = arith.divf %426, %427 : vector<8x32xf32>
    %429 = math.tanh %415 : vector<8x32xf32>
    %430 = arith.negf %418 : vector<8x32xf32>
    %431 = math.exp %430 : vector<8x32xf32>
    %cst_197 = arith.constant 1.000000e+00 : f32
    %432 = vector.broadcast %cst_197 : f32 to vector<8x32xf32>
    %433 = arith.addf %432, %431 : vector<8x32xf32>
    %434 = arith.divf %432, %433 : vector<8x32xf32>
    %435 = arith.mulf %428, %404 : vector<8x32xf32>
    %436 = arith.mulf %423, %429 : vector<8x32xf32>
    %437 = arith.addf %435, %436 : vector<8x32xf32>
    %438 = math.tanh %437 : vector<8x32xf32>
    %439 = arith.mulf %434, %438 : vector<8x32xf32>
    %440 = vector.extract_strided_slice %342 {offsets = [16, 0], sizes = [8, 32], strides = [1, 1]} : vector<64x32xf32> to vector<8x32xf32>
    %cst_198 = arith.constant dense<0.000000e+00> : vector<8x32xf32>
    %441 = tpu.matmul %439, %365, %cst_198 {dimension_numbers = #tpu.dot_dimension_numbers<[1], [0], [0], [1], [0, 0, 1, 1], [], []>} : vector<8x32xf32>, vector<32x32xf32>, vector<8x32xf32> -> vector<8x32xf32>
    %442 = arith.addf %440, %441 : vector<8x32xf32>
    %443 = vector.extract_strided_slice %349 {offsets = [16, 0], sizes = [8, 32], strides = [1, 1]} : vector<64x32xf32> to vector<8x32xf32>
    %cst_199 = arith.constant dense<0.000000e+00> : vector<8x32xf32>
    %444 = tpu.matmul %439, %367, %cst_199 {dimension_numbers = #tpu.dot_dimension_numbers<[1], [0], [0], [1], [0, 0, 1, 1], [], []>} : vector<8x32xf32>, vector<32x32xf32>, vector<8x32xf32> -> vector<8x32xf32>
    %445 = arith.addf %443, %444 : vector<8x32xf32>
    %446 = vector.extract_strided_slice %356 {offsets = [16, 0], sizes = [8, 32], strides = [1, 1]} : vector<64x32xf32> to vector<8x32xf32>
    %cst_200 = arith.constant dense<0.000000e+00> : vector<8x32xf32>
    %447 = tpu.matmul %439, %369, %cst_200 {dimension_numbers = #tpu.dot_dimension_numbers<[1], [0], [0], [1], [0, 0, 1, 1], [], []>} : vector<8x32xf32>, vector<32x32xf32>, vector<8x32xf32> -> vector<8x32xf32>
    %448 = arith.addf %446, %447 : vector<8x32xf32>
    %449 = vector.extract_strided_slice %363 {offsets = [16, 0], sizes = [8, 32], strides = [1, 1]} : vector<64x32xf32> to vector<8x32xf32>
    %cst_201 = arith.constant dense<0.000000e+00> : vector<8x32xf32>
    %450 = tpu.matmul %439, %371, %cst_201 {dimension_numbers = #tpu.dot_dimension_numbers<[1], [0], [0], [1], [0, 0, 1, 1], [], []>} : vector<8x32xf32>, vector<32x32xf32>, vector<8x32xf32> -> vector<8x32xf32>
    %451 = arith.addf %449, %450 : vector<8x32xf32>
    %452 = arith.negf %442 : vector<8x32xf32>
    %453 = math.exp %452 : vector<8x32xf32>
    %cst_202 = arith.constant 1.000000e+00 : f32
    %454 = vector.broadcast %cst_202 : f32 to vector<8x32xf32>
    %455 = arith.addf %454, %453 : vector<8x32xf32>
    %456 = arith.divf %454, %455 : vector<8x32xf32>
    %457 = arith.negf %445 : vector<8x32xf32>
    %458 = math.exp %457 : vector<8x32xf32>
    %cst_203 = arith.constant 1.000000e+00 : f32
    %459 = vector.broadcast %cst_203 : f32 to vector<8x32xf32>
    %460 = arith.addf %459, %458 : vector<8x32xf32>
    %461 = arith.divf %459, %460 : vector<8x32xf32>
    %462 = math.tanh %448 : vector<8x32xf32>
    %463 = arith.negf %451 : vector<8x32xf32>
    %464 = math.exp %463 : vector<8x32xf32>
    %cst_204 = arith.constant 1.000000e+00 : f32
    %465 = vector.broadcast %cst_204 : f32 to vector<8x32xf32>
    %466 = arith.addf %465, %464 : vector<8x32xf32>
    %467 = arith.divf %465, %466 : vector<8x32xf32>
    %468 = arith.mulf %461, %437 : vector<8x32xf32>
    %469 = arith.mulf %456, %462 : vector<8x32xf32>
    %470 = arith.addf %468, %469 : vector<8x32xf32>
    %471 = math.tanh %470 : vector<8x32xf32>
    %472 = arith.mulf %467, %471 : vector<8x32xf32>
    %473 = vector.extract_strided_slice %342 {offsets = [24, 0], sizes = [8, 32], strides = [1, 1]} : vector<64x32xf32> to vector<8x32xf32>
    %cst_205 = arith.constant dense<0.000000e+00> : vector<8x32xf32>
    %474 = tpu.matmul %472, %365, %cst_205 {dimension_numbers = #tpu.dot_dimension_numbers<[1], [0], [0], [1], [0, 0, 1, 1], [], []>} : vector<8x32xf32>, vector<32x32xf32>, vector<8x32xf32> -> vector<8x32xf32>
    %475 = arith.addf %473, %474 : vector<8x32xf32>
    %476 = vector.extract_strided_slice %349 {offsets = [24, 0], sizes = [8, 32], strides = [1, 1]} : vector<64x32xf32> to vector<8x32xf32>
    %cst_206 = arith.constant dense<0.000000e+00> : vector<8x32xf32>
    %477 = tpu.matmul %472, %367, %cst_206 {dimension_numbers = #tpu.dot_dimension_numbers<[1], [0], [0], [1], [0, 0, 1, 1], [], []>} : vector<8x32xf32>, vector<32x32xf32>, vector<8x32xf32> -> vector<8x32xf32>
    %478 = arith.addf %476, %477 : vector<8x32xf32>
    %479 = vector.extract_strided_slice %356 {offsets = [24, 0], sizes = [8, 32], strides = [1, 1]} : vector<64x32xf32> to vector<8x32xf32>
    %cst_207 = arith.constant dense<0.000000e+00> : vector<8x32xf32>
    %480 = tpu.matmul %472, %369, %cst_207 {dimension_numbers = #tpu.dot_dimension_numbers<[1], [0], [0], [1], [0, 0, 1, 1], [], []>} : vector<8x32xf32>, vector<32x32xf32>, vector<8x32xf32> -> vector<8x32xf32>
    %481 = arith.addf %479, %480 : vector<8x32xf32>
    %482 = vector.extract_strided_slice %363 {offsets = [24, 0], sizes = [8, 32], strides = [1, 1]} : vector<64x32xf32> to vector<8x32xf32>
    %cst_208 = arith.constant dense<0.000000e+00> : vector<8x32xf32>
    %483 = tpu.matmul %472, %371, %cst_208 {dimension_numbers = #tpu.dot_dimension_numbers<[1], [0], [0], [1], [0, 0, 1, 1], [], []>} : vector<8x32xf32>, vector<32x32xf32>, vector<8x32xf32> -> vector<8x32xf32>
    %484 = arith.addf %482, %483 : vector<8x32xf32>
    %485 = arith.negf %475 : vector<8x32xf32>
    %486 = math.exp %485 : vector<8x32xf32>
    %cst_209 = arith.constant 1.000000e+00 : f32
    %487 = vector.broadcast %cst_209 : f32 to vector<8x32xf32>
    %488 = arith.addf %487, %486 : vector<8x32xf32>
    %489 = arith.divf %487, %488 : vector<8x32xf32>
    %490 = arith.negf %478 : vector<8x32xf32>
    %491 = math.exp %490 : vector<8x32xf32>
    %cst_210 = arith.constant 1.000000e+00 : f32
    %492 = vector.broadcast %cst_210 : f32 to vector<8x32xf32>
    %493 = arith.addf %492, %491 : vector<8x32xf32>
    %494 = arith.divf %492, %493 : vector<8x32xf32>
    %495 = math.tanh %481 : vector<8x32xf32>
    %496 = arith.negf %484 : vector<8x32xf32>
    %497 = math.exp %496 : vector<8x32xf32>
    %cst_211 = arith.constant 1.000000e+00 : f32
    %498 = vector.broadcast %cst_211 : f32 to vector<8x32xf32>
    %499 = arith.addf %498, %497 : vector<8x32xf32>
    %500 = arith.divf %498, %499 : vector<8x32xf32>
    %501 = arith.mulf %494, %470 : vector<8x32xf32>
    %502 = arith.mulf %489, %495 : vector<8x32xf32>
    %503 = arith.addf %501, %502 : vector<8x32xf32>
    %504 = math.tanh %503 : vector<8x32xf32>
    %505 = arith.mulf %500, %504 : vector<8x32xf32>
    %506 = vector.extract_strided_slice %342 {offsets = [32, 0], sizes = [8, 32], strides = [1, 1]} : vector<64x32xf32> to vector<8x32xf32>
    %cst_212 = arith.constant dense<0.000000e+00> : vector<8x32xf32>
    %507 = tpu.matmul %505, %365, %cst_212 {dimension_numbers = #tpu.dot_dimension_numbers<[1], [0], [0], [1], [0, 0, 1, 1], [], []>} : vector<8x32xf32>, vector<32x32xf32>, vector<8x32xf32> -> vector<8x32xf32>
    %508 = arith.addf %506, %507 : vector<8x32xf32>
    %509 = vector.extract_strided_slice %349 {offsets = [32, 0], sizes = [8, 32], strides = [1, 1]} : vector<64x32xf32> to vector<8x32xf32>
    %cst_213 = arith.constant dense<0.000000e+00> : vector<8x32xf32>
    %510 = tpu.matmul %505, %367, %cst_213 {dimension_numbers = #tpu.dot_dimension_numbers<[1], [0], [0], [1], [0, 0, 1, 1], [], []>} : vector<8x32xf32>, vector<32x32xf32>, vector<8x32xf32> -> vector<8x32xf32>
    %511 = arith.addf %509, %510 : vector<8x32xf32>
    %512 = vector.extract_strided_slice %356 {offsets = [32, 0], sizes = [8, 32], strides = [1, 1]} : vector<64x32xf32> to vector<8x32xf32>
    %cst_214 = arith.constant dense<0.000000e+00> : vector<8x32xf32>
    %513 = tpu.matmul %505, %369, %cst_214 {dimension_numbers = #tpu.dot_dimension_numbers<[1], [0], [0], [1], [0, 0, 1, 1], [], []>} : vector<8x32xf32>, vector<32x32xf32>, vector<8x32xf32> -> vector<8x32xf32>
    %514 = arith.addf %512, %513 : vector<8x32xf32>
    %515 = vector.extract_strided_slice %363 {offsets = [32, 0], sizes = [8, 32], strides = [1, 1]} : vector<64x32xf32> to vector<8x32xf32>
    %cst_215 = arith.constant dense<0.000000e+00> : vector<8x32xf32>
    %516 = tpu.matmul %505, %371, %cst_215 {dimension_numbers = #tpu.dot_dimension_numbers<[1], [0], [0], [1], [0, 0, 1, 1], [], []>} : vector<8x32xf32>, vector<32x32xf32>, vector<8x32xf32> -> vector<8x32xf32>
    %517 = arith.addf %515, %516 : vector<8x32xf32>
    %518 = arith.negf %508 : vector<8x32xf32>
    %519 = math.exp %518 : vector<8x32xf32>
    %cst_216 = arith.constant 1.000000e+00 : f32
    %520 = vector.broadcast %cst_216 : f32 to vector<8x32xf32>
    %521 = arith.addf %520, %519 : vector<8x32xf32>
    %522 = arith.divf %520, %521 : vector<8x32xf32>
    %523 = arith.negf %511 : vector<8x32xf32>
    %524 = math.exp %523 : vector<8x32xf32>
    %cst_217 = arith.constant 1.000000e+00 : f32
    %525 = vector.broadcast %cst_217 : f32 to vector<8x32xf32>
    %526 = arith.addf %525, %524 : vector<8x32xf32>
    %527 = arith.divf %525, %526 : vector<8x32xf32>
    %528 = math.tanh %514 : vector<8x32xf32>
    %529 = arith.negf %517 : vector<8x32xf32>
    %530 = math.exp %529 : vector<8x32xf32>
    %cst_218 = arith.constant 1.000000e+00 : f32
    %531 = vector.broadcast %cst_218 : f32 to vector<8x32xf32>
    %532 = arith.addf %531, %530 : vector<8x32xf32>
    %533 = arith.divf %531, %532 : vector<8x32xf32>
    %534 = arith.mulf %527, %503 : vector<8x32xf32>
    %535 = arith.mulf %522, %528 : vector<8x32xf32>
    %536 = arith.addf %534, %535 : vector<8x32xf32>
    %537 = math.tanh %536 : vector<8x32xf32>
    %538 = arith.mulf %533, %537 : vector<8x32xf32>
    %539 = vector.extract_strided_slice %342 {offsets = [40, 0], sizes = [8, 32], strides = [1, 1]} : vector<64x32xf32> to vector<8x32xf32>
    %cst_219 = arith.constant dense<0.000000e+00> : vector<8x32xf32>
    %540 = tpu.matmul %538, %365, %cst_219 {dimension_numbers = #tpu.dot_dimension_numbers<[1], [0], [0], [1], [0, 0, 1, 1], [], []>} : vector<8x32xf32>, vector<32x32xf32>, vector<8x32xf32> -> vector<8x32xf32>
    %541 = arith.addf %539, %540 : vector<8x32xf32>
    %542 = vector.extract_strided_slice %349 {offsets = [40, 0], sizes = [8, 32], strides = [1, 1]} : vector<64x32xf32> to vector<8x32xf32>
    %cst_220 = arith.constant dense<0.000000e+00> : vector<8x32xf32>
    %543 = tpu.matmul %538, %367, %cst_220 {dimension_numbers = #tpu.dot_dimension_numbers<[1], [0], [0], [1], [0, 0, 1, 1], [], []>} : vector<8x32xf32>, vector<32x32xf32>, vector<8x32xf32> -> vector<8x32xf32>
    %544 = arith.addf %542, %543 : vector<8x32xf32>
    %545 = vector.extract_strided_slice %356 {offsets = [40, 0], sizes = [8, 32], strides = [1, 1]} : vector<64x32xf32> to vector<8x32xf32>
    %cst_221 = arith.constant dense<0.000000e+00> : vector<8x32xf32>
    %546 = tpu.matmul %538, %369, %cst_221 {dimension_numbers = #tpu.dot_dimension_numbers<[1], [0], [0], [1], [0, 0, 1, 1], [], []>} : vector<8x32xf32>, vector<32x32xf32>, vector<8x32xf32> -> vector<8x32xf32>
    %547 = arith.addf %545, %546 : vector<8x32xf32>
    %548 = vector.extract_strided_slice %363 {offsets = [40, 0], sizes = [8, 32], strides = [1, 1]} : vector<64x32xf32> to vector<8x32xf32>
    %cst_222 = arith.constant dense<0.000000e+00> : vector<8x32xf32>
    %549 = tpu.matmul %538, %371, %cst_222 {dimension_numbers = #tpu.dot_dimension_numbers<[1], [0], [0], [1], [0, 0, 1, 1], [], []>} : vector<8x32xf32>, vector<32x32xf32>, vector<8x32xf32> -> vector<8x32xf32>
    %550 = arith.addf %548, %549 : vector<8x32xf32>
    %551 = arith.negf %541 : vector<8x32xf32>
    %552 = math.exp %551 : vector<8x32xf32>
    %cst_223 = arith.constant 1.000000e+00 : f32
    %553 = vector.broadcast %cst_223 : f32 to vector<8x32xf32>
    %554 = arith.addf %553, %552 : vector<8x32xf32>
    %555 = arith.divf %553, %554 : vector<8x32xf32>
    %556 = arith.negf %544 : vector<8x32xf32>
    %557 = math.exp %556 : vector<8x32xf32>
    %cst_224 = arith.constant 1.000000e+00 : f32
    %558 = vector.broadcast %cst_224 : f32 to vector<8x32xf32>
    %559 = arith.addf %558, %557 : vector<8x32xf32>
    %560 = arith.divf %558, %559 : vector<8x32xf32>
    %561 = math.tanh %547 : vector<8x32xf32>
    %562 = arith.negf %550 : vector<8x32xf32>
    %563 = math.exp %562 : vector<8x32xf32>
    %cst_225 = arith.constant 1.000000e+00 : f32
    %564 = vector.broadcast %cst_225 : f32 to vector<8x32xf32>
    %565 = arith.addf %564, %563 : vector<8x32xf32>
    %566 = arith.divf %564, %565 : vector<8x32xf32>
    %567 = arith.mulf %560, %536 : vector<8x32xf32>
    %568 = arith.mulf %555, %561 : vector<8x32xf32>
    %569 = arith.addf %567, %568 : vector<8x32xf32>
    %570 = math.tanh %569 : vector<8x32xf32>
    %571 = arith.mulf %566, %570 : vector<8x32xf32>
    %572 = vector.extract_strided_slice %342 {offsets = [48, 0], sizes = [8, 32], strides = [1, 1]} : vector<64x32xf32> to vector<8x32xf32>
    %cst_226 = arith.constant dense<0.000000e+00> : vector<8x32xf32>
    %573 = tpu.matmul %571, %365, %cst_226 {dimension_numbers = #tpu.dot_dimension_numbers<[1], [0], [0], [1], [0, 0, 1, 1], [], []>} : vector<8x32xf32>, vector<32x32xf32>, vector<8x32xf32> -> vector<8x32xf32>
    %574 = arith.addf %572, %573 : vector<8x32xf32>
    %575 = vector.extract_strided_slice %349 {offsets = [48, 0], sizes = [8, 32], strides = [1, 1]} : vector<64x32xf32> to vector<8x32xf32>
    %cst_227 = arith.constant dense<0.000000e+00> : vector<8x32xf32>
    %576 = tpu.matmul %571, %367, %cst_227 {dimension_numbers = #tpu.dot_dimension_numbers<[1], [0], [0], [1], [0, 0, 1, 1], [], []>} : vector<8x32xf32>, vector<32x32xf32>, vector<8x32xf32> -> vector<8x32xf32>
    %577 = arith.addf %575, %576 : vector<8x32xf32>
    %578 = vector.extract_strided_slice %356 {offsets = [48, 0], sizes = [8, 32], strides = [1, 1]} : vector<64x32xf32> to vector<8x32xf32>
    %cst_228 = arith.constant dense<0.000000e+00> : vector<8x32xf32>
    %579 = tpu.matmul %571, %369, %cst_228 {dimension_numbers = #tpu.dot_dimension_numbers<[1], [0], [0], [1], [0, 0, 1, 1], [], []>} : vector<8x32xf32>, vector<32x32xf32>, vector<8x32xf32> -> vector<8x32xf32>
    %580 = arith.addf %578, %579 : vector<8x32xf32>
    %581 = vector.extract_strided_slice %363 {offsets = [48, 0], sizes = [8, 32], strides = [1, 1]} : vector<64x32xf32> to vector<8x32xf32>
    %cst_229 = arith.constant dense<0.000000e+00> : vector<8x32xf32>
    %582 = tpu.matmul %571, %371, %cst_229 {dimension_numbers = #tpu.dot_dimension_numbers<[1], [0], [0], [1], [0, 0, 1, 1], [], []>} : vector<8x32xf32>, vector<32x32xf32>, vector<8x32xf32> -> vector<8x32xf32>
    %583 = arith.addf %581, %582 : vector<8x32xf32>
    %584 = arith.negf %574 : vector<8x32xf32>
    %585 = math.exp %584 : vector<8x32xf32>
    %cst_230 = arith.constant 1.000000e+00 : f32
    %586 = vector.broadcast %cst_230 : f32 to vector<8x32xf32>
    %587 = arith.addf %586, %585 : vector<8x32xf32>
    %588 = arith.divf %586, %587 : vector<8x32xf32>
    %589 = arith.negf %577 : vector<8x32xf32>
    %590 = math.exp %589 : vector<8x32xf32>
    %cst_231 = arith.constant 1.000000e+00 : f32
    %591 = vector.broadcast %cst_231 : f32 to vector<8x32xf32>
    %592 = arith.addf %591, %590 : vector<8x32xf32>
    %593 = arith.divf %591, %592 : vector<8x32xf32>
    %594 = math.tanh %580 : vector<8x32xf32>
    %595 = arith.negf %583 : vector<8x32xf32>
    %596 = math.exp %595 : vector<8x32xf32>
    %cst_232 = arith.constant 1.000000e+00 : f32
    %597 = vector.broadcast %cst_232 : f32 to vector<8x32xf32>
    %598 = arith.addf %597, %596 : vector<8x32xf32>
    %599 = arith.divf %597, %598 : vector<8x32xf32>
    %600 = arith.mulf %593, %569 : vector<8x32xf32>
    %601 = arith.mulf %588, %594 : vector<8x32xf32>
    %602 = arith.addf %600, %601 : vector<8x32xf32>
    %603 = math.tanh %602 : vector<8x32xf32>
    %604 = arith.mulf %599, %603 : vector<8x32xf32>
    %605 = vector.extract_strided_slice %342 {offsets = [56, 0], sizes = [8, 32], strides = [1, 1]} : vector<64x32xf32> to vector<8x32xf32>
    %cst_233 = arith.constant dense<0.000000e+00> : vector<8x32xf32>
    %606 = tpu.matmul %604, %365, %cst_233 {dimension_numbers = #tpu.dot_dimension_numbers<[1], [0], [0], [1], [0, 0, 1, 1], [], []>} : vector<8x32xf32>, vector<32x32xf32>, vector<8x32xf32> -> vector<8x32xf32>
    %607 = arith.addf %605, %606 : vector<8x32xf32>
    %608 = vector.extract_strided_slice %349 {offsets = [56, 0], sizes = [8, 32], strides = [1, 1]} : vector<64x32xf32> to vector<8x32xf32>
    %cst_234 = arith.constant dense<0.000000e+00> : vector<8x32xf32>
    %609 = tpu.matmul %604, %367, %cst_234 {dimension_numbers = #tpu.dot_dimension_numbers<[1], [0], [0], [1], [0, 0, 1, 1], [], []>} : vector<8x32xf32>, vector<32x32xf32>, vector<8x32xf32> -> vector<8x32xf32>
    %610 = arith.addf %608, %609 : vector<8x32xf32>
    %611 = vector.extract_strided_slice %356 {offsets = [56, 0], sizes = [8, 32], strides = [1, 1]} : vector<64x32xf32> to vector<8x32xf32>
    %cst_235 = arith.constant dense<0.000000e+00> : vector<8x32xf32>
    %612 = tpu.matmul %604, %369, %cst_235 {dimension_numbers = #tpu.dot_dimension_numbers<[1], [0], [0], [1], [0, 0, 1, 1], [], []>} : vector<8x32xf32>, vector<32x32xf32>, vector<8x32xf32> -> vector<8x32xf32>
    %613 = arith.addf %611, %612 : vector<8x32xf32>
    %614 = vector.extract_strided_slice %363 {offsets = [56, 0], sizes = [8, 32], strides = [1, 1]} : vector<64x32xf32> to vector<8x32xf32>
    %cst_236 = arith.constant dense<0.000000e+00> : vector<8x32xf32>
    %615 = tpu.matmul %604, %371, %cst_236 {dimension_numbers = #tpu.dot_dimension_numbers<[1], [0], [0], [1], [0, 0, 1, 1], [], []>} : vector<8x32xf32>, vector<32x32xf32>, vector<8x32xf32> -> vector<8x32xf32>
    %616 = arith.addf %614, %615 : vector<8x32xf32>
    %617 = arith.negf %607 : vector<8x32xf32>
    %618 = math.exp %617 : vector<8x32xf32>
    %cst_237 = arith.constant 1.000000e+00 : f32
    %619 = vector.broadcast %cst_237 : f32 to vector<8x32xf32>
    %620 = arith.addf %619, %618 : vector<8x32xf32>
    %621 = arith.divf %619, %620 : vector<8x32xf32>
    %622 = arith.negf %610 : vector<8x32xf32>
    %623 = math.exp %622 : vector<8x32xf32>
    %cst_238 = arith.constant 1.000000e+00 : f32
    %624 = vector.broadcast %cst_238 : f32 to vector<8x32xf32>
    %625 = arith.addf %624, %623 : vector<8x32xf32>
    %626 = arith.divf %624, %625 : vector<8x32xf32>
    %627 = math.tanh %613 : vector<8x32xf32>
    %628 = arith.negf %616 : vector<8x32xf32>
    %629 = math.exp %628 : vector<8x32xf32>
    %cst_239 = arith.constant 1.000000e+00 : f32
    %630 = vector.broadcast %cst_239 : f32 to vector<8x32xf32>
    %631 = arith.addf %630, %629 : vector<8x32xf32>
    %632 = arith.divf %630, %631 : vector<8x32xf32>
    %633 = arith.mulf %626, %602 : vector<8x32xf32>
    %634 = arith.mulf %621, %627 : vector<8x32xf32>
    %635 = arith.addf %633, %634 : vector<8x32xf32>
    %636 = math.tanh %635 : vector<8x32xf32>
    %637 = arith.mulf %632, %636 : vector<8x32xf32>
    %c0_240 = arith.constant 0 : index
    %c0_241 = arith.constant 0 : index
    %638 = vector.load %arg8[%c0_240, %c0_241] : memref<32x16xf32, #tpu.memory_space<vmem>>, vector<32x16xf32>
    %cst_242 = arith.constant dense<0.000000e+00> : vector<8x16xf32>
    %639 = tpu.matmul %637, %638, %cst_242 {dimension_numbers = #tpu.dot_dimension_numbers<[1], [0], [0], [1], [0, 0, 1, 1], [], []>} : vector<8x32xf32>, vector<32x16xf32>, vector<8x16xf32> -> vector<8x16xf32>
    %c0_243 = arith.constant 0 : index
    %c0_244 = arith.constant 0 : index
    %640 = vector.load %arg9[%c0_243, %c0_244] : memref<1x16xf32, #tpu.memory_space<vmem>>, vector<1x16xf32>
    %641 = vector.broadcast %640 : vector<1x16xf32> to vector<8x16xf32>
    %642 = arith.addf %639, %641 : vector<8x16xf32>
    %cst_245 = arith.constant 0.000000e+00 : f32
    %643 = vector.broadcast %cst_245 : f32 to vector<8x16xf32>
    %644 = arith.maximumf %642, %643 : vector<8x16xf32>
    %c0_246 = arith.constant 0 : index
    %c0_247 = arith.constant 0 : index
    %645 = vector.load %arg10[%c0_246, %c0_247] : memref<16x1xf32, #tpu.memory_space<vmem>>, vector<16x1xf32>
    %cst_248 = arith.constant dense<0.000000e+00> : vector<8x1xf32>
    %646 = tpu.matmul %644, %645, %cst_248 {dimension_numbers = #tpu.dot_dimension_numbers<[1], [0], [0], [1], [0, 0, 1, 1], [], []>} : vector<8x16xf32>, vector<16x1xf32>, vector<8x1xf32> -> vector<8x1xf32>
    %c0_249 = arith.constant 0 : index
    %c0_250 = arith.constant 0 : index
    %647 = vector.load %arg11[%c0_249, %c0_250] : memref<1x1xf32, #tpu.memory_space<vmem>>, vector<1x1xf32>
    %648 = vector.broadcast %647 : vector<1x1xf32> to vector<8x1xf32>
    %649 = arith.addf %646, %648 : vector<8x1xf32>
    %c0_251 = arith.constant 0 : index
    %c0_252 = arith.constant 0 : index
    %650 = vector.load %arg12[%c0_251, %c0_252] : memref<8x1xf32, #tpu.memory_space<vmem>>, vector<8x1xf32>
    tpu.vector_store %arg12[%c0_251, %c0_252], %649 {strides = array<i32>} : memref<8x1xf32, #tpu.memory_space<vmem>>, vector<8x1xf32>,
    return
  }
  func.func @transform_0(%arg0: i32) -> (i32, i32, i32) {
    %c0_i32 = arith.constant 0 : i32
    %c0_i32_0 = arith.constant 0 : i32
    %c0_i32_1 = arith.constant 0 : i32
    return %c0_i32, %arg0, %c0_i32_0 : i32, i32, i32
  }
  func.func @transform_1(%arg0: i32) -> (i32, i32, i32) {
    %c0_i32 = arith.constant 0 : i32
    %c0_i32_0 = arith.constant 0 : i32
    %c0_i32_1 = arith.constant 0 : i32
    %c0_i32_2 = arith.constant 0 : i32
    return %c0_i32, %c0_i32_0, %c0_i32_1 : i32, i32, i32
  }
  func.func @transform_2(%arg0: i32) -> (i32, i32, i32) {
    %c0_i32 = arith.constant 0 : i32
    %c0_i32_0 = arith.constant 0 : i32
    %c0_i32_1 = arith.constant 0 : i32
    %c0_i32_2 = arith.constant 0 : i32
    return %c0_i32, %c0_i32_0, %c0_i32_1 : i32, i32, i32
  }
  func.func @transform_3(%arg0: i32) -> (i32, i32, i32) {
    %c0_i32 = arith.constant 0 : i32
    %c0_i32_0 = arith.constant 0 : i32
    %c0_i32_1 = arith.constant 0 : i32
    %c0_i32_2 = arith.constant 0 : i32
    return %c0_i32, %c0_i32_0, %c0_i32_1 : i32, i32, i32
  }
  func.func @transform_4(%arg0: i32) -> (i32, i32, i32) {
    %c0_i32 = arith.constant 0 : i32
    %c0_i32_0 = arith.constant 0 : i32
    %c0_i32_1 = arith.constant 0 : i32
    %c0_i32_2 = arith.constant 0 : i32
    return %c0_i32, %c0_i32_0, %c0_i32_1 : i32, i32, i32
  }
  func.func @transform_5(%arg0: i32) -> (i32, i32, i32) {
    %c0_i32 = arith.constant 0 : i32
    %c0_i32_0 = arith.constant 0 : i32
    %c0_i32_1 = arith.constant 0 : i32
    %c0_i32_2 = arith.constant 0 : i32
    return %c0_i32, %c0_i32_0, %c0_i32_1 : i32, i32, i32
  }
  func.func @transform_6(%arg0: i32) -> (i32, i32, i32) {
    %c0_i32 = arith.constant 0 : i32
    %c0_i32_0 = arith.constant 0 : i32
    %c0_i32_1 = arith.constant 0 : i32
    %c0_i32_2 = arith.constant 0 : i32
    return %c0_i32, %c0_i32_0, %c0_i32_1 : i32, i32, i32
  }
  func.func @transform_7(%arg0: i32) -> (i32, i32) {
    %c0_i32 = arith.constant 0 : i32
    %c0_i32_0 = arith.constant 0 : i32
    %c0_i32_1 = arith.constant 0 : i32
    return %c0_i32, %c0_i32_0 : i32, i32
  }
  func.func @transform_8(%arg0: i32) -> (i32, i32) {
    %c0_i32 = arith.constant 0 : i32
    %c0_i32_0 = arith.constant 0 : i32
    %c0_i32_1 = arith.constant 0 : i32
    return %c0_i32, %c0_i32_0 : i32, i32
  }
  func.func @transform_9(%arg0: i32) -> (i32, i32) {
    %c0_i32 = arith.constant 0 : i32
    %c0_i32_0 = arith.constant 0 : i32
    %c0_i32_1 = arith.constant 0 : i32
    return %c0_i32, %c0_i32_0 : i32, i32
  }
  func.func @transform_10(%arg0: i32) -> (i32, i32) {
    %c0_i32 = arith.constant 0 : i32
    %c0_i32_0 = arith.constant 0 : i32
    %c0_i32_1 = arith.constant 0 : i32
    return %c0_i32, %c0_i32_0 : i32, i32
  }
  func.func @transform_11(%arg0: i32) -> (i32, i32) {
    %c0_i32 = arith.constant 0 : i32
    %c0_i32_0 = arith.constant 0 : i32
    return %arg0, %c0_i32 : i32, i32
  }
}

</mosaic_0001>

<bundles_post_ra>
// kernel: lstm_model_forward.1
= control target key start
LH: loop header
LB: loop body
LE: loop exit
PB: predicated region body
PF: predicated region fallthrough
CT: control target
= control target key end

     0   :  { %s9745_s0 = inlined_call_operand.vmem [shape: f32[8,8,8], index: 0, kind: input, shape index: {}]   ;;  %s9746_s1 = inlined_call_operand.hbm [shape: f32[4,8,32], index: 1, kind: input, shape index: {}]   ;;  %s9747_s2 = inlined_call_operand.vmem [shape: f32[4,32,32], index: 2, kind: input, shape index: {}]   ;;  %s9748_s3 = inlined_call_operand.hbm [shape: f32[4,1,32], index: 3, kind: input, shape index: {}]   ;;  %s9749_s4 = inlined_call_operand.vmem [shape: f32[4,32,32], index: 4, kind: input, shape index: {}]   ;;  %s9750_s5 = inlined_call_operand.hbm [shape: f32[4,32,32], index: 5, kind: input, shape index: {}]   ;;  %s9751_s6 = inlined_call_operand.hbm [shape: f32[4,1,32], index: 6, kind: input, shape index: {}]   ;;  %s9752_s7 = inlined_call_operand.vmem [shape: f32[32,16], index: 7, kind: input, shape index: {}]   ;;  %s9753_s8 = inlined_call_operand.hbm [shape: f32[1,16], index: 8, kind: input, shape index: {}]   ;;  %s9754_s9 = inlined_call_operand.vmem [shape: f32[16,1], index: 9, kind: input, shape index: {}]   ;;  %s9755_s10 = inlined_call_operand.<no memory space> [shape: f32[1,1], index: 10, kind: input, shape index: {}]   ;;  %s9756_s11 = inlined_call_operand.vmem [shape: f32[8,1], index: 11, kind: output, shape index: {}]  }
   0x1   :  { %v16_v0 = vstv %s9755_s10 }
   0x2   :  { %17 = vst [vmem:[#allocation4] sm:$0x1] %v16_v0 }
   0x3   :  { %18 = vsyncpa [#allocation6], 0 }
   0x4   :  { %19 = vsyncpa [#allocation8], 0 }
   0x5   :  { %20 = vsyncpa [#allocation11], 0  ;;  %s8609_s19 = smov [#allocation7]   ;;  %s8493_s23 = scalar_lea.hbm %s9748_s3, 64 }
   0x6   :  { %s42_s20 = sshll.u32 %s8609_s19, 4  ;;  %p8494_p0 = scmp.ne.s32.totalorder %s9748_s3, %s8493_s23  ;;  %s43_s20 = int_to_ptr.vmem [resolvable:$true] %s42_s20 }
   0x7   :  { %p8497_p1 = scmp.lt.u32.totalorder %s8493_s23, %s9748_s3 }
   0x9   :  { %p8499_p2 = pnand %p8497_p1, %p8494_p0 }
   0xb   :  { %8502 = shalt.err (!%p8499_p2)
}
   0xc   :  { %s8503_s10 = scalar_lea.vmem %s43_s20, 64  ;;  %p8508_p4 = scmp.lt.s32.totalorder %s43_s20, %s43_s20 }
   0xd   :  { %p8504_p3 = scmp.ne.s32.totalorder %s43_s20, %s8503_s10  ;;  %p8509_p5 = scmp.lt.s32.totalorder %s8503_s10, %s8503_s10 }
   0xf   :  { %p8510_p6 = por %p8509_p5, %p8508_p4 }
  0x11   :  { %p8511_p7 = pnand %p8510_p6, %p8504_p3 }
  0x13   :  { %8514 = shalt.err (!%p8511_p7)
}
  0x14   :  { %s8610_s28 = smov 16   ;;  %s8611_s29 = smov 1  }
  0x15   :  { %48 = dma.hbm_to_vmem [thread:$0]  %s9748_s3, 64, %s43_s20, [#allocation8], %s8610_s28, %s8610_s28, %s8611_s29  }
  0x16   :  { %s8612_s13 = smov [#allocation10]   ;;  %s8613_s15 = smov [#allocation5]  }
  0x17   :  { %s68_s14 = sshll.u32 %s8612_s13, 4  ;;  %s28_s16 = sshll.u32 %s8613_s15, 4  ;;  %s69_s14 = int_to_ptr.vmem [resolvable:$true] %s68_s14  ;;  %s29_s16 = int_to_ptr.vmem [resolvable:$true] %s28_s16 }
  0x18   :  { %s8515_s19 = scalar_lea.hbm %s9751_s6, 64 }
  0x19   :  { %p8516_p8 = scmp.ne.s32.totalorder %s9751_s6, %s8515_s19  ;;  %p8519_p9 = scmp.lt.u32.totalorder %s8515_s19, %s9751_s6 }
  0x1b   :  { %p8521_p10 = pnand %p8519_p9, %p8516_p8 }
  0x1d   :  { %8524 = shalt.err (!%p8521_p10)
}
  0x1e   :  { %s8525_s3 = scalar_lea.vmem %s69_s14, 64  ;;  %p8530_p12 = scmp.lt.s32.totalorder %s69_s14, %s69_s14 }
  0x1f   :  { %p8526_p11 = scmp.ne.s32.totalorder %s69_s14, %s8525_s3  ;;  %p8531_p13 = scmp.lt.s32.totalorder %s8525_s3, %s8525_s3 }
  0x21   :  { %p8532_p0 = por %p8531_p13, %p8530_p12 }
  0x23   :  { %p8533_p1 = pnand %p8532_p0, %p8526_p11 }
  0x25   :  { %8536 = shalt.err (!%p8533_p1)
}
  0x26   :  { %74 = dma.hbm_to_vmem [thread:$0]  %s9751_s6, 64, %s69_s14, [#allocation11], %s8610_s28, %s8610_s28, %s8611_s29  }
  0x27   :  { %s8537_s10 = scalar_lea.hbm %s9746_s1, 512 }
  0x28   :  { %p8538_p2 = scmp.ne.s32.totalorder %s9746_s1, %s8537_s10  ;;  %p8541_p3 = scmp.lt.u32.totalorder %s8537_s10, %s9746_s1 }
  0x2a   :  { %p8543_p4 = pnand %p8541_p3, %p8538_p2 }
  0x2c   :  { %8546 = shalt.err (!%p8543_p4)
}
  0x2d   :  { %s8547_s17 = scalar_lea.vmem %s29_s16, 512  ;;  %p8552_p6 = scmp.lt.s32.totalorder %s29_s16, %s29_s16 }
  0x2e   :  { %p8548_p5 = scmp.ne.s32.totalorder %s29_s16, %s8547_s17  ;;  %p8553_p7 = scmp.lt.s32.totalorder %s8547_s17, %s8547_s17 }
  0x30   :  { %p8554_p8 = por %p8553_p7, %p8552_p6 }
  0x32   :  { %p8555_p9 = pnand %p8554_p8, %p8548_p5 }
  0x34   :  { %8558 = shalt.err (!%p8555_p9)
}
  0x35   :  { %s8614_s6 = smov 128   ;;  %s8615_s28 = smov 8  }
  0x36   :  { %34 = dma.hbm_to_vmem [thread:$0]  %s9746_s1, 512, %s29_s16, [#allocation6], %s8614_s6, %s8614_s6, %s8615_s28  }
  0x37   :  { %s8616_s18 = smov [#allocation9]   ;;  %s8617_s21 = smov [#allocation12]  }
  0x38   :  { %s56_s19 = sshll.u32 %s8616_s18, 4  ;;  %s83_s22 = sshll.u32 %s8617_s21, 4  ;;  %s57_s19 = int_to_ptr.vmem [resolvable:$true] %s56_s19  ;;  %s84_s22 = int_to_ptr.vmem [resolvable:$true] %s83_s22 }
  0x39   :  { %s8559_s3 = scalar_lea.hbm %s9750_s5, 2048 }
  0x3a   :  { %p8560_p10 = scmp.ne.s32.totalorder %s9750_s5, %s8559_s3  ;;  %p8563_p11 = scmp.lt.u32.totalorder %s8559_s3, %s9750_s5 }
  0x3c   :  { %p8565_p12 = pnand %p8563_p11, %p8560_p10 }
  0x3e   :  { %8568 = shalt.err (!%p8565_p12)
}
  0x3f   :  { %s8569_s1 = scalar_lea.vmem %s57_s19, 2048  ;;  %p8574_p0 = scmp.lt.s32.totalorder %s57_s19, %s57_s19 }
  0x40   :  { %p8570_p13 = scmp.ne.s32.totalorder %s57_s19, %s8569_s1  ;;  %p8575_p1 = scmp.lt.s32.totalorder %s8569_s1, %s8569_s1 }
  0x42   :  { %p8576_p2 = por %p8575_p1, %p8574_p0 }
  0x44   :  { %p8577_p3 = pnand %p8576_p2, %p8570_p13 }
  0x46   :  { %8580 = shalt.err (!%p8577_p3)
}
  0x47   :  { %62 = dma.hbm_to_vmem [thread:$0]  %s9750_s5, 2048, %s57_s19, [#allocation8], %s8614_s6, %s8614_s6, %s8615_s28  }
  0x48   :  { %s8581_s13 = scalar_lea.hbm %s9753_s8, 16 }
  0x49   :  { %p8582_p4 = scmp.ne.s32.totalorder %s9753_s8, %s8581_s13  ;;  %p8585_p5 = scmp.lt.u32.totalorder %s8581_s13, %s9753_s8 }
  0x4b   :  { %p8587_p6 = pnand %p8585_p5, %p8582_p4 }
  0x4d   :  { %8590 = shalt.err (!%p8587_p6)
}
  0x4e   :  { %s8591_s18 = scalar_lea.vmem %s84_s22, 16  ;;  %s8595_s21 = scalar_lea.vmem %s84_s22, 32 }
  0x4f   :  { %p8592_p7 = scmp.ne.s32.totalorder %s84_s22, %s8591_s18  ;;  %p8596_p8 = scmp.lt.s32.totalorder %s84_s22, %s84_s22 }
  0x50   :  { %p8597_p9 = scmp.lt.s32.totalorder %s8595_s21, %s8591_s18 }
  0x52   :  { %p8598_p10 = por %p8597_p9, %p8596_p8 }
  0x54   :  { %p8599_p11 = pnand %p8598_p10, %p8592_p7 }
  0x56   :  { %8602 = shalt.err (!%p8599_p11)
}
  0x57   :  { %86 = dma.hbm_to_vmem [thread:$0]  %s9753_s8, 16, %s84_s22, [#allocation11]  }
  0x58   :  { %8603 = dma.done.wait [#allocation6], 512  }
  0x59   :  { %8604 = vsyncadd [#allocation6], 4294966784 }
  0x5a   :  { %8605 = dma.done.wait [#allocation8], 2112  }
  0x5b   :  { %8606 = vsyncadd [#allocation8], 4294965184 }
  0x5c   :  { %8607 = dma.done.wait [#allocation11], 80  }
  0x5d   :  { %8608 = vsyncadd [#allocation11], 4294967216  ;;  %vm107_vm0 = vcmask 64512   ;;  %v138_v1 = vld [vmem:[#allocation5] sm:$0xff]  ;;  %v276_v2 = vld [vmem:[#allocation5 + $0x8] sm:$0xff]  ;;  %v9759_v18 = vmov 0.0|0.0  }
  0x5e   :  { %v106_v3 = vld [vmem:[%s9745_s0] sm:$0xff]  ;;  %6942 = vmatprep.subr.mxu0 %v138_v1  ;;  %6956 = vmatprep.subr.mxu1 %v276_v2  ;;  %v391_v4 = vld [vmem:[#allocation5 + $0x10] sm:$0xff]  ;;  %v6319_v6 = vld [vmem:[%s9745_s0 + $0x8] sm:$0xff]  ;;  %vm8619_vm1 = vmmov 0   ;;  %v9757_v38 = vmov 0.0   ;;  %vm639_vm2 = vcmask 261120  }
  0x5f   :  { %108 = vst.msk [vmem:[#allocation2] sm:$0xff] %vm107_vm0, %v106_v3  ;;  %v506_v5 = vld [vmem:[#allocation5 + $0x18] sm:$0xff]  ;;  %6943 = vmatpush3.msra.mxu0 %v138_v1  ;;  %6957 = vmatpush3.msra.mxu1 %v276_v2  ;;  %111 = vst.msk [vmem:[#allocation2 + $0x8] sm:$0xff] %vm107_vm0, %v6319_v6  ;;  %v6320_v7 = vld [vmem:[%s9745_s0 + $0x10] sm:$0xff]  ;;  %vm6236_vm3 = vcmask 130048   ;;  %vm6310_vm4 = vcmask 7168  }
  0x60   :  { %v6321_v8 = vld [vmem:[%s9745_s0 + $0x18] sm:$0xff]  ;;  %v6322_v9 = vld [vmem:[%s9745_s0 + $0x20] sm:$0xff]  ;;  %6970 = vmatprep.subr.mxu0 %v391_v4  ;;  %6984 = vmatprep.subr.mxu1 %v506_v5  ;;  %114 = vst.msk [vmem:[#allocation2 + $0x10] sm:$0xff] %vm107_vm0, %v6320_v7  ;;  %v6323_v10 = vld [vmem:[%s9745_s0 + $0x28] sm:$0xff] }
  0x61   :  { %117 = vst.msk [vmem:[#allocation2 + $0x18] sm:$0xff] %vm107_vm0, %v6321_v8  ;;  %120 = vst.msk [vmem:[#allocation2 + $0x20] sm:$0xff] %vm107_vm0, %v6322_v9  ;;  %v6324_v11 = vld [vmem:[%s9745_s0 + $0x30] sm:$0xff]  ;;  %v6325_v12 = vld [vmem:[%s9745_s0 + $0x38] sm:$0xff] }
  0x62   :  { %123 = vst.msk [vmem:[#allocation2 + $0x28] sm:$0xff] %vm107_vm0, %v6323_v10  ;;  %126 = vst.msk [vmem:[#allocation2 + $0x30] sm:$0xff] %vm107_vm0, %v6324_v11  ;;  %v620_v22 = vld [vmem:[%s9747_s2] sm:$0xff]  ;;  %v621_v23 = vld [vmem:[%s9747_s2 + $0x8] sm:$0xff] }
  0x63   :  { %129 = vst.msk [vmem:[#allocation2 + $0x38] sm:$0xff] %vm107_vm0, %v6325_v12  ;;  %v6362_v24 = vld [vmem:[%s9747_s2 + $0x20] sm:$0xff]  ;;  %v6363_v25 = vld [vmem:[%s9747_s2 + $0x28] sm:$0xff]  ;;  %v8808_v26 = vpack.c.bf16 %v621_v23, %v620_v22  ;;  %v622_v28 = vld [vmem:[%s9747_s2 + $0x10] sm:$0xff] }
  0x64   :  { %v8810_v27 = vpack.c.bf16 %v6363_v25, %v6362_v24  ;;  %v623_v29 = vld [vmem:[%s9747_s2 + $0x18] sm:$0xff]  ;;  %v6364_v30 = vld [vmem:[%s9747_s2 + $0x30] sm:$0xff]  ;;  %v6366_v34 = vld [vmem:[%s9747_s2 + $0x40] sm:$0xff] }
  0x65   :  { %v6365_v31 = vld [vmem:[%s9747_s2 + $0x38] sm:$0xff]  ;;  %v8830_v32 = vpack.c.bf16 %v623_v29, %v622_v28  ;;  %v6367_v35 = vld [vmem:[%s9747_s2 + $0x48] sm:$0xff]  ;;  %v6370_v36 = vld [vmem:[%s9747_s2 + $0x60] sm:$0xff] }
  0x66   :  { %v130_v13 = vld [vmem:[#allocation2] sm:$0xff]  ;;  %v131_v14 = vld [vmem:[#allocation2 + $0x8] sm:$0xff]  ;;  %v8832_v33 = vpack.c.bf16 %v6365_v31, %v6364_v30  ;;  %v8866_v39 = vpack.c.bf16 %v6367_v35, %v6366_v34  ;;  %v6368_v41 = vld [vmem:[%s9747_s2 + $0x50] sm:$0xff] }
  0x67   :  { %6944 = vmatprep.mubr.msk.f32.mxu0 %vm107_vm0, %v130_v13  ;;  %6958 = vmatprep.mubr.msk.f32.mxu1 %vm107_vm0, %v130_v13  ;;  %v132_v15 = vld [vmem:[#allocation2 + $0x10] sm:$0xff]  ;;  %v6371_v37 = vld [vmem:[%s9747_s2 + $0x68] sm:$0xff]  ;;  %v6369_v42 = vld [vmem:[%s9747_s2 + $0x58] sm:$0xff] }
  0x68   :  { %6945 = vmatmul.mubr.msk.f32.vlgmr.msra.gmra.mrb[0].mxu0 %vm107_vm0, %v131_v14  ;;  %6959 = vmatmul.mubr.msk.f32.vlgmr.msra.gmra.mrb[0].mxu1 %vm107_vm0, %v131_v14  ;;  %v133_v16 = vld [vmem:[#allocation2 + $0x18] sm:$0xff]  ;;  %v134_v17 = vld [vmem:[#allocation2 + $0x20] sm:$0xff]  ;;  %v8868_v40 = vpack.c.bf16 %v6371_v37, %v6370_v36  ;;  %v6372_v43 = vld [vmem:[%s9747_s2 + $0x70] sm:$0xff]  ;;  %v8886_v45 = vpack.c.bf16 %v6369_v42, %v6368_v41 }
  0x69   :  { %6971 = vmatpush3.msra.mxu0 %v391_v4  ;;  %6985 = vmatpush3.msra.mxu1 %v506_v5  ;;  %v135_v19 = vld [vmem:[#allocation2 + $0x28] sm:$0xff]  ;;  %v136_v20 = vld [vmem:[#allocation2 + $0x30] sm:$0xff]  ;;  %v6373_v44 = vld [vmem:[%s9747_s2 + $0x78] sm:$0xff] }
  0x6a   :  { %6947 = vmatprep.mubr.msk.f32.mxu0 %vm107_vm0, %v132_v15  ;;  %6961 = vmatprep.mubr.msk.f32.mxu1 %vm107_vm0, %v132_v15  ;;  %v137_v21 = vld [vmem:[#allocation2 + $0x38] sm:$0xff]  ;;  %v8888_v46 = vpack.c.bf16 %v6373_v44, %v6372_v43  ;;  %v8914_v47 = vld [vmem:[#allocation7] ss:$0 sm:$0xff]  ;;  %v8916_v48 = vld [vmem:[#allocation7 + $0x1] ss:$0 sm:$0xff] }
  0x6b   :  { %7800 = vmatprep.subr.bf16.mxu0 %v9759_v18  ;;  %7806 = vmatprep.subr.bf16.mxu1 %v9759_v18 }
  0x6c   :  { %6948 = vmatmul.mubr.msk.f32.gmra.mrb[2].mxu0 %vm107_vm0, %v133_v16  ;;  %6962 = vmatmul.mubr.msk.f32.gmra.mrb[2].mxu1 %vm107_vm0, %v133_v16 }
  0x6d   :  { %6950 = vmatprep.mubr.msk.f32.mxu0 %vm107_vm0, %v134_v17  ;;  %6964 = vmatprep.mubr.msk.f32.mxu1 %vm107_vm0, %v134_v17 }
  0x70   :  { %6951 = vmatmul.mubr.msk.f32.gmra.mrb[4].mxu0 %vm107_vm0, %v135_v19  ;;  %6965 = vmatmul.mubr.msk.f32.gmra.mrb[4].mxu1 %vm107_vm0, %v135_v19 }
  0x71   :  { %6953 = vmatprep.mubr.msk.f32.mxu0 %vm107_vm0, %v136_v20  ;;  %6967 = vmatprep.mubr.msk.f32.mxu1 %vm107_vm0, %v136_v20 }
  0x74   :  { %6954 = vmatmul.mubr.msk.f32.gmra.mrb[6].mxu0 %vm107_vm0, %v137_v21  ;;  %6968 = vmatmul.mubr.msk.f32.gmra.mrb[6].mxu1 %vm107_vm0, %v137_v21 }
  0x75   :  { %6972 = vmatprep.mubr.msk.f32.mxu0 %vm107_vm0, %v130_v13  ;;  %6986 = vmatprep.mubr.msk.f32.mxu1 %vm107_vm0, %v130_v13 }
  0x78   :  { %6973 = vmatmul.mubr.msk.f32.vlgmr.msra.gmra.mrb[8].mxu0 %vm107_vm0, %v131_v14  ;;  %6987 = vmatmul.mubr.msk.f32.vlgmr.msra.gmra.mrb[8].mxu1 %vm107_vm0, %v131_v14 }
  0x79   :  { %7802 = vmatpush3.bf16.msra.mxu0 %v8808_v26  ;;  %7808 = vmatpush3.bf16.msra.mxu1 %v8810_v27 }
  0x7a   :  { %6975 = vmatprep.mubr.msk.f32.mxu0 %vm107_vm0, %v132_v15  ;;  %6989 = vmatprep.mubr.msk.f32.mxu1 %vm107_vm0, %v132_v15  ;;  %v6344_v15 = vld [vmem:[#allocation7 + $0x2] ss:$0 sm:$0xff] }
  0x7b   :  { %7803 = vmatprep.subr.bf16.mxu0 %v9759_v18  ;;  %7809 = vmatprep.subr.bf16.mxu1 %v9759_v18 }
  0x7c   :  { %6976 = vmatmul.mubr.msk.f32.gmra.mrb[10].mxu0 %vm107_vm0, %v133_v16  ;;  %6990 = vmatmul.mubr.msk.f32.gmra.mrb[10].mxu1 %vm107_vm0, %v133_v16  ;;  %v6353_v16 = vld [vmem:[#allocation7 + $0x3] ss:$0 sm:$0xff] }
  0x7d   :  { %6978 = vmatprep.mubr.msk.f32.mxu0 %vm107_vm0, %v134_v17  ;;  %6992 = vmatprep.mubr.msk.f32.mxu1 %vm107_vm0, %v134_v17 }
  0x7e   :  { %7805 = vmatpush3.bf16.msra.mxu0 %v8830_v32  ;;  %7811 = vmatpush3.bf16.msra.mxu1 %v8832_v33 }
  0x7f   :  { %7812 = vmatprep.subr.bf16.mxu0 %v9759_v18  ;;  %7818 = vmatprep.subr.bf16.mxu1 %v9759_v18 }
  0x80   :  { %6979 = vmatmul.mubr.msk.f32.gmra.mrb[12].mxu0 %vm107_vm0, %v135_v19  ;;  %6993 = vmatmul.mubr.msk.f32.gmra.mrb[12].mxu1 %vm107_vm0, %v135_v19 }
  0x81   :  { %6981 = vmatprep.mubr.msk.f32.mxu0 %vm107_vm0, %v136_v20  ;;  %6995 = vmatprep.mubr.msk.f32.mxu1 %vm107_vm0, %v136_v20 }
  0x84   :  { %6982 = vmatmul.mubr.msk.f32.gmra.mrb[14].mxu0 %vm107_vm0, %v137_v21  ;;  %6996 = vmatmul.mubr.msk.f32.gmra.mrb[14].mxu1 %vm107_vm0, %v137_v21 }
  0x85   :  { %7006 = vmatprep.mubr.msk.f32.mxu0 %vm8619_vm1, %v9757_v38  ;;  %7017 = vmatprep.mubr.msk.f32.mxu1 %vm8619_vm1, %v9757_v38 }
  0x88   :  { %7007 = vmatmul.mubr.f32.vlgmr.msra.gmra.mrb[16].mxu0 %v9757_v38  ;;  %7018 = vmatmul.mubr.f32.vlgmr.msra.gmra.mrb[16].mxu1 %v9757_v38 }
  0x89   :  { %7814 = vmatpush3.bf16.msra.mxu0 %v8866_v39  ;;  %7820 = vmatpush3.bf16.msra.mxu1 %v8868_v40 }
  0x8a   :  { %7815 = vmatprep.subr.bf16.mxu0 %v9759_v18  ;;  %7821 = vmatprep.subr.bf16.mxu1 %v9759_v18 }
  0x8b   :  { %7028 = vmatprep.mubr.msk.f32.mxu0 %vm8619_vm1, %v9757_v38  ;;  %7039 = vmatprep.mubr.msk.f32.mxu1 %vm8619_vm1, %v9757_v38 }
  0x8d   :  { %7817 = vmatpush3.bf16.msra.mxu0 %v8886_v45  ;;  %7823 = vmatpush3.bf16.msra.mxu1 %v8888_v46 }
  0x8e   :  { %7824 = vmatprep.subr.bf16.mxu0 %v9759_v18  ;;  %7830 = vmatprep.subr.bf16.mxu1 %v9759_v18 }
  0x90   :  { %7029 = vmatmul.mubr.f32.vlgmr.msra.gmra.mrb[18].mxu0 %v9757_v38  ;;  %7040 = vmatmul.mubr.f32.vlgmr.msra.gmra.mrb[18].mxu1 %v9757_v38 }
  0x91   :  { %7826 = vmatpush3.bf16.msra.mxu0 %v8808_v26  ;;  %7832 = vmatpush3.bf16.msra.mxu1 %v8810_v27 }
  0x92   :  { %7827 = vmatprep.subr.bf16.mxu0 %v9759_v18  ;;  %7833 = vmatprep.subr.bf16.mxu1 %v9759_v18 }
  0x93   :  { %7050 = vmatprep.mubr.msk.f32.mxu0 %vm8619_vm1, %v9757_v38  ;;  %7061 = vmatprep.mubr.msk.f32.mxu1 %vm8619_vm1, %v9757_v38 }
  0x95   :  { %7829 = vmatpush3.bf16.msra.mxu0 %v8830_v32  ;;  %7835 = vmatpush3.bf16.msra.mxu1 %v8832_v33 }
  0x96   :  { %7836 = vmatprep.subr.bf16.mxu0 %v9759_v18  ;;  %7842 = vmatprep.subr.bf16.mxu1 %v9759_v18 }
 0x13b   :  { %v6946_v49 = vpop.f32.mrb[0].mxu0  ;;  %v6960_v50 = vpop.f32.mrb[0].mxu1 }
 0x13c   :  { %v8919_v51 = vadd.f32 %v6946_v49, %v8914_v47  ;;  %v8922_v52 = vadd.f32 %v6960_v50, %v8916_v48  ;;  %v236_v53 = vpop.f32.mrb[1].mxu0  ;;  %v351_v54 = vpop.f32.mrb[1].mxu1 }
 0x13f   :  { %v6949_v55 = vpop.f32.mrb[2].mxu0  ;;  %v6963_v56 = vpop.f32.mrb[2].mxu1 }
 0x140   :  { %v8925_v57 = vadd.f32 %v6949_v55, %v8914_v47  ;;  %v8928_v58 = vadd.f32 %v6963_v56, %v8916_v48  ;;  %v246_v59 = vpop.f32.mrb[3].mxu0  ;;  %v361_v60 = vpop.f32.mrb[3].mxu1 }
 0x141   :  { %v8931_v61 = vadd.f32 %v8914_v47, %v246_v59  ;;  %v8934_v62 = vadd.f32 %v8916_v48, %v361_v60 }
 0x143   :  { %v6952_v63 = vpop.f32.mrb[4].mxu0  ;;  %v6966_v0 = vpop.f32.mrb[4].mxu1 }
 0x144   :  { %v8937_v1 = vadd.f32 %v6952_v63, %v8914_v47  ;;  %v8940_v2 = vadd.f32 %v6966_v0, %v8916_v48  ;;  %v256_v3 = vpop.f32.mrb[5].mxu0  ;;  %v371_v4 = vpop.f32.mrb[5].mxu1 }
 0x145   :  { %v8943_v5 = vadd.f32 %v8914_v47, %v256_v3  ;;  %v8946_v6 = vadd.f32 %v8916_v48, %v371_v4 }
 0x147   :  { %v6955_v7 = vpop.f32.mrb[6].mxu0  ;;  %v6969_v8 = vpop.f32.mrb[6].mxu1 }
 0x148   :  { %v8949_v9 = vadd.f32 %v6955_v7, %v8914_v47  ;;  %v8952_v10 = vadd.f32 %v6969_v8, %v8916_v48  ;;  %v266_v11 = vpop.f32.mrb[7].mxu0  ;;  %v381_v12 = vpop.f32.mrb[7].mxu1  ;;  %v237_v7 = vadd.f32 %v8914_v47, %v236_v53  ;;  %v352_v8 = vadd.f32 %v8916_v48, %v351_v54 }
 0x149   :  { %v8955_v13 = vadd.f32 %v8914_v47, %v266_v11  ;;  %v8958_v14 = vadd.f32 %v8916_v48, %v381_v12 }
 0x14b   :  { %v6974_v17 = vpop.f32.mrb[8].mxu0  ;;  %v6988_v19 = vpop.f32.mrb[8].mxu1 }
 0x14c   :  { %v8960_v20 = vadd.f32 %v6974_v17, %v6344_v15  ;;  %v8962_v21 = vadd.f32 %v6988_v19, %v6353_v16  ;;  %v466_v22 = vpop.f32.mrb[9].mxu0  ;;  %v581_v23 = vpop.f32.mrb[9].mxu1 }
 0x14f   :  { %v6977_v24 = vpop.f32.mrb[10].mxu0  ;;  %v6991_v25 = vpop.f32.mrb[10].mxu1 }
 0x150   :  { %v8964_v28 = vadd.f32 %v6977_v24, %v6344_v15  ;;  %v8966_v29 = vadd.f32 %v6991_v25, %v6353_v16  ;;  %v476_v30 = vpop.f32.mrb[11].mxu0  ;;  %v591_v31 = vpop.f32.mrb[11].mxu1 }
 0x151   :  { %v8968_v34 = vadd.f32 %v6344_v15, %v476_v30  ;;  %v8970_v35 = vadd.f32 %v6353_v16, %v591_v31 }
 0x153   :  { %v6980_v36 = vpop.f32.mrb[12].mxu0  ;;  %v6994_v37 = vpop.f32.mrb[12].mxu1 }
 0x154   :  { %v8972_v41 = vadd.f32 %v6980_v36, %v6344_v15  ;;  %v8974_v42 = vadd.f32 %v6994_v37, %v6353_v16  ;;  %v486_v43 = vpop.f32.mrb[13].mxu0  ;;  %v601_v44 = vpop.f32.mrb[13].mxu1  ;;  %v467_v36 = vadd.f32 %v6344_v15, %v466_v22  ;;  %v582_v37 = vadd.f32 %v6353_v16, %v581_v23 }
 0x155   :  { %v8976_v49 = vadd.f32 %v6344_v15, %v486_v43  ;;  %v8978_v50 = vadd.f32 %v6353_v16, %v601_v44 }
 0x157   :  { %v6983_v55 = vpop.f32.mrb[14].mxu0  ;;  %v6997_v56 = vpop.f32.mrb[14].mxu1 }
 0x158   :  { %v8980_v59 = vadd.f32 %v6983_v55, %v6344_v15  ;;  %v8982_v60 = vadd.f32 %v6997_v56, %v6353_v16  ;;  %v496_v63 = vpop.f32.mrb[15].mxu0  ;;  %v611_v0 = vpop.f32.mrb[15].mxu1 }
 0x159   :  { %v8984_v3 = vadd.f32 %v6344_v15, %v496_v63  ;;  %v8986_v4 = vadd.f32 %v6353_v16, %v611_v0 }
 0x15b   :  { %v709_v11 = vpop.f32.mrb[16].mxu0  ;;  %v780_v12 = vpop.f32.mrb[16].mxu1 }
 0x15c   :  { %v713_v17 = vadd.f32 %v709_v11, %v237_v7  ;;  %v784_v19 = vadd.f32 %v780_v12, %v352_v8  ;;  %v7008_v24 = vpop.f32.mrb[17].mxu0  ;;  %v7019_v25 = vpop.f32.mrb[17].mxu1 }
 0x15e   :  { %v6374_v30 = vmul.f32 -1.442695, %v713_v17  ;;  %v6375_v31 = vmul.f32 -1.442695, %v784_v19 }
 0x160   :  { %8237 = vpow2.f32 %v6374_v30 }
 0x161   :  { %8239 = vpow2.f32 %v6375_v31 }
 0x163   :  { %v851_v43 = vpop.f32.mrb[18].mxu0  ;;  %v922_v44 = vpop.f32.mrb[18].mxu1 }
 0x164   :  { %v855_v55 = vadd.f32 %v851_v43, %v467_v36  ;;  %v926_v56 = vadd.f32 %v922_v44, %v582_v37  ;;  %v7030_v63 = vpop.f32.mrb[19].mxu0  ;;  %v7041_v47 = vpop.f32.mrb[19].mxu1 }
 0x166   :  { %v6376_v53 = vmul.f32 -1.442695, %v926_v56 }
 0x168   :  { %8241 = vpow2.f32 %v6376_v53 }
 0x169   :  { %8243 = vtanh.f32 %v855_v55 }
 0x16a   :  { %v8238_v48 = vpop.eup %8237 }
 0x16b   :  { %v8240_v54 = vpop.eup %8239  ;;  %v930_v0 = vadd.f32 1.0, %v8238_v48 }
 0x16c   :  { %v936_v7 = vadd.f32 1.0, %v8240_v54 }
 0x16d   :  { %8245 = vrcp.f32 %v930_v0 }
 0x16e   :  { %8247 = vrcp.f32 %v936_v7 }
 0x172   :  { %v8242_v8 = vpop.eup %8241 }
 0x173   :  { %v8244_v11 = vpop.eup %8243  ;;  %v943_v22 = vadd.f32 1.0, %v8242_v8 }
 0x175   :  { %8249 = vrcp.f32 %v943_v22 }
 0x177   :  { %v8246_v12 = vpop.eup %8245 }
 0x178   :  { %v8248_v15 = vpop.eup %8247  ;;  %v947_v16 = vmul.f32 %v8246_v12, %v8244_v11 }
 0x179   :  { %v946_v23 = vmul.f32 0.0, %v8248_v15 }
 0x17b   :  { %v8990_v17 = vadd.f32 %v947_v16, %v946_v23 }
 0x17d   :  { %8251 = vtanh.f32 %v8990_v17 }
 0x17f   :  { %v8250_v19 = vpop.eup %8249 }
 0x187   :  { %v8252_v24 = vpop.eup %8251 }
 0x188   :  { %v950_v25 = vmul.f32 %v8252_v24, %v8250_v19 }
 0x18a   :  { %951 = vst.msk [vmem:[#allocation3] sm:$0xff] %vm639_vm2, %v950_v25  ;;  %7051 = vmatmul.mubr.msk.f32.vlgmr.msra.gmra.mrb[20].mxu0 %vm639_vm2, %v950_v25  ;;  %7062 = vmatmul.mubr.msk.f32.vlgmr.msra.gmra.mrb[20].mxu1 %vm639_vm2, %v950_v25 }
 0x18b   :  { %7838 = vmatpush3.bf16.msra.mxu0 %v8866_v39  ;;  %7844 = vmatpush3.bf16.msra.mxu1 %v8868_v40 }
 0x18c   :  { %7839 = vmatprep.subr.bf16.mxu0 %v9759_v18  ;;  %7845 = vmatprep.subr.bf16.mxu1 %v9759_v18 }
 0x18d   :  { %7072 = vmatprep.mubr.msk.f32.mxu0 %vm8619_vm1, %v9757_v38  ;;  %7083 = vmatprep.mubr.msk.f32.mxu1 %vm8619_vm1, %v9757_v38 }
 0x18f   :  { %7841 = vmatpush3.bf16.msra.mxu0 %v8886_v45  ;;  %7847 = vmatpush3.bf16.msra.mxu1 %v8888_v46 }
 0x190   :  { %7848 = vmatprep.subr.bf16.mxu0 %v9759_v18  ;;  %7854 = vmatprep.subr.bf16.mxu1 %v9759_v18 }
 0x192   :  { %7073 = vmatmul.mubr.msk.f32.vlgmr.msra.gmra.mrb[22].mxu0 %vm639_vm2, %v950_v25  ;;  %7084 = vmatmul.mubr.msk.f32.vlgmr.msra.gmra.mrb[22].mxu1 %vm639_vm2, %v950_v25 }
 0x193   :  { %7850 = vmatpush3.bf16.msra.mxu0 %v8808_v26  ;;  %7856 = vmatpush3.bf16.msra.mxu1 %v8810_v27 }
 0x194   :  { %7851 = vmatprep.subr.bf16.mxu0 %v9759_v18  ;;  %7857 = vmatprep.subr.bf16.mxu1 %v9759_v18 }
 0x195   :  { %7094 = vmatprep.mubr.msk.f32.mxu0 %vm8619_vm1, %v9757_v38  ;;  %7105 = vmatprep.mubr.msk.f32.mxu1 %vm8619_vm1, %v9757_v38 }
 0x197   :  { %7853 = vmatpush3.bf16.msra.mxu0 %v8830_v32  ;;  %7859 = vmatpush3.bf16.msra.mxu1 %v8832_v33 }
 0x198   :  { %7860 = vmatprep.subr.bf16.mxu0 %v9759_v18  ;;  %7866 = vmatprep.subr.bf16.mxu1 %v9759_v18 }
 0x25d   :  { %v1021_v30 = vpop.f32.mrb[20].mxu0  ;;  %v1092_v31 = vpop.f32.mrb[20].mxu1 }
 0x25e   :  { %v1025_v36 = vadd.f32 %v1021_v30, %v8919_v51  ;;  %v1096_v37 = vadd.f32 %v1092_v31, %v8922_v52  ;;  %v7052_v43 = vpop.f32.mrb[21].mxu0  ;;  %v7063_v44 = vpop.f32.mrb[21].mxu1 }
 0x260   :  { %v6381_v55 = vmul.f32 -1.442695, %v1025_v36  ;;  %v6382_v56 = vmul.f32 -1.442695, %v1096_v37 }
 0x262   :  { %8253 = vpow2.f32 %v6381_v55 }
 0x263   :  { %8255 = vpow2.f32 %v6382_v56 }
 0x265   :  { %v1163_v63 = vpop.f32.mrb[22].mxu0  ;;  %v1234_v47 = vpop.f32.mrb[22].mxu1 }
 0x266   :  { %v1167_v53 = vadd.f32 %v1163_v63, %v8960_v20  ;;  %v1238_v48 = vadd.f32 %v1234_v47, %v8962_v21  ;;  %v7074_v54 = vpop.f32.mrb[23].mxu0  ;;  %v7085_v0 = vpop.f32.mrb[23].mxu1 }
 0x268   :  { %v6383_v7 = vmul.f32 -1.442695, %v1238_v48 }
 0x26a   :  { %8257 = vpow2.f32 %v6383_v7 }
 0x26b   :  { %8259 = vtanh.f32 %v1167_v53 }
 0x26c   :  { %v8254_v8 = vpop.eup %8253 }
 0x26d   :  { %v8256_v11 = vpop.eup %8255  ;;  %v1242_v51 = vadd.f32 1.0, %v8254_v8 }
 0x26e   :  { %v1248_v52 = vadd.f32 1.0, %v8256_v11 }
 0x26f   :  { %8261 = vrcp.f32 %v1242_v51 }
 0x270   :  { %8263 = vrcp.f32 %v1248_v52 }
 0x274   :  { %v8258_v12 = vpop.eup %8257 }
 0x275   :  { %v8260_v15 = vpop.eup %8259  ;;  %v1255_v19 = vadd.f32 1.0, %v8258_v12 }
 0x277   :  { %8265 = vrcp.f32 %v1255_v19 }
 0x279   :  { %v8262_v16 = vpop.eup %8261 }
 0x27a   :  { %v8264_v22 = vpop.eup %8263  ;;  %v1259_v23 = vmul.f32 %v8262_v16, %v8260_v15 }
 0x27b   :  { %v1258_v20 = vmul.f32 %v8264_v22, %v8990_v17 }
 0x27d   :  { %v1260_v21 = vadd.f32 %v1259_v23, %v1258_v20 }
 0x27f   :  { %8267 = vtanh.f32 %v1260_v21 }
 0x281   :  { %v8266_v24 = vpop.eup %8265 }
 0x289   :  { %v8268_v25 = vpop.eup %8267 }
 0x28a   :  { %v1262_v30 = vmul.f32 %v8268_v25, %v8266_v24 }
 0x28c   :  { %1263 = vst.msk [vmem:[#allocation3 + $0x8] sm:$0xff] %vm639_vm2, %v1262_v30  ;;  %7095 = vmatmul.mubr.msk.f32.vlgmr.msra.gmra.mrb[24].mxu0 %vm639_vm2, %v1262_v30  ;;  %7106 = vmatmul.mubr.msk.f32.vlgmr.msra.gmra.mrb[24].mxu1 %vm639_vm2, %v1262_v30 }
 0x28d   :  { %7862 = vmatpush3.bf16.msra.mxu0 %v8866_v39  ;;  %7868 = vmatpush3.bf16.msra.mxu1 %v8868_v40 }
 0x28e   :  { %7863 = vmatprep.subr.bf16.mxu0 %v9759_v18  ;;  %7869 = vmatprep.subr.bf16.mxu1 %v9759_v18 }
 0x28f   :  { %7116 = vmatprep.mubr.msk.f32.mxu0 %vm8619_vm1, %v9757_v38  ;;  %7127 = vmatprep.mubr.msk.f32.mxu1 %vm8619_vm1, %v9757_v38 }
 0x291   :  { %7865 = vmatpush3.bf16.msra.mxu0 %v8886_v45  ;;  %7871 = vmatpush3.bf16.msra.mxu1 %v8888_v46 }
 0x292   :  { %7872 = vmatprep.subr.bf16.mxu0 %v9759_v18  ;;  %7878 = vmatprep.subr.bf16.mxu1 %v9759_v18 }
 0x294   :  { %7117 = vmatmul.mubr.msk.f32.vlgmr.msra.gmra.mrb[26].mxu0 %vm639_vm2, %v1262_v30  ;;  %7128 = vmatmul.mubr.msk.f32.vlgmr.msra.gmra.mrb[26].mxu1 %vm639_vm2, %v1262_v30 }
 0x295   :  { %7874 = vmatpush3.bf16.msra.mxu0 %v8808_v26  ;;  %7880 = vmatpush3.bf16.msra.mxu1 %v8810_v27 }
 0x296   :  { %7875 = vmatprep.subr.bf16.mxu0 %v9759_v18  ;;  %7881 = vmatprep.subr.bf16.mxu1 %v9759_v18 }
 0x297   :  { %7138 = vmatprep.mubr.msk.f32.mxu0 %vm8619_vm1, %v9757_v38  ;;  %7149 = vmatprep.mubr.msk.f32.mxu1 %vm8619_vm1, %v9757_v38 }
 0x299   :  { %7877 = vmatpush3.bf16.msra.mxu0 %v8830_v32  ;;  %7883 = vmatpush3.bf16.msra.mxu1 %v8832_v33 }
 0x29a   :  { %7884 = vmatprep.subr.bf16.mxu0 %v9759_v18  ;;  %7890 = vmatprep.subr.bf16.mxu1 %v9759_v18 }
 0x35f   :  { %v1333_v17 = vpop.f32.mrb[24].mxu0  ;;  %v1404_v31 = vpop.f32.mrb[24].mxu1 }
 0x360   :  { %v1337_v36 = vadd.f32 %v1333_v17, %v8931_v61  ;;  %v1408_v37 = vadd.f32 %v1404_v31, %v8934_v62  ;;  %v7096_v43 = vpop.f32.mrb[25].mxu0  ;;  %v7107_v44 = vpop.f32.mrb[25].mxu1 }
 0x362   :  { %v6388_v55 = vmul.f32 -1.442695, %v1337_v36  ;;  %v6389_v56 = vmul.f32 -1.442695, %v1408_v37 }
 0x364   :  { %8269 = vpow2.f32 %v6388_v55 }
 0x365   :  { %8271 = vpow2.f32 %v6389_v56 }
 0x367   :  { %v1475_v63 = vpop.f32.mrb[26].mxu0  ;;  %v1546_v47 = vpop.f32.mrb[26].mxu1 }
 0x368   :  { %v1479_v53 = vadd.f32 %v1475_v63, %v8968_v34  ;;  %v1550_v48 = vadd.f32 %v1546_v47, %v8970_v35  ;;  %v7118_v54 = vpop.f32.mrb[27].mxu0  ;;  %v7129_v0 = vpop.f32.mrb[27].mxu1 }
 0x36a   :  { %v6390_v7 = vmul.f32 -1.442695, %v1550_v48 }
 0x36c   :  { %8273 = vpow2.f32 %v6390_v7 }
 0x36d   :  { %8275 = vtanh.f32 %v1479_v53 }
 0x36e   :  { %v8270_v8 = vpop.eup %8269 }
 0x36f   :  { %v8272_v11 = vpop.eup %8271  ;;  %v1554_v61 = vadd.f32 1.0, %v8270_v8 }
 0x370   :  { %v1560_v62 = vadd.f32 1.0, %v8272_v11 }
 0x371   :  { %8277 = vrcp.f32 %v1554_v61 }
 0x372   :  { %8279 = vrcp.f32 %v1560_v62 }
 0x376   :  { %v8274_v51 = vpop.eup %8273 }
 0x377   :  { %v8276_v52 = vpop.eup %8275  ;;  %v1567_v22 = vadd.f32 1.0, %v8274_v51 }
 0x379   :  { %8281 = vrcp.f32 %v1567_v22 }
 0x37b   :  { %v8278_v12 = vpop.eup %8277 }
 0x37c   :  { %v8280_v15 = vpop.eup %8279  ;;  %v1571_v16 = vmul.f32 %v8278_v12, %v8276_v52 }
 0x37d   :  { %v1570_v34 = vmul.f32 %v8280_v15, %v1260_v21 }
 0x37f   :  { %v1572_v23 = vadd.f32 %v1571_v16, %v1570_v34 }
 0x381   :  { %8283 = vtanh.f32 %v1572_v23 }
 0x383   :  { %v8282_v35 = vpop.eup %8281 }
 0x38b   :  { %v8284_v19 = vpop.eup %8283 }
 0x38c   :  { %v1574_v20 = vmul.f32 %v8284_v19, %v8282_v35 }
 0x38e   :  { %1575 = vst.msk [vmem:[#allocation3 + $0x10] sm:$0xff] %vm639_vm2, %v1574_v20  ;;  %7139 = vmatmul.mubr.msk.f32.vlgmr.msra.gmra.mrb[28].mxu0 %vm639_vm2, %v1574_v20  ;;  %7150 = vmatmul.mubr.msk.f32.vlgmr.msra.gmra.mrb[28].mxu1 %vm639_vm2, %v1574_v20 }
 0x38f   :  { %7886 = vmatpush3.bf16.msra.mxu0 %v8866_v39  ;;  %7892 = vmatpush3.bf16.msra.mxu1 %v8868_v40 }
 0x390   :  { %7887 = vmatprep.subr.bf16.mxu0 %v9759_v18  ;;  %7893 = vmatprep.subr.bf16.mxu1 %v9759_v18 }
 0x391   :  { %7160 = vmatprep.mubr.msk.f32.mxu0 %vm8619_vm1, %v9757_v38  ;;  %7171 = vmatprep.mubr.msk.f32.mxu1 %vm8619_vm1, %v9757_v38 }
 0x393   :  { %7889 = vmatpush3.bf16.msra.mxu0 %v8886_v45  ;;  %7895 = vmatpush3.bf16.msra.mxu1 %v8888_v46 }
 0x394   :  { %7896 = vmatprep.subr.bf16.mxu0 %v9759_v18  ;;  %7902 = vmatprep.subr.bf16.mxu1 %v9759_v18 }
 0x396   :  { %7161 = vmatmul.mubr.msk.f32.vlgmr.msra.gmra.mrb[30].mxu0 %vm639_vm2, %v1574_v20  ;;  %7172 = vmatmul.mubr.msk.f32.vlgmr.msra.gmra.mrb[30].mxu1 %vm639_vm2, %v1574_v20 }
 0x397   :  { %7898 = vmatpush3.bf16.msra.mxu0 %v8808_v26  ;;  %7904 = vmatpush3.bf16.msra.mxu1 %v8810_v27 }
 0x398   :  { %7899 = vmatprep.subr.bf16.mxu0 %v9759_v18  ;;  %7905 = vmatprep.subr.bf16.mxu1 %v9759_v18 }
 0x399   :  { %7182 = vmatprep.mubr.msk.f32.mxu0 %vm8619_vm1, %v9757_v38  ;;  %7193 = vmatprep.mubr.msk.f32.mxu1 %vm8619_vm1, %v9757_v38 }
 0x39b   :  { %7901 = vmatpush3.bf16.msra.mxu0 %v8830_v32  ;;  %7907 = vmatpush3.bf16.msra.mxu1 %v8832_v33 }
 0x39c   :  { %7908 = vmatprep.subr.bf16.mxu0 %v9759_v18  ;;  %7914 = vmatprep.subr.bf16.mxu1 %v9759_v18 }
 0x461   :  { %v1645_v21 = vpop.f32.mrb[28].mxu0  ;;  %v1716_v24 = vpop.f32.mrb[28].mxu1 }
 0x462   :  { %v1649_v25 = vadd.f32 %v1645_v21, %v8925_v57  ;;  %v1720_v30 = vadd.f32 %v1716_v24, %v8928_v58  ;;  %v7140_v17 = vpop.f32.mrb[29].mxu0  ;;  %v7151_v31 = vpop.f32.mrb[29].mxu1 }
 0x464   :  { %v6395_v36 = vmul.f32 -1.442695, %v1649_v25  ;;  %v6396_v37 = vmul.f32 -1.442695, %v1720_v30 }
 0x466   :  { %8285 = vpow2.f32 %v6395_v36 }
 0x467   :  { %8287 = vpow2.f32 %v6396_v37 }
 0x469   :  { %v1787_v43 = vpop.f32.mrb[30].mxu0  ;;  %v1858_v44 = vpop.f32.mrb[30].mxu1 }
 0x46a   :  { %v1791_v55 = vadd.f32 %v1787_v43, %v8964_v28  ;;  %v1862_v56 = vadd.f32 %v1858_v44, %v8966_v29  ;;  %v7162_v63 = vpop.f32.mrb[31].mxu0  ;;  %v7173_v47 = vpop.f32.mrb[31].mxu1 }
 0x46c   :  { %v6397_v53 = vmul.f32 -1.442695, %v1862_v56 }
 0x46e   :  { %8289 = vpow2.f32 %v6397_v53 }
 0x46f   :  { %8291 = vtanh.f32 %v1791_v55 }
 0x470   :  { %v8286_v48 = vpop.eup %8285 }
 0x471   :  { %v8288_v54 = vpop.eup %8287  ;;  %v1866_v57 = vadd.f32 1.0, %v8286_v48 }
 0x472   :  { %v1872_v58 = vadd.f32 1.0, %v8288_v54 }
 0x473   :  { %8293 = vrcp.f32 %v1866_v57 }
 0x474   :  { %8295 = vrcp.f32 %v1872_v58 }
 0x478   :  { %v8290_v0 = vpop.eup %8289 }
 0x479   :  { %v8292_v7 = vpop.eup %8291  ;;  %v1879_v62 = vadd.f32 1.0, %v8290_v0 }
 0x47b   :  { %8297 = vrcp.f32 %v1879_v62 }
 0x47d   :  { %v8294_v8 = vpop.eup %8293 }
 0x47e   :  { %v8296_v11 = vpop.eup %8295  ;;  %v1883_v61 = vmul.f32 %v8294_v8, %v8292_v7 }
 0x47f   :  { %v1882_v28 = vmul.f32 %v8296_v11, %v1572_v23 }
 0x481   :  { %v1884_v51 = vadd.f32 %v1883_v61, %v1882_v28 }
 0x483   :  { %8299 = vtanh.f32 %v1884_v51 }
 0x485   :  { %v8298_v29 = vpop.eup %8297 }
 0x48d   :  { %v8300_v52 = vpop.eup %8299 }
 0x48e   :  { %v1886_v12 = vmul.f32 %v8300_v52, %v8298_v29 }
 0x490   :  { %1887 = vst.msk [vmem:[#allocation3 + $0x18] sm:$0xff] %vm639_vm2, %v1886_v12  ;;  %7183 = vmatmul.mubr.msk.f32.vlgmr.msra.gmra.mrb[32].mxu0 %vm639_vm2, %v1886_v12  ;;  %7194 = vmatmul.mubr.msk.f32.vlgmr.msra.gmra.mrb[32].mxu1 %vm639_vm2, %v1886_v12 }
 0x491   :  { %7910 = vmatpush3.bf16.msra.mxu0 %v8866_v39  ;;  %7916 = vmatpush3.bf16.msra.mxu1 %v8868_v40 }
 0x492   :  { %7911 = vmatprep.subr.bf16.mxu0 %v9759_v18  ;;  %7917 = vmatprep.subr.bf16.mxu1 %v9759_v18 }
 0x493   :  { %7204 = vmatprep.mubr.msk.f32.mxu0 %vm8619_vm1, %v9757_v38  ;;  %7215 = vmatprep.mubr.msk.f32.mxu1 %vm8619_vm1, %v9757_v38 }
 0x495   :  { %7913 = vmatpush3.bf16.msra.mxu0 %v8886_v45  ;;  %7919 = vmatpush3.bf16.msra.mxu1 %v8888_v46 }
 0x496   :  { %7920 = vmatprep.subr.bf16.mxu0 %v9759_v18  ;;  %7926 = vmatprep.subr.bf16.mxu1 %v9759_v18 }
 0x498   :  { %7205 = vmatmul.mubr.msk.f32.vlgmr.msra.gmra.mrb[34].mxu0 %vm639_vm2, %v1886_v12  ;;  %7216 = vmatmul.mubr.msk.f32.vlgmr.msra.gmra.mrb[34].mxu1 %vm639_vm2, %v1886_v12 }
 0x499   :  { %7922 = vmatpush3.bf16.msra.mxu0 %v8808_v26  ;;  %7928 = vmatpush3.bf16.msra.mxu1 %v8810_v27 }
 0x49a   :  { %7923 = vmatprep.subr.bf16.mxu0 %v9759_v18  ;;  %7929 = vmatprep.subr.bf16.mxu1 %v9759_v18 }
 0x49b   :  { %7226 = vmatprep.mubr.msk.f32.mxu0 %vm8619_vm1, %v9757_v38  ;;  %7237 = vmatprep.mubr.msk.f32.mxu1 %vm8619_vm1, %v9757_v38 }
 0x49d   :  { %7925 = vmatpush3.bf16.msra.mxu0 %v8830_v32  ;;  %7931 = vmatpush3.bf16.msra.mxu1 %v8832_v33 }
 0x49e   :  { %7932 = vmatprep.subr.bf16.mxu0 %v9759_v18  ;;  %7938 = vmatprep.subr.bf16.mxu1 %v9759_v18 }
 0x563   :  { %v1957_v15 = vpop.f32.mrb[32].mxu0  ;;  %v2028_v16 = vpop.f32.mrb[32].mxu1 }
 0x564   :  { %v1961_v22 = vadd.f32 %v1957_v15, %v8943_v5  ;;  %v2032_v34 = vadd.f32 %v2028_v16, %v8946_v6  ;;  %v7184_v23 = vpop.f32.mrb[33].mxu0  ;;  %v7195_v35 = vpop.f32.mrb[33].mxu1 }
 0x566   :  { %v6402_v19 = vmul.f32 -1.442695, %v1961_v22  ;;  %v6403_v20 = vmul.f32 -1.442695, %v2032_v34 }
 0x568   :  { %8301 = vpow2.f32 %v6402_v19 }
 0x569   :  { %8303 = vpow2.f32 %v6403_v20 }
 0x56b   :  { %v2099_v21 = vpop.f32.mrb[34].mxu0  ;;  %v2170_v24 = vpop.f32.mrb[34].mxu1 }
 0x56c   :  { %v2103_v25 = vadd.f32 %v2099_v21, %v8976_v49  ;;  %v2174_v30 = vadd.f32 %v2170_v24, %v8978_v50  ;;  %v7206_v17 = vpop.f32.mrb[35].mxu0  ;;  %v7217_v31 = vpop.f32.mrb[35].mxu1 }
 0x56e   :  { %v6404_v36 = vmul.f32 -1.442695, %v2174_v30 }
 0x570   :  { %8305 = vpow2.f32 %v6404_v36 }
 0x571   :  { %8307 = vtanh.f32 %v2103_v25 }
 0x572   :  { %v8302_v37 = vpop.eup %8301 }
 0x573   :  { %v8304_v43 = vpop.eup %8303  ;;  %v2178_v5 = vadd.f32 1.0, %v8302_v37 }
 0x574   :  { %v2184_v6 = vadd.f32 1.0, %v8304_v43 }
 0x575   :  { %8309 = vrcp.f32 %v2178_v5 }
 0x576   :  { %8311 = vrcp.f32 %v2184_v6 }
 0x57a   :  { %v8306_v44 = vpop.eup %8305 }
 0x57b   :  { %v8308_v55 = vpop.eup %8307  ;;  %v2191_v53 = vadd.f32 1.0, %v8306_v44 }
 0x57d   :  { %8313 = vrcp.f32 %v2191_v53 }
 0x57f   :  { %v8310_v56 = vpop.eup %8309 }
 0x580   :  { %v8312_v63 = vpop.eup %8311  ;;  %v2195_v47 = vmul.f32 %v8310_v56, %v8308_v55 }
 0x581   :  { %v2194_v49 = vmul.f32 %v8312_v63, %v1884_v51 }
 0x583   :  { %v2196_v48 = vadd.f32 %v2195_v47, %v2194_v49 }
 0x585   :  { %8315 = vtanh.f32 %v2196_v48 }
 0x587   :  { %v8314_v50 = vpop.eup %8313 }
 0x58f   :  { %v8316_v54 = vpop.eup %8315 }
 0x590   :  { %v2198_v57 = vmul.f32 %v8316_v54, %v8314_v50 }
 0x592   :  { %2199 = vst.msk [vmem:[#allocation3 + $0x20] sm:$0xff] %vm639_vm2, %v2198_v57  ;;  %7227 = vmatmul.mubr.msk.f32.vlgmr.msra.gmra.mrb[36].mxu0 %vm639_vm2, %v2198_v57  ;;  %7238 = vmatmul.mubr.msk.f32.vlgmr.msra.gmra.mrb[36].mxu1 %vm639_vm2, %v2198_v57 }
 0x593   :  { %7934 = vmatpush3.bf16.msra.mxu0 %v8866_v39  ;;  %7940 = vmatpush3.bf16.msra.mxu1 %v8868_v40 }
 0x594   :  { %7935 = vmatprep.subr.bf16.mxu0 %v9759_v18  ;;  %7941 = vmatprep.subr.bf16.mxu1 %v9759_v18 }
 0x595   :  { %7248 = vmatprep.mubr.msk.f32.mxu0 %vm8619_vm1, %v9757_v38  ;;  %7259 = vmatprep.mubr.msk.f32.mxu1 %vm8619_vm1, %v9757_v38 }
 0x597   :  { %7937 = vmatpush3.bf16.msra.mxu0 %v8886_v45  ;;  %7943 = vmatpush3.bf16.msra.mxu1 %v8888_v46 }
 0x598   :  { %7944 = vmatprep.subr.bf16.mxu0 %v9759_v18  ;;  %7950 = vmatprep.subr.bf16.mxu1 %v9759_v18 }
 0x59a   :  { %7249 = vmatmul.mubr.msk.f32.vlgmr.msra.gmra.mrb[38].mxu0 %vm639_vm2, %v2198_v57  ;;  %7260 = vmatmul.mubr.msk.f32.vlgmr.msra.gmra.mrb[38].mxu1 %vm639_vm2, %v2198_v57 }
 0x59b   :  { %7946 = vmatpush3.bf16.msra.mxu0 %v8808_v26  ;;  %7952 = vmatpush3.bf16.msra.mxu1 %v8810_v27 }
 0x59c   :  { %7947 = vmatprep.subr.bf16.mxu0 %v9759_v18  ;;  %7953 = vmatprep.subr.bf16.mxu1 %v9759_v18 }
 0x59d   :  { %7270 = vmatprep.mubr.msk.f32.mxu0 %vm8619_vm1, %v9757_v38  ;;  %7281 = vmatprep.mubr.msk.f32.mxu1 %vm8619_vm1, %v9757_v38 }
 0x59f   :  { %7949 = vmatpush3.bf16.msra.mxu0 %v8830_v32  ;;  %7955 = vmatpush3.bf16.msra.mxu1 %v8832_v33 }
 0x5a0   :  { %7956 = vmatprep.subr.bf16.mxu0 %v9759_v18  ;;  %7962 = vmatprep.subr.bf16.mxu1 %v9759_v18 }
 0x665   :  { %v2269_v58 = vpop.f32.mrb[36].mxu0  ;;  %v2340_v0 = vpop.f32.mrb[36].mxu1 }
 0x666   :  { %v2273_v7 = vadd.f32 %v2269_v58, %v8937_v1  ;;  %v2344_v8 = vadd.f32 %v2340_v0, %v8940_v2  ;;  %v7228_v11 = vpop.f32.mrb[37].mxu0  ;;  %v7239_v61 = vpop.f32.mrb[37].mxu1 }
 0x668   :  { %v6409_v62 = vmul.f32 -1.442695, %v2273_v7  ;;  %v6410_v28 = vmul.f32 -1.442695, %v2344_v8 }
 0x66a   :  { %8317 = vpow2.f32 %v6409_v62  ;;  %v3144_v62 = vld [vmem:[%s9749_s4] sm:$0xff] }
 0x66b   :  { %8319 = vpow2.f32 %v6410_v28  ;;  %v3145_v28 = vld [vmem:[%s9749_s4 + $0x8] sm:$0xff] }
 0x66d   :  { %v2411_v51 = vpop.f32.mrb[38].mxu0  ;;  %v2482_v29 = vpop.f32.mrb[38].mxu1 }
 0x66e   :  { %v2415_v52 = vadd.f32 %v2411_v51, %v8972_v41  ;;  %v2486_v12 = vadd.f32 %v2482_v29, %v8974_v42  ;;  %v7250_v15 = vpop.f32.mrb[39].mxu0  ;;  %v7261_v16 = vpop.f32.mrb[39].mxu1  ;;  %v6435_v51 = vld [vmem:[%s9749_s4 + $0x20] sm:$0xff]  ;;  %v6436_v29 = vld [vmem:[%s9749_s4 + $0x28] sm:$0xff] }
 0x66f   :  { %v3146_v15 = vld [vmem:[%s9749_s4 + $0x10] sm:$0xff]  ;;  %v6438_v16 = vld [vmem:[%s9749_s4 + $0x38] sm:$0xff] }
 0x670   :  { %v6411_v22 = vmul.f32 -1.442695, %v2486_v12  ;;  %v8000_v12 = vpack.c.bf16 %v6436_v29, %v6435_v51 }
 0x672   :  { %8321 = vpow2.f32 %v6411_v22 }
 0x673   :  { %8323 = vtanh.f32 %v2415_v52  ;;  %v7992_v52 = vpack.c.bf16 %v3145_v28, %v3144_v62 }
 0x674   :  { %v8318_v34 = vpop.eup %8317 }
 0x675   :  { %v8320_v23 = vpop.eup %8319  ;;  %v2490_v1 = vadd.f32 1.0, %v8318_v34 }
 0x676   :  { %v2496_v2 = vadd.f32 1.0, %v8320_v23  ;;  %v9234_v23 = vld [vmem:[#allocation3] sm:$0xff] }
 0x677   :  { %8325 = vrcp.f32 %v2490_v1  ;;  %v9252_v1 = vld [vmem:[#allocation3 + $0x18] sm:$0xff] }
 0x678   :  { %8327 = vrcp.f32 %v2496_v2  ;;  %v9256_v2 = vld [vmem:[#allocation3 + $0x20] sm:$0xff] }
 0x67c   :  { %v8322_v35 = vpop.eup %8321 }
 0x67d   :  { %v8324_v19 = vpop.eup %8323  ;;  %v2503_v25 = vadd.f32 1.0, %v8322_v35 }
 0x67f   :  { %8329 = vrcp.f32 %v2503_v25 }
 0x681   :  { %v8326_v20 = vpop.eup %8325 }
 0x682   :  { %v8328_v21 = vpop.eup %8327  ;;  %v2507_v24 = vmul.f32 %v8326_v20, %v8324_v19  ;;  %v6448_v20 = vld [vmem:[%s9749_s4 + $0x40] sm:$0xff] }
 0x683   :  { %v2506_v41 = vmul.f32 %v8328_v21, %v2196_v48  ;;  %v6449_v21 = vld [vmem:[%s9749_s4 + $0x48] sm:$0xff] }
 0x684   :  { %v8008_v25 = vpack.c.bf16 %v6449_v21, %v6448_v20  ;;  %v3638_v20 = vld [vmem:[#allocation9] sm:$0xff]  ;;  %v3639_v21 = vld [vmem:[#allocation9 + $0x8] sm:$0xff] }
 0x685   :  { %v2508_v30 = vadd.f32 %v2507_v24, %v2506_v41  ;;  %v6461_v24 = vld [vmem:[%s9749_s4 + $0x60] sm:$0xff]  ;;  %v6462_v41 = vld [vmem:[%s9749_s4 + $0x68] sm:$0xff] }
 0x687   :  { %8331 = vtanh.f32 %v2508_v30 }
 0x689   :  { %v8330_v42 = vpop.eup %8329 }
 0x691   :  { %v8332_v17 = vpop.eup %8331 }
 0x692   :  { %v2510_v31 = vmul.f32 %v8332_v17, %v8330_v42  ;;  %v6451_v42 = vld [vmem:[%s9749_s4 + $0x58] sm:$0xff]  ;;  %v8016_v17 = vpack.c.bf16 %v6462_v41, %v6461_v24  ;;  %v3643_v24 = vld [vmem:[#allocation9 + $0x20] sm:$0xff] }
 0x694   :  { %2511 = vst.msk [vmem:[#allocation3 + $0x28] sm:$0xff] %vm639_vm2, %v2510_v31  ;;  %7271 = vmatmul.mubr.msk.f32.vlgmr.msra.gmra.mrb[40].mxu0 %vm639_vm2, %v2510_v31  ;;  %7282 = vmatmul.mubr.msk.f32.vlgmr.msra.gmra.mrb[40].mxu1 %vm639_vm2, %v2510_v31 }
 0x695   :  { %7958 = vmatpush3.bf16.msra.mxu0 %v8866_v39  ;;  %7964 = vmatpush3.bf16.msra.mxu1 %v8868_v40 }
 0x696   :  { %7959 = vmatprep.subr.bf16.mxu0 %v9759_v18  ;;  %7965 = vmatprep.subr.bf16.mxu1 %v9759_v18 }
 0x697   :  { %7292 = vmatprep.mubr.msk.f32.mxu0 %vm8619_vm1, %v9757_v38  ;;  %7303 = vmatprep.mubr.msk.f32.mxu1 %vm8619_vm1, %v9757_v38 }
 0x699   :  { %7961 = vmatpush3.bf16.msra.mxu0 %v8886_v45  ;;  %7967 = vmatpush3.bf16.msra.mxu1 %v8888_v46 }
 0x69a   :  { %7968 = vmatprep.subr.bf16.mxu0 %v9759_v18  ;;  %7974 = vmatprep.subr.bf16.mxu1 %v9759_v18 }
 0x69b   :  { %v9264_v35 = vld [vmem:[#allocation3 + $0x28] sm:$0xff] }
 0x69c   :  { %7293 = vmatmul.mubr.msk.f32.vlgmr.msra.gmra.mrb[42].mxu0 %vm639_vm2, %v2510_v31  ;;  %7304 = vmatmul.mubr.msk.f32.vlgmr.msra.gmra.mrb[42].mxu1 %vm639_vm2, %v2510_v31 }
 0x69d   :  { %7970 = vmatpush3.bf16.msra.mxu0 %v8808_v26  ;;  %7976 = vmatpush3.bf16.msra.mxu1 %v8810_v27 }
 0x69e   :  { %7971 = vmatprep.subr.bf16.mxu0 %v9759_v18  ;;  %7977 = vmatprep.subr.bf16.mxu1 %v9759_v18 }
 0x69f   :  { %7314 = vmatprep.mubr.msk.f32.mxu0 %vm8619_vm1, %v9757_v38  ;;  %7325 = vmatprep.mubr.msk.f32.mxu1 %vm8619_vm1, %v9757_v38 }
 0x6a1   :  { %7973 = vmatpush3.bf16.msra.mxu0 %v8830_v32  ;;  %7979 = vmatpush3.bf16.msra.mxu1 %v8832_v33 }
 0x6a2   :  { %7980 = vmatprep.subr.bf16.mxu0 %v9759_v18  ;;  %7986 = vmatprep.subr.bf16.mxu1 %v9759_v18 }
 0x767   :  { %v2581_v26 = vpop.f32.mrb[40].mxu0  ;;  %v2652_v27 = vpop.f32.mrb[40].mxu1 }
 0x768   :  { %v2585_v36 = vadd.f32 %v2581_v26, %v8955_v13  ;;  %v2656_v37 = vadd.f32 %v2652_v27, %v8958_v14  ;;  %v7272_v43 = vpop.f32.mrb[41].mxu0  ;;  %v7283_v5 = vpop.f32.mrb[41].mxu1  ;;  %v6463_v26 = vld [vmem:[%s9749_s4 + $0x70] sm:$0xff]  ;;  %v6464_v27 = vld [vmem:[%s9749_s4 + $0x78] sm:$0xff] }
 0x76a   :  { %v6416_v6 = vmul.f32 -1.442695, %v2585_v36  ;;  %v6417_v44 = vmul.f32 -1.442695, %v2656_v37  ;;  %v8020_v36 = vpack.c.bf16 %v6464_v27, %v6463_v26  ;;  %v3646_v26 = vld [vmem:[#allocation9 + $0x38] sm:$0xff] }
 0x76c   :  { %8333 = vpow2.f32 %v6416_v6 }
 0x76d   :  { %8335 = vpow2.f32 %v6417_v44 }
 0x76f   :  { %v2723_v55 = vpop.f32.mrb[42].mxu0  ;;  %v2794_v32 = vpop.f32.mrb[42].mxu1 }
 0x770   :  { %v2727_v33 = vadd.f32 %v2723_v55, %v8984_v3  ;;  %v2798_v56 = vadd.f32 %v2794_v32, %v8986_v4  ;;  %v7294_v63 = vpop.f32.mrb[43].mxu0  ;;  %v7305_v47 = vpop.f32.mrb[43].mxu1 }
 0x772   :  { %v6418_v53 = vmul.f32 -1.442695, %v2798_v56 }
 0x774   :  { %8337 = vpow2.f32 %v6418_v53 }
 0x775   :  { %8339 = vtanh.f32 %v2727_v33 }
 0x776   :  { %v8334_v49 = vpop.eup %8333 }
 0x777   :  { %v8336_v48 = vpop.eup %8335  ;;  %v2802_v13 = vadd.f32 1.0, %v8334_v49 }
 0x778   :  { %v2808_v14 = vadd.f32 1.0, %v8336_v48 }
 0x779   :  { %8341 = vrcp.f32 %v2802_v13 }
 0x77a   :  { %8343 = vrcp.f32 %v2808_v14 }
 0x77e   :  { %v8338_v50 = vpop.eup %8337 }
 0x77f   :  { %v8340_v54 = vpop.eup %8339  ;;  %v2815_v7 = vadd.f32 1.0, %v8338_v50 }
 0x781   :  { %8345 = vrcp.f32 %v2815_v7 }
 0x783   :  { %v8342_v57 = vpop.eup %8341 }
 0x784   :  { %v8344_v58 = vpop.eup %8343  ;;  %v2819_v0 = vmul.f32 %v8342_v57, %v8340_v54 }
 0x785   :  { %v2818_v3 = vmul.f32 %v8344_v58, %v2508_v30  ;;  %v6450_v30 = vld [vmem:[%s9749_s4 + $0x50] sm:$0xff] }
 0x786   :  { %v8012_v31 = vpack.c.bf16 %v6451_v42, %v6450_v30  ;;  %v3640_v42 = vld [vmem:[#allocation9 + $0x10] sm:$0xff] }
 0x787   :  { %v9192_v8 = vadd.f32 %v2819_v0, %v2818_v3 }
 0x789   :  { %8347 = vtanh.f32 %v9192_v8 }
 0x78b   :  { %v8346_v4 = vpop.eup %8345 }
 0x793   :  { %v8348_v11 = vpop.eup %8347 }
 0x794   :  { %v2822_v61 = vmul.f32 %v8348_v11, %v8346_v4 }
 0x796   :  { %2823 = vst.msk [vmem:[#allocation3 + $0x30] sm:$0xff] %vm639_vm2, %v2822_v61  ;;  %7315 = vmatmul.mubr.msk.f32.vlgmr.msra.gmra.mrb[44].mxu0 %vm639_vm2, %v2822_v61  ;;  %7326 = vmatmul.mubr.msk.f32.vlgmr.msra.gmra.mrb[44].mxu1 %vm639_vm2, %v2822_v61 }
 0x797   :  { %7982 = vmatpush3.bf16.msra.mxu0 %v8866_v39  ;;  %7988 = vmatpush3.bf16.msra.mxu1 %v8868_v40  ;;  %v3147_v39 = vld [vmem:[%s9749_s4 + $0x18] sm:$0xff]  ;;  %v6437_v40 = vld [vmem:[%s9749_s4 + $0x30] sm:$0xff] }
 0x798   :  { %7983 = vmatprep.subr.bf16.mxu0 %v9759_v18  ;;  %7989 = vmatprep.subr.bf16.mxu1 %v9759_v18  ;;  %v7996_v22 = vpack.c.bf16 %v3147_v39, %v3146_v15  ;;  %v8004_v34 = vpack.c.bf16 %v6438_v16, %v6437_v40 }
 0x799   :  { %7336 = vmatprep.mubr.msk.f32.mxu0 %vm8619_vm1, %v9757_v38  ;;  %7347 = vmatprep.mubr.msk.f32.mxu1 %vm8619_vm1, %v9757_v38 }
 0x79b   :  { %7985 = vmatpush3.bf16.msra.mxu0 %v8886_v45  ;;  %7991 = vmatpush3.bf16.msra.mxu1 %v8888_v46  ;;  %v9240_v45 = vld [vmem:[#allocation3 + $0x8] sm:$0xff]  ;;  %v9244_v46 = vld [vmem:[#allocation3 + $0x10] sm:$0xff] }
 0x79c   :  { %7993 = vmatprep.subr.bf16.mxu0 %v7992_v52  ;;  %8001 = vmatprep.subr.bf16.mxu1 %v8000_v12 }
 0x79d   :  { %v9268_v19 = vld [vmem:[#allocation3 + $0x30] sm:$0xff] }
 0x79e   :  { %7337 = vmatmul.mubr.msk.f32.vlgmr.msra.gmra.mrb[46].mxu0 %vm639_vm2, %v2822_v61  ;;  %7348 = vmatmul.mubr.msk.f32.vlgmr.msra.gmra.mrb[46].mxu1 %vm639_vm2, %v2822_v61 }
 0x79f   :  { %7995 = vmatpush3.bf16.msra.mxu0 %v7992_v52  ;;  %7358 = vmatprep.mubr.msk.f32.mxu0 %vm639_vm2, %v9234_v23 }
 0x7a0   :  { %8003 = vmatpush3.bf16.msra.mxu1 %v8000_v12  ;;  %7378 = vmatprep.mubr.msk.f32.mxu1 %vm639_vm2, %v9234_v23 }
 0x7a1   :  { %7997 = vmatprep.subr.bf16.mxu0 %v7996_v22  ;;  %8005 = vmatprep.subr.bf16.mxu1 %v8004_v34 }
 0x7a3   :  { %7999 = vmatpush3.bf16.msra.mxu0 %v7996_v22 }
 0x7a4   :  { %8007 = vmatpush3.bf16.msra.mxu1 %v8004_v34  ;;  %8009 = vmatprep.subr.bf16.mxu0 %v8008_v25 }
 0x7a5   :  { %8017 = vmatprep.subr.bf16.mxu1 %v8016_v17 }
 0x7a6   :  { %7359 = vmatmul.mubr.msk.f32.vlgmr.msra.gmra.mrb[48].mxu0 %vm639_vm2, %v9240_v45 }
 0x7a7   :  { %7379 = vmatmul.mubr.msk.f32.vlgmr.msra.gmra.mrb[48].mxu1 %vm639_vm2, %v9240_v45  ;;  %7361 = vmatprep.mubr.msk.f32.mxu0 %vm639_vm2, %v9244_v46 }
 0x7a8   :  { %7381 = vmatprep.mubr.msk.f32.mxu1 %vm639_vm2, %v9244_v46  ;;  %8011 = vmatpush3.bf16.msra.mxu0 %v8008_v25  ;;  %v3644_v25 = vld [vmem:[#allocation9 + $0x28] sm:$0xff] }
 0x7a9   :  { %8019 = vmatpush3.bf16.msra.mxu1 %v8016_v17  ;;  %8013 = vmatprep.subr.bf16.mxu0 %v8012_v31  ;;  %v9340_v30 = vpack.c.bf16 %v3644_v25, %v3643_v24  ;;  %v3641_v17 = vld [vmem:[#allocation9 + $0x18] sm:$0xff]  ;;  %v9448_v25 = vld [vmem:[#allocation10] ss:$0 sm:$0xff] }
 0x7aa   :  { %7362 = vmatmul.mubr.msk.f32.gmra.mrb[50].mxu0 %vm639_vm2, %v9252_v1  ;;  %8021 = vmatprep.subr.bf16.mxu1 %v8020_v36 }
 0x7ab   :  { %7382 = vmatmul.mubr.msk.f32.gmra.mrb[50].mxu1 %vm639_vm2, %v9252_v1  ;;  %7364 = vmatprep.mubr.msk.f32.mxu0 %vm639_vm2, %v9256_v2 }
 0x7ac   :  { %7384 = vmatprep.mubr.msk.f32.mxu1 %vm639_vm2, %v9256_v2  ;;  %8015 = vmatpush3.bf16.msra.mxu0 %v8012_v31  ;;  %v3645_v31 = vld [vmem:[#allocation9 + $0x30] sm:$0xff] }
 0x7ad   :  { %8023 = vmatpush3.bf16.msra.mxu1 %v8020_v36  ;;  %8024 = vmatprep.subr.bf16.mxu0 %v9759_v18  ;;  %v9354_v27 = vpack.c.bf16 %v3646_v26, %v3645_v31 }
 0x7ae   :  { %7365 = vmatmul.mubr.msk.f32.gmra.mrb[52].mxu0 %vm639_vm2, %v9264_v35  ;;  %8030 = vmatprep.subr.bf16.mxu1 %v9759_v18 }
 0x7af   :  { %7385 = vmatmul.mubr.msk.f32.gmra.mrb[52].mxu1 %vm639_vm2, %v9264_v35  ;;  %7367 = vmatprep.mubr.msk.f32.mxu0 %vm639_vm2, %v9268_v19 }
 0x7b0   :  { %7387 = vmatprep.mubr.msk.f32.mxu1 %vm639_vm2, %v9268_v19 }
 0x869   :  { %v2893_v37 = vpop.f32.mrb[44].mxu0  ;;  %v2964_v43 = vpop.f32.mrb[44].mxu1 }
 0x86a   :  { %v2897_v5 = vadd.f32 %v2893_v37, %v8949_v9  ;;  %v2968_v6 = vadd.f32 %v2964_v43, %v8952_v10  ;;  %v7316_v44 = vpop.f32.mrb[45].mxu0  ;;  %v7327_v55 = vpop.f32.mrb[45].mxu1  ;;  %v3650_v37 = vld [vmem:[#allocation9 + $0x50] sm:$0xff] }
 0x86b   :  { %v3655_v43 = vld [vmem:[#allocation9 + $0x70] sm:$0xff] }
 0x86c   :  { %v6423_v32 = vmul.f32 -1.442695, %v2897_v5  ;;  %v6424_v33 = vmul.f32 -1.442695, %v2968_v6  ;;  %v3656_v5 = vld [vmem:[#allocation9 + $0x78] sm:$0xff] }
 0x86d   :  { %v9394_v44 = vpack.c.bf16 %v3656_v5, %v3655_v43 }
 0x86e   :  { %8349 = vpow2.f32 %v6423_v32 }
 0x86f   :  { %8351 = vpow2.f32 %v6424_v33 }
 0x871   :  { %v3035_v56 = vpop.f32.mrb[46].mxu0  ;;  %v3106_v63 = vpop.f32.mrb[46].mxu1 }
 0x872   :  { %v3039_v47 = vadd.f32 %v3035_v56, %v8980_v59  ;;  %v3110_v53 = vadd.f32 %v3106_v63, %v8982_v60  ;;  %v7338_v49 = vpop.f32.mrb[47].mxu0  ;;  %v7349_v48 = vpop.f32.mrb[47].mxu1  ;;  %v6452_v63 = vld [vmem:[#allocation10 + $0x2] ss:$0 sm:$0xff] }
 0x874   :  { %v6425_v13 = vmul.f32 -1.442695, %v3110_v53 }
 0x876   :  { %8353 = vpow2.f32 %v6425_v13 }
 0x877   :  { %8355 = vtanh.f32 %v3039_v47  ;;  %v6465_v47 = vld [vmem:[#allocation10 + $0x3] ss:$0 sm:$0xff] }
 0x878   :  { %v8350_v14 = vpop.eup %8349 }
 0x879   :  { %v8352_v50 = vpop.eup %8351  ;;  %v3114_v9 = vadd.f32 1.0, %v8350_v14  ;;  %v9306_v10 = vpop.f32.mrb[48].mxu0 }
 0x87a   :  { %v3120_v54 = vadd.f32 1.0, %v8352_v50  ;;  %v9308_v57 = vpop.f32.mrb[48].mxu1  ;;  %v9310_v58 = vpop.f32.mrb[49].mxu0 }
 0x87b   :  { %8357 = vrcp.f32 %v3114_v9  ;;  %v9312_v0 = vpop.f32.mrb[49].mxu1 }
 0x87c   :  { %8359 = vrcp.f32 %v3120_v54 }
 0x87d   :  { %v9314_v59 = vpop.f32.mrb[50].mxu0 }
 0x87e   :  { %v9316_v60 = vpop.f32.mrb[50].mxu1  ;;  %v9318_v7 = vpop.f32.mrb[51].mxu0 }
 0x87f   :  { %v9320_v3 = vpop.f32.mrb[51].mxu1 }
 0x880   :  { %v8354_v62 = vpop.eup %8353 }
 0x881   :  { %v9322_v4 = vpop.f32.mrb[52].mxu0  ;;  %v8356_v51 = vpop.eup %8355  ;;  %v3127_v15 = vadd.f32 1.0, %v8354_v62 }
 0x882   :  { %v9324_v11 = vpop.f32.mrb[52].mxu1  ;;  %v9326_v61 = vpop.f32.mrb[53].mxu0 }
 0x883   :  { %v9328_v28 = vpop.f32.mrb[53].mxu1  ;;  %8361 = vrcp.f32 %v3127_v15 }
 0x885   :  { %v8358_v29 = vpop.eup %8357 }
 0x886   :  { %v8360_v52 = vpop.eup %8359  ;;  %v3131_v12 = vmul.f32 %v8358_v29, %v8356_v51 }
 0x887   :  { %v3130_v39 = vmul.f32 %v8360_v52, %v9192_v8  ;;  %v9338_v8 = vpack.c.bf16 %v3639_v21, %v3638_v20 }
 0x889   :  { %v3132_v40 = vadd.f32 %v3131_v12, %v3130_v39 }
 0x88b   :  { %8363 = vtanh.f32 %v3132_v40 }
 0x88d   :  { %v8362_v16 = vpop.eup %8361 }
 0x895   :  { %v8364_v22 = vpop.eup %8363 }
 0x896   :  { %v3134_v34 = vmul.f32 %v8364_v22, %v8362_v16 }
 0x898   :  { %3135 = vst.msk [vmem:[#allocation3 + $0x38] sm:$0xff] %vm639_vm2, %v3134_v34 }
 0x89f   :  { %v3143_v41 = vld [vmem:[#allocation3 + $0x38] sm:$0xff] }
 0x8a0   :  { %7368 = vmatmul.mubr.msk.f32.gmra.mrb[54].mxu0 %vm639_vm2, %v3143_v41  ;;  %7388 = vmatmul.mubr.msk.f32.gmra.mrb[54].mxu1 %vm639_vm2, %v3143_v41 }
 0x8a1   :  { %7398 = vmatprep.mubr.msk.f32.mxu0 %vm639_vm2, %v9234_v23  ;;  %7418 = vmatprep.mubr.msk.f32.mxu1 %vm639_vm2, %v9234_v23  ;;  %v9352_v23 = vpack.c.bf16 %v3641_v17, %v3640_v42 }
 0x8a4   :  { %7399 = vmatmul.mubr.msk.f32.vlgmr.msra.gmra.mrb[56].mxu0 %vm639_vm2, %v9240_v45  ;;  %7419 = vmatmul.mubr.msk.f32.vlgmr.msra.gmra.mrb[56].mxu1 %vm639_vm2, %v9240_v45  ;;  %v3648_v45 = vld [vmem:[#allocation9 + $0x40] sm:$0xff] }
 0x8a5   :  { %8026 = vmatpush3.bf16.msra.mxu0 %v9338_v8  ;;  %8032 = vmatpush3.bf16.msra.mxu1 %v9340_v30 }
 0x8a6   :  { %7401 = vmatprep.mubr.msk.f32.mxu0 %vm639_vm2, %v9244_v46  ;;  %7421 = vmatprep.mubr.msk.f32.mxu1 %vm639_vm2, %v9244_v46  ;;  %v3649_v46 = vld [vmem:[#allocation9 + $0x48] sm:$0xff] }
 0x8a7   :  { %8027 = vmatprep.subr.bf16.mxu0 %v9759_v18  ;;  %8033 = vmatprep.subr.bf16.mxu1 %v9759_v18 }
 0x8a8   :  { %7402 = vmatmul.mubr.msk.f32.gmra.mrb[58].mxu0 %vm639_vm2, %v9252_v1  ;;  %7422 = vmatmul.mubr.msk.f32.gmra.mrb[58].mxu1 %vm639_vm2, %v9252_v1  ;;  %v3653_v1 = vld [vmem:[#allocation9 + $0x60] sm:$0xff] }
 0x8a9   :  { %7404 = vmatprep.mubr.msk.f32.mxu0 %vm639_vm2, %v9256_v2  ;;  %7424 = vmatprep.mubr.msk.f32.mxu1 %vm639_vm2, %v9256_v2  ;;  %v3654_v2 = vld [vmem:[#allocation9 + $0x68] sm:$0xff] }
 0x8aa   :  { %8029 = vmatpush3.bf16.msra.mxu0 %v9352_v23  ;;  %8035 = vmatpush3.bf16.msra.mxu1 %v9354_v27  ;;  %v9386_v36 = vpack.c.bf16 %v3654_v2, %v3653_v1 }
 0x8ab   :  { %8036 = vmatprep.subr.bf16.mxu0 %v9759_v18  ;;  %8042 = vmatprep.subr.bf16.mxu1 %v9759_v18 }
 0x8ac   :  { %7405 = vmatmul.mubr.msk.f32.gmra.mrb[60].mxu0 %vm639_vm2, %v9264_v35  ;;  %7425 = vmatmul.mubr.msk.f32.gmra.mrb[60].mxu1 %vm639_vm2, %v9264_v35  ;;  %v9384_v35 = vpack.c.bf16 %v3649_v46, %v3648_v45 }
 0x8ad   :  { %7407 = vmatprep.mubr.msk.f32.mxu0 %vm639_vm2, %v9268_v19  ;;  %7427 = vmatprep.mubr.msk.f32.mxu1 %vm639_vm2, %v9268_v19  ;;  %v3651_v19 = vld [vmem:[#allocation9 + $0x58] sm:$0xff] }
 0x8ae   :  { %v9392_v6 = vpack.c.bf16 %v3651_v19, %v3650_v37  ;;  %v3246_v37 = vadd.f32 %v9448_v25, %v9310_v58 }
 0x8b0   :  { %7408 = vmatmul.mubr.msk.f32.gmra.mrb[62].mxu0 %vm639_vm2, %v3143_v41  ;;  %7428 = vmatmul.mubr.msk.f32.gmra.mrb[62].mxu1 %vm639_vm2, %v3143_v41  ;;  %v9450_v41 = vld [vmem:[#allocation10 + $0x1] ss:$0 sm:$0xff] }
 0x8b1   :  { %7438 = vmatprep.mubr.msk.f32.mxu0 %vm8619_vm1, %v9757_v38  ;;  %7449 = vmatprep.mubr.msk.f32.mxu1 %vm8619_vm1, %v9757_v38  ;;  %v3364_v19 = vadd.f32 %v9450_v41, %v9312_v0 }
 0x8b4   :  { %7439 = vmatmul.mubr.f32.vlgmr.msra.gmra.mrb[64].mxu0 %v9757_v38  ;;  %7450 = vmatmul.mubr.f32.vlgmr.msra.gmra.mrb[64].mxu1 %v9757_v38 }
 0x8b5   :  { %8038 = vmatpush3.bf16.msra.mxu0 %v9384_v35  ;;  %8044 = vmatpush3.bf16.msra.mxu1 %v9386_v36 }
 0x8b6   :  { %8039 = vmatprep.subr.bf16.mxu0 %v9759_v18  ;;  %8045 = vmatprep.subr.bf16.mxu1 %v9759_v18 }
 0x8b7   :  { %7460 = vmatprep.mubr.msk.f32.mxu0 %vm8619_vm1, %v9757_v38  ;;  %7471 = vmatprep.mubr.msk.f32.mxu1 %vm8619_vm1, %v9757_v38 }
 0x8b9   :  { %8041 = vmatpush3.bf16.msra.mxu0 %v9392_v6  ;;  %8047 = vmatpush3.bf16.msra.mxu1 %v9394_v44 }
 0x8ba   :  { %8048 = vmatprep.subr.bf16.mxu0 %v9759_v18  ;;  %8054 = vmatprep.subr.bf16.mxu1 %v9759_v18 }
 0x8bc   :  { %7461 = vmatmul.mubr.f32.vlgmr.msra.gmra.mrb[66].mxu0 %v9757_v38  ;;  %7472 = vmatmul.mubr.f32.vlgmr.msra.gmra.mrb[66].mxu1 %v9757_v38 }
 0x8bd   :  { %8050 = vmatpush3.bf16.msra.mxu0 %v9338_v8  ;;  %8056 = vmatpush3.bf16.msra.mxu1 %v9340_v30 }
 0x8be   :  { %8051 = vmatprep.subr.bf16.mxu0 %v9759_v18  ;;  %8057 = vmatprep.subr.bf16.mxu1 %v9759_v18 }
 0x8bf   :  { %7482 = vmatprep.mubr.msk.f32.mxu0 %vm8619_vm1, %v9757_v38  ;;  %7493 = vmatprep.mubr.msk.f32.mxu1 %vm8619_vm1, %v9757_v38 }
 0x8c1   :  { %8053 = vmatpush3.bf16.msra.mxu0 %v9352_v23  ;;  %8059 = vmatpush3.bf16.msra.mxu1 %v9354_v27 }
 0x8c2   :  { %8060 = vmatprep.subr.bf16.mxu0 %v9759_v18  ;;  %8066 = vmatprep.subr.bf16.mxu1 %v9759_v18 }
 0x973   :  { %v9420_v55 = vpop.f32.mrb[54].mxu0  ;;  %v9422_v32 = vpop.f32.mrb[54].mxu1 }
 0x974   :  { %v9424_v33 = vpop.f32.mrb[55].mxu0  ;;  %v9426_v56 = vpop.f32.mrb[55].mxu1 }
 0x977   :  { %v7400_v53 = vpop.f32.mrb[56].mxu0  ;;  %v7420_v49 = vpop.f32.mrb[56].mxu1 }
 0x978   :  { %v9428_v48 = vadd.f32 %v7400_v53, %v6452_v63  ;;  %v9430_v13 = vadd.f32 %v7420_v49, %v6465_v47  ;;  %v3481_v14 = vpop.f32.mrb[57].mxu0  ;;  %v3599_v50 = vpop.f32.mrb[57].mxu1 }
 0x97b   :  { %v7403_v9 = vpop.f32.mrb[58].mxu0  ;;  %v7423_v54 = vpop.f32.mrb[58].mxu1 }
 0x97c   :  { %v9432_v62 = vadd.f32 %v7403_v9, %v6452_v63  ;;  %v9434_v51 = vadd.f32 %v7423_v54, %v6465_v47  ;;  %v3491_v29 = vpop.f32.mrb[59].mxu0  ;;  %v3609_v52 = vpop.f32.mrb[59].mxu1 }
 0x97d   :  { %v9436_v12 = vadd.f32 %v6452_v63, %v3491_v29  ;;  %v9438_v15 = vadd.f32 %v6465_v47, %v3609_v52 }
 0x97f   :  { %v7406_v39 = vpop.f32.mrb[60].mxu0  ;;  %v7426_v40 = vpop.f32.mrb[60].mxu1 }
 0x980   :  { %v9440_v16 = vadd.f32 %v7406_v39, %v6452_v63  ;;  %v9442_v22 = vadd.f32 %v7426_v40, %v6465_v47  ;;  %v3501_v34 = vpop.f32.mrb[61].mxu0  ;;  %v3619_v20 = vpop.f32.mrb[61].mxu1  ;;  %v3482_v39 = vadd.f32 %v6452_v63, %v3481_v14  ;;  %v3600_v40 = vadd.f32 %v6465_v47, %v3599_v50 }
 0x981   :  { %v9444_v21 = vadd.f32 %v6452_v63, %v3501_v34  ;;  %v9446_v24 = vadd.f32 %v6465_v47, %v3619_v20 }
 0x983   :  { %v7409_v42 = vpop.f32.mrb[62].mxu0  ;;  %v7429_v17 = vpop.f32.mrb[62].mxu1 }
 0x984   :  { %v9452_v31 = vadd.f32 %v7409_v42, %v6452_v63  ;;  %v9454_v26 = vadd.f32 %v7429_v17, %v6465_v47  ;;  %v3511_v45 = vpop.f32.mrb[63].mxu0  ;;  %v3629_v46 = vpop.f32.mrb[63].mxu1 }
 0x985   :  { %v9456_v1 = vadd.f32 %v6452_v63, %v3511_v45  ;;  %v9458_v2 = vadd.f32 %v6465_v47, %v3629_v46 }
 0x987   :  { %v3723_v43 = vpop.f32.mrb[64].mxu0  ;;  %v3794_v5 = vpop.f32.mrb[64].mxu1 }
 0x988   :  { %v3727_v53 = vadd.f32 %v3723_v43, %v3246_v37  ;;  %v3798_v49 = vadd.f32 %v3794_v5, %v3364_v19  ;;  %v7440_v9 = vpop.f32.mrb[65].mxu0  ;;  %v7451_v54 = vpop.f32.mrb[65].mxu1 }
 0x98a   :  { %v6474_v29 = vmul.f32 -1.442695, %v3727_v53  ;;  %v6475_v52 = vmul.f32 -1.442695, %v3798_v49 }
 0x98c   :  { %8365 = vpow2.f32 %v6474_v29  ;;  %v3251_v29 = vadd.f32 %v9306_v10, %v9448_v25 }
 0x98d   :  { %8367 = vpow2.f32 %v6475_v52  ;;  %v3369_v52 = vadd.f32 %v9308_v57, %v9450_v41 }
 0x98f   :  { %v3865_v34 = vpop.f32.mrb[66].mxu0  ;;  %v3936_v20 = vpop.f32.mrb[66].mxu1 }
 0x990   :  { %v3869_v42 = vadd.f32 %v3865_v34, %v3482_v39  ;;  %v3940_v17 = vadd.f32 %v3936_v20, %v3600_v40  ;;  %v7462_v58 = vpop.f32.mrb[67].mxu0  ;;  %v7473_v45 = vpop.f32.mrb[67].mxu1 }
 0x992   :  { %v6476_v46 = vmul.f32 -1.442695, %v3940_v17 }
 0x994   :  { %8369 = vpow2.f32 %v6476_v46 }
 0x995   :  { %8371 = vtanh.f32 %v3869_v42 }
 0x996   :  { %v8366_v0 = vpop.eup %8365 }
 0x997   :  { %v8368_v38 = vpop.eup %8367  ;;  %v3944_v18 = vadd.f32 1.0, %v8366_v0 }
 0x998   :  { %v3950_v37 = vadd.f32 1.0, %v8368_v38  ;;  %v9762_v38 = vmov 0.0  }
 0x999   :  { %8373 = vrcp.f32 %v3944_v18  ;;  %v9761_v18 = vmov 0.0|0.0  }
 0x99a   :  { %8375 = vrcp.f32 %v3950_v37 }
 0x99e   :  { %v8370_v19 = vpop.eup %8369 }
 0x99f   :  { %v8372_v43 = vpop.eup %8371  ;;  %v3957_v14 = vadd.f32 1.0, %v8370_v19 }
 0x9a1   :  { %8377 = vrcp.f32 %v3957_v14 }
 0x9a3   :  { %v8374_v5 = vpop.eup %8373 }
 0x9a4   :  { %v8376_v63 = vpop.eup %8375  ;;  %v3961_v47 = vmul.f32 %v8374_v5, %v8372_v43 }
 0x9a5   :  { %v3960_v50 = vmul.f32 0.0, %v8376_v63 }
 0x9a7   :  { %v9464_v53 = vadd.f32 %v3961_v47, %v3960_v50 }
 0x9a9   :  { %8379 = vtanh.f32 %v9464_v53 }
 0x9ab   :  { %v8378_v49 = vpop.eup %8377 }
 0x9b3   :  { %v8380_v9 = vpop.eup %8379 }
 0x9b4   :  { %v3964_v54 = vmul.f32 %v8380_v9, %v8378_v49 }
 0x9b6   :  { %7483 = vmatmul.mubr.msk.f32.vlgmr.msra.gmra.mrb[68].mxu0 %vm639_vm2, %v3964_v54  ;;  %7494 = vmatmul.mubr.msk.f32.vlgmr.msra.gmra.mrb[68].mxu1 %vm639_vm2, %v3964_v54 }
 0x9b7   :  { %8062 = vmatpush3.bf16.msra.mxu0 %v9384_v35  ;;  %8068 = vmatpush3.bf16.msra.mxu1 %v9386_v36 }
 0x9b8   :  { %8063 = vmatprep.subr.bf16.mxu0 %v9761_v18  ;;  %8069 = vmatprep.subr.bf16.mxu1 %v9761_v18 }
 0x9b9   :  { %7504 = vmatprep.mubr.msk.f32.mxu0 %vm8619_vm1, %v9762_v38  ;;  %7515 = vmatprep.mubr.msk.f32.mxu1 %vm8619_vm1, %v9762_v38 }
 0x9bb   :  { %8065 = vmatpush3.bf16.msra.mxu0 %v9392_v6  ;;  %8071 = vmatpush3.bf16.msra.mxu1 %v9394_v44 }
 0x9bc   :  { %8072 = vmatprep.subr.bf16.mxu0 %v9761_v18  ;;  %8078 = vmatprep.subr.bf16.mxu1 %v9761_v18 }
 0x9be   :  { %7505 = vmatmul.mubr.msk.f32.vlgmr.msra.gmra.mrb[70].mxu0 %vm639_vm2, %v3964_v54  ;;  %7516 = vmatmul.mubr.msk.f32.vlgmr.msra.gmra.mrb[70].mxu1 %vm639_vm2, %v3964_v54 }
 0x9bf   :  { %8074 = vmatpush3.bf16.msra.mxu0 %v9338_v8  ;;  %8080 = vmatpush3.bf16.msra.mxu1 %v9340_v30 }
 0x9c0   :  { %8075 = vmatprep.subr.bf16.mxu0 %v9761_v18  ;;  %8081 = vmatprep.subr.bf16.mxu1 %v9761_v18 }
 0x9c1   :  { %7526 = vmatprep.mubr.msk.f32.mxu0 %vm8619_vm1, %v9762_v38  ;;  %7537 = vmatprep.mubr.msk.f32.mxu1 %vm8619_vm1, %v9762_v38 }
 0x9c3   :  { %8077 = vmatpush3.bf16.msra.mxu0 %v9352_v23  ;;  %8083 = vmatpush3.bf16.msra.mxu1 %v9354_v27 }
 0x9c4   :  { %8084 = vmatprep.subr.bf16.mxu0 %v9761_v18  ;;  %8090 = vmatprep.subr.bf16.mxu1 %v9761_v18 }
 0xa89   :  { %v4034_v39 = vpop.f32.mrb[68].mxu0  ;;  %v4105_v40 = vpop.f32.mrb[68].mxu1 }
 0xa8a   :  { %v4038_v34 = vadd.f32 %v4034_v39, %v3251_v29  ;;  %v4109_v20 = vadd.f32 %v4105_v40, %v3369_v52  ;;  %v7484_v42 = vpop.f32.mrb[69].mxu0  ;;  %v7495_v17 = vpop.f32.mrb[69].mxu1 }
 0xa8c   :  { %v6481_v58 = vmul.f32 -1.442695, %v4038_v34  ;;  %v6482_v45 = vmul.f32 -1.442695, %v4109_v20  ;;  %v3374_v20 = vadd.f32 %v9450_v41, %v9320_v3 }
 0xa8e   :  { %8381 = vpow2.f32 %v6481_v58 }
 0xa8f   :  { %8383 = vpow2.f32 %v6482_v45 }
 0xa91   :  { %v4176_v46 = vpop.f32.mrb[70].mxu0  ;;  %v4247_v0 = vpop.f32.mrb[70].mxu1 }
 0xa92   :  { %v4180_v37 = vadd.f32 %v4176_v46, %v9428_v48  ;;  %v4251_v19 = vadd.f32 %v4247_v0, %v9430_v13  ;;  %v7506_v10 = vpop.f32.mrb[71].mxu0  ;;  %v7517_v43 = vpop.f32.mrb[71].mxu1 }
 0xa94   :  { %v6483_v5 = vmul.f32 -1.442695, %v4251_v19 }
 0xa96   :  { %8385 = vpow2.f32 %v6483_v5 }
 0xa97   :  { %8387 = vtanh.f32 %v4180_v37 }
 0xa98   :  { %v8382_v57 = vpop.eup %8381 }
 0xa99   :  { %v8384_v63 = vpop.eup %8383  ;;  %v4255_v47 = vadd.f32 1.0, %v8382_v57 }
 0xa9a   :  { %v4261_v14 = vadd.f32 1.0, %v8384_v63 }
 0xa9b   :  { %8389 = vrcp.f32 %v4255_v47 }
 0xa9c   :  { %8391 = vrcp.f32 %v4261_v14 }
 0xaa0   :  { %v8386_v50 = vpop.eup %8385 }
 0xaa1   :  { %v8388_v49 = vpop.eup %8387  ;;  %v4268_v52 = vadd.f32 1.0, %v8386_v50 }
 0xaa3   :  { %8393 = vrcp.f32 %v4268_v52 }
 0xaa5   :  { %v8390_v9 = vpop.eup %8389 }
 0xaa6   :  { %v8392_v54 = vpop.eup %8391  ;;  %v4272_v29 = vmul.f32 %v8390_v9, %v8388_v49 }
 0xaa7   :  { %v4271_v48 = vmul.f32 %v8392_v54, %v9464_v53  ;;  %v3256_v53 = vadd.f32 %v9448_v25, %v9318_v7 }
 0xaa9   :  { %v9502_v13 = vadd.f32 %v4272_v29, %v4271_v48 }
 0xaab   :  { %8395 = vtanh.f32 %v9502_v13 }
 0xaad   :  { %v8394_v39 = vpop.eup %8393 }
 0xab5   :  { %v8396_v40 = vpop.eup %8395 }
 0xab6   :  { %v4275_v34 = vmul.f32 %v8396_v40, %v8394_v39 }
 0xab8   :  { %7527 = vmatmul.mubr.msk.f32.vlgmr.msra.gmra.mrb[72].mxu0 %vm639_vm2, %v4275_v34  ;;  %7538 = vmatmul.mubr.msk.f32.vlgmr.msra.gmra.mrb[72].mxu1 %vm639_vm2, %v4275_v34 }
 0xab9   :  { %8086 = vmatpush3.bf16.msra.mxu0 %v9384_v35  ;;  %8092 = vmatpush3.bf16.msra.mxu1 %v9386_v36 }
 0xaba   :  { %8087 = vmatprep.subr.bf16.mxu0 %v9761_v18  ;;  %8093 = vmatprep.subr.bf16.mxu1 %v9761_v18 }
 0xabb   :  { %7548 = vmatprep.mubr.msk.f32.mxu0 %vm8619_vm1, %v9762_v38  ;;  %7559 = vmatprep.mubr.msk.f32.mxu1 %vm8619_vm1, %v9762_v38 }
 0xabd   :  { %8089 = vmatpush3.bf16.msra.mxu0 %v9392_v6  ;;  %8095 = vmatpush3.bf16.msra.mxu1 %v9394_v44 }
 0xabe   :  { %8096 = vmatprep.subr.bf16.mxu0 %v9761_v18  ;;  %8102 = vmatprep.subr.bf16.mxu1 %v9761_v18 }
 0xac0   :  { %7549 = vmatmul.mubr.msk.f32.vlgmr.msra.gmra.mrb[74].mxu0 %vm639_vm2, %v4275_v34  ;;  %7560 = vmatmul.mubr.msk.f32.vlgmr.msra.gmra.mrb[74].mxu1 %vm639_vm2, %v4275_v34 }
 0xac1   :  { %8098 = vmatpush3.bf16.msra.mxu0 %v9338_v8  ;;  %8104 = vmatpush3.bf16.msra.mxu1 %v9340_v30 }
 0xac2   :  { %8099 = vmatprep.subr.bf16.mxu0 %v9761_v18  ;;  %8105 = vmatprep.subr.bf16.mxu1 %v9761_v18 }
 0xac3   :  { %7570 = vmatprep.mubr.msk.f32.mxu0 %vm8619_vm1, %v9762_v38  ;;  %7581 = vmatprep.mubr.msk.f32.mxu1 %vm8619_vm1, %v9762_v38 }
 0xac5   :  { %8101 = vmatpush3.bf16.msra.mxu0 %v9352_v23  ;;  %8107 = vmatpush3.bf16.msra.mxu1 %v9354_v27 }
 0xac6   :  { %8108 = vmatprep.subr.bf16.mxu0 %v9761_v18  ;;  %8114 = vmatprep.subr.bf16.mxu1 %v9761_v18 }
 0xb8b   :  { %v4345_v42 = vpop.f32.mrb[72].mxu0  ;;  %v4416_v17 = vpop.f32.mrb[72].mxu1 }
 0xb8c   :  { %v4349_v58 = vadd.f32 %v4345_v42, %v3256_v53  ;;  %v4420_v45 = vadd.f32 %v4416_v17, %v3374_v20  ;;  %v7528_v46 = vpop.f32.mrb[73].mxu0  ;;  %v7539_v0 = vpop.f32.mrb[73].mxu1  ;;  %v3379_v20 = vadd.f32 %v9316_v60, %v9450_v41 }
 0xb8e   :  { %v6488_v37 = vmul.f32 -1.442695, %v4349_v58  ;;  %v6489_v19 = vmul.f32 -1.442695, %v4420_v45 }
 0xb90   :  { %8397 = vpow2.f32 %v6488_v37 }
 0xb91   :  { %8399 = vpow2.f32 %v6489_v19 }
 0xb93   :  { %v4487_v10 = vpop.f32.mrb[74].mxu0  ;;  %v4558_v43 = vpop.f32.mrb[74].mxu1 }
 0xb94   :  { %v4491_v5 = vadd.f32 %v4487_v10, %v9436_v12  ;;  %v4562_v57 = vadd.f32 %v4558_v43, %v9438_v15  ;;  %v7550_v7 = vpop.f32.mrb[75].mxu0  ;;  %v7561_v63 = vpop.f32.mrb[75].mxu1 }
 0xb96   :  { %v6490_v47 = vmul.f32 -1.442695, %v4562_v57 }
 0xb98   :  { %8401 = vpow2.f32 %v6490_v47 }
 0xb99   :  { %8403 = vtanh.f32 %v4491_v5 }
 0xb9a   :  { %v8398_v3 = vpop.eup %8397 }
 0xb9b   :  { %v8400_v14 = vpop.eup %8399  ;;  %v4566_v50 = vadd.f32 1.0, %v8398_v3 }
 0xb9c   :  { %v4572_v49 = vadd.f32 1.0, %v8400_v14 }
 0xb9d   :  { %8405 = vrcp.f32 %v4566_v50 }
 0xb9e   :  { %8407 = vrcp.f32 %v4572_v49 }
 0xba2   :  { %v8402_v9 = vpop.eup %8401 }
 0xba3   :  { %v8404_v54 = vpop.eup %8403  ;;  %v4579_v39 = vadd.f32 1.0, %v8402_v9 }
 0xba5   :  { %8409 = vrcp.f32 %v4579_v39 }
 0xba7   :  { %v8406_v29 = vpop.eup %8405 }
 0xba8   :  { %v8408_v52 = vpop.eup %8407  ;;  %v4583_v48 = vmul.f32 %v8406_v29, %v8404_v54 }
 0xba9   :  { %v4582_v12 = vmul.f32 %v8408_v52, %v9502_v13  ;;  %v3261_v13 = vadd.f32 %v9314_v59, %v9448_v25 }
 0xbab   :  { %v9540_v15 = vadd.f32 %v4583_v48, %v4582_v12 }
 0xbad   :  { %8411 = vtanh.f32 %v9540_v15 }
 0xbaf   :  { %v8410_v40 = vpop.eup %8409 }
 0xbb7   :  { %v8412_v34 = vpop.eup %8411 }
 0xbb8   :  { %v4586_v53 = vmul.f32 %v8412_v34, %v8410_v40  ;;  %v3384_v40 = vadd.f32 %v9450_v41, %v9328_v28 }
 0xbba   :  { %7571 = vmatmul.mubr.msk.f32.vlgmr.msra.gmra.mrb[76].mxu0 %vm639_vm2, %v4586_v53  ;;  %7582 = vmatmul.mubr.msk.f32.vlgmr.msra.gmra.mrb[76].mxu1 %vm639_vm2, %v4586_v53 }
 0xbbb   :  { %8110 = vmatpush3.bf16.msra.mxu0 %v9384_v35  ;;  %8116 = vmatpush3.bf16.msra.mxu1 %v9386_v36 }
 0xbbc   :  { %8111 = vmatprep.subr.bf16.mxu0 %v9761_v18  ;;  %8117 = vmatprep.subr.bf16.mxu1 %v9761_v18 }
 0xbbd   :  { %7592 = vmatprep.mubr.msk.f32.mxu0 %vm8619_vm1, %v9762_v38  ;;  %7603 = vmatprep.mubr.msk.f32.mxu1 %vm8619_vm1, %v9762_v38 }
 0xbbf   :  { %8113 = vmatpush3.bf16.msra.mxu0 %v9392_v6  ;;  %8119 = vmatpush3.bf16.msra.mxu1 %v9394_v44 }
 0xbc0   :  { %8120 = vmatprep.subr.bf16.mxu0 %v9761_v18  ;;  %8126 = vmatprep.subr.bf16.mxu1 %v9761_v18 }
 0xbc2   :  { %7593 = vmatmul.mubr.msk.f32.vlgmr.msra.gmra.mrb[78].mxu0 %vm639_vm2, %v4586_v53  ;;  %7604 = vmatmul.mubr.msk.f32.vlgmr.msra.gmra.mrb[78].mxu1 %vm639_vm2, %v4586_v53 }
 0xbc3   :  { %8122 = vmatpush3.bf16.msra.mxu0 %v9338_v8  ;;  %8128 = vmatpush3.bf16.msra.mxu1 %v9340_v30 }
 0xbc4   :  { %8123 = vmatprep.subr.bf16.mxu0 %v9761_v18  ;;  %8129 = vmatprep.subr.bf16.mxu1 %v9761_v18 }
 0xbc5   :  { %7614 = vmatprep.mubr.msk.f32.mxu0 %vm8619_vm1, %v9762_v38  ;;  %7625 = vmatprep.mubr.msk.f32.mxu1 %vm8619_vm1, %v9762_v38 }
 0xbc7   :  { %8125 = vmatpush3.bf16.msra.mxu0 %v9352_v23  ;;  %8131 = vmatpush3.bf16.msra.mxu1 %v9354_v27 }
 0xbc8   :  { %8132 = vmatprep.subr.bf16.mxu0 %v9761_v18  ;;  %8138 = vmatprep.subr.bf16.mxu1 %v9761_v18 }
 0xc8d   :  { %v4656_v42 = vpop.f32.mrb[76].mxu0  ;;  %v4727_v17 = vpop.f32.mrb[76].mxu1 }
 0xc8e   :  { %v4660_v58 = vadd.f32 %v4656_v42, %v3261_v13  ;;  %v4731_v45 = vadd.f32 %v4727_v17, %v3379_v20  ;;  %v7572_v46 = vpop.f32.mrb[77].mxu0  ;;  %v7583_v0 = vpop.f32.mrb[77].mxu1 }
 0xc90   :  { %v6495_v37 = vmul.f32 -1.442695, %v4660_v58  ;;  %v6496_v19 = vmul.f32 -1.442695, %v4731_v45 }
 0xc92   :  { %8413 = vpow2.f32 %v6495_v37 }
 0xc93   :  { %8415 = vpow2.f32 %v6496_v19 }
 0xc95   :  { %v4798_v10 = vpop.f32.mrb[78].mxu0  ;;  %v4869_v43 = vpop.f32.mrb[78].mxu1 }
 0xc96   :  { %v4802_v5 = vadd.f32 %v4798_v10, %v9432_v62  ;;  %v4873_v57 = vadd.f32 %v4869_v43, %v9434_v51  ;;  %v7594_v59 = vpop.f32.mrb[79].mxu0  ;;  %v7605_v7 = vpop.f32.mrb[79].mxu1 }
 0xc98   :  { %v6497_v63 = vmul.f32 -1.442695, %v4873_v57 }
 0xc9a   :  { %8417 = vpow2.f32 %v6497_v63 }
 0xc9b   :  { %8419 = vtanh.f32 %v4802_v5 }
 0xc9c   :  { %v8414_v60 = vpop.eup %8413 }
 0xc9d   :  { %v8416_v47 = vpop.eup %8415  ;;  %v4877_v3 = vadd.f32 1.0, %v8414_v60 }
 0xc9e   :  { %v4883_v14 = vadd.f32 1.0, %v8416_v47 }
 0xc9f   :  { %8421 = vrcp.f32 %v4877_v3 }
 0xca0   :  { %8423 = vrcp.f32 %v4883_v14 }
 0xca4   :  { %v8418_v50 = vpop.eup %8417 }
 0xca5   :  { %v8420_v49 = vpop.eup %8419  ;;  %v4890_v52 = vadd.f32 1.0, %v8418_v50 }
 0xca7   :  { %8425 = vrcp.f32 %v4890_v52 }
 0xca9   :  { %v8422_v9 = vpop.eup %8421 }
 0xcaa   :  { %v8424_v54 = vpop.eup %8423  ;;  %v4894_v29 = vmul.f32 %v8422_v9, %v8420_v49 }
 0xcab   :  { %v4893_v62 = vmul.f32 %v8424_v54, %v9540_v15  ;;  %v3266_v15 = vadd.f32 %v9448_v25, %v9326_v61  ;;  %v3271_v54 = vadd.f32 %v9322_v4, %v9448_v25 }
 0xcad   :  { %v9578_v51 = vadd.f32 %v4894_v29, %v4893_v62  ;;  %v3389_v29 = vadd.f32 %v9324_v11, %v9450_v41 }
 0xcaf   :  { %8427 = vtanh.f32 %v9578_v51 }
 0xcb1   :  { %v8426_v48 = vpop.eup %8425 }
 0xcb9   :  { %v8428_v39 = vpop.eup %8427 }
 0xcba   :  { %v4897_v12 = vmul.f32 %v8428_v39, %v8426_v48 }
 0xcbc   :  { %7615 = vmatmul.mubr.msk.f32.vlgmr.msra.gmra.mrb[80].mxu0 %vm639_vm2, %v4897_v12  ;;  %7626 = vmatmul.mubr.msk.f32.vlgmr.msra.gmra.mrb[80].mxu1 %vm639_vm2, %v4897_v12 }
 0xcbd   :  { %8134 = vmatpush3.bf16.msra.mxu0 %v9384_v35  ;;  %8140 = vmatpush3.bf16.msra.mxu1 %v9386_v36 }
 0xcbe   :  { %8135 = vmatprep.subr.bf16.mxu0 %v9761_v18  ;;  %8141 = vmatprep.subr.bf16.mxu1 %v9761_v18 }
 0xcbf   :  { %7636 = vmatprep.mubr.msk.f32.mxu0 %vm8619_vm1, %v9762_v38  ;;  %7647 = vmatprep.mubr.msk.f32.mxu1 %vm8619_vm1, %v9762_v38 }
 0xcc1   :  { %8137 = vmatpush3.bf16.msra.mxu0 %v9392_v6  ;;  %8143 = vmatpush3.bf16.msra.mxu1 %v9394_v44 }
 0xcc2   :  { %8144 = vmatprep.subr.bf16.mxu0 %v9761_v18  ;;  %8150 = vmatprep.subr.bf16.mxu1 %v9761_v18 }
 0xcc4   :  { %7637 = vmatmul.mubr.msk.f32.vlgmr.msra.gmra.mrb[82].mxu0 %vm639_vm2, %v4897_v12  ;;  %7648 = vmatmul.mubr.msk.f32.vlgmr.msra.gmra.mrb[82].mxu1 %vm639_vm2, %v4897_v12 }
 0xcc5   :  { %8146 = vmatpush3.bf16.msra.mxu0 %v9338_v8  ;;  %8152 = vmatpush3.bf16.msra.mxu1 %v9340_v30 }
 0xcc6   :  { %8147 = vmatprep.subr.bf16.mxu0 %v9761_v18  ;;  %8153 = vmatprep.subr.bf16.mxu1 %v9761_v18 }
 0xcc7   :  { %7658 = vmatprep.mubr.msk.f32.mxu0 %vm8619_vm1, %v9762_v38  ;;  %7669 = vmatprep.mubr.msk.f32.mxu1 %vm8619_vm1, %v9762_v38 }
 0xcc9   :  { %8149 = vmatpush3.bf16.msra.mxu0 %v9352_v23  ;;  %8155 = vmatpush3.bf16.msra.mxu1 %v9354_v27 }
 0xcca   :  { %8156 = vmatprep.subr.bf16.mxu0 %v9761_v18  ;;  %8162 = vmatprep.subr.bf16.mxu1 %v9761_v18 }
 0xd8f   :  { %v4967_v34 = vpop.f32.mrb[80].mxu0  ;;  %v5038_v53 = vpop.f32.mrb[80].mxu1 }
 0xd90   :  { %v4971_v13 = vadd.f32 %v4967_v34, %v3266_v15  ;;  %v5042_v20 = vadd.f32 %v5038_v53, %v3384_v40  ;;  %v7616_v42 = vpop.f32.mrb[81].mxu0  ;;  %v7627_v17 = vpop.f32.mrb[81].mxu1 }
 0xd92   :  { %v6502_v58 = vmul.f32 -1.442695, %v4971_v13  ;;  %v6503_v45 = vmul.f32 -1.442695, %v5042_v20 }
 0xd94   :  { %8429 = vpow2.f32 %v6502_v58 }
 0xd95   :  { %8431 = vpow2.f32 %v6503_v45 }
 0xd97   :  { %v5109_v46 = vpop.f32.mrb[82].mxu0  ;;  %v5180_v0 = vpop.f32.mrb[82].mxu1 }
 0xd98   :  { %v5113_v37 = vadd.f32 %v5109_v46, %v9444_v21  ;;  %v5184_v19 = vadd.f32 %v5180_v0, %v9446_v24  ;;  %v7638_v61 = vpop.f32.mrb[83].mxu0  ;;  %v7649_v10 = vpop.f32.mrb[83].mxu1 }
 0xd9a   :  { %v6504_v43 = vmul.f32 -1.442695, %v5184_v19 }
 0xd9c   :  { %8433 = vpow2.f32 %v6504_v43 }
 0xd9d   :  { %8435 = vtanh.f32 %v5113_v37 }
 0xd9e   :  { %v8430_v28 = vpop.eup %8429 }
 0xd9f   :  { %v8432_v5 = vpop.eup %8431  ;;  %v5188_v57 = vadd.f32 1.0, %v8430_v28 }
 0xda0   :  { %v5194_v59 = vadd.f32 1.0, %v8432_v5 }
 0xda1   :  { %8437 = vrcp.f32 %v5188_v57 }
 0xda2   :  { %8439 = vrcp.f32 %v5194_v59 }
 0xda6   :  { %v8434_v7 = vpop.eup %8433 }
 0xda7   :  { %v8436_v63 = vpop.eup %8435  ;;  %v5201_v14 = vadd.f32 1.0, %v8434_v7 }
 0xda9   :  { %8441 = vrcp.f32 %v5201_v14 }
 0xdab   :  { %v8438_v60 = vpop.eup %8437 }
 0xdac   :  { %v8440_v47 = vpop.eup %8439  ;;  %v5205_v3 = vmul.f32 %v8438_v60, %v8436_v63 }
 0xdad   :  { %v5204_v21 = vmul.f32 %v8440_v47, %v9578_v51 }
 0xdaf   :  { %v9616_v24 = vadd.f32 %v5205_v3, %v5204_v21 }
 0xdb1   :  { %8443 = vtanh.f32 %v9616_v24 }
 0xdb3   :  { %v8442_v50 = vpop.eup %8441 }
 0xdbb   :  { %v8444_v49 = vpop.eup %8443 }
 0xdbc   :  { %v5208_v9 = vmul.f32 %v8444_v49, %v8442_v50 }
 0xdbe   :  { %7659 = vmatmul.mubr.msk.f32.vlgmr.msra.gmra.mrb[84].mxu0 %vm639_vm2, %v5208_v9  ;;  %7670 = vmatmul.mubr.msk.f32.vlgmr.msra.gmra.mrb[84].mxu1 %vm639_vm2, %v5208_v9 }
 0xdbf   :  { %8158 = vmatpush3.bf16.msra.mxu0 %v9384_v35  ;;  %8164 = vmatpush3.bf16.msra.mxu1 %v9386_v36 }
 0xdc0   :  { %8159 = vmatprep.subr.bf16.mxu0 %v9761_v18  ;;  %8165 = vmatprep.subr.bf16.mxu1 %v9761_v18 }
 0xdc1   :  { %7680 = vmatprep.mubr.msk.f32.mxu0 %vm8619_vm1, %v9762_v38  ;;  %7691 = vmatprep.mubr.msk.f32.mxu1 %vm8619_vm1, %v9762_v38 }
 0xdc3   :  { %8161 = vmatpush3.bf16.msra.mxu0 %v9392_v6  ;;  %8167 = vmatpush3.bf16.msra.mxu1 %v9394_v44 }
 0xdc4   :  { %8168 = vmatprep.subr.bf16.mxu0 %v9761_v18  ;;  %8174 = vmatprep.subr.bf16.mxu1 %v9761_v18 }
 0xdc6   :  { %7681 = vmatmul.mubr.msk.f32.vlgmr.msra.gmra.mrb[86].mxu0 %vm639_vm2, %v5208_v9  ;;  %7692 = vmatmul.mubr.msk.f32.vlgmr.msra.gmra.mrb[86].mxu1 %vm639_vm2, %v5208_v9 }
 0xdc7   :  { %8170 = vmatpush3.bf16.msra.mxu0 %v9338_v8  ;;  %8176 = vmatpush3.bf16.msra.mxu1 %v9340_v30 }
 0xdc8   :  { %8171 = vmatprep.subr.bf16.mxu0 %v9761_v18  ;;  %8177 = vmatprep.subr.bf16.mxu1 %v9761_v18 }
 0xdc9   :  { %7702 = vmatprep.mubr.msk.f32.mxu0 %vm8619_vm1, %v9762_v38  ;;  %7713 = vmatprep.mubr.msk.f32.mxu1 %vm8619_vm1, %v9762_v38 }
 0xdcb   :  { %8173 = vmatpush3.bf16.msra.mxu0 %v9352_v23  ;;  %8179 = vmatpush3.bf16.msra.mxu1 %v9354_v27 }
 0xdcc   :  { %8180 = vmatprep.subr.bf16.mxu0 %v9761_v18  ;;  %8186 = vmatprep.subr.bf16.mxu1 %v9761_v18 }
 0xe91   :  { %v5278_v52 = vpop.f32.mrb[84].mxu0  ;;  %v5349_v62 = vpop.f32.mrb[84].mxu1 }
 0xe92   :  { %v5282_v51 = vadd.f32 %v5278_v52, %v3271_v54  ;;  %v5353_v48 = vadd.f32 %v5349_v62, %v3389_v29  ;;  %v7660_v39 = vpop.f32.mrb[85].mxu0  ;;  %v7671_v12 = vpop.f32.mrb[85].mxu1 }
 0xe94   :  { %v6509_v15 = vmul.f32 -1.442695, %v5282_v51  ;;  %v6510_v40 = vmul.f32 -1.442695, %v5353_v48 }
 0xe96   :  { %8445 = vpow2.f32 %v6509_v15 }
 0xe97   :  { %8447 = vpow2.f32 %v6510_v40 }
 0xe99   :  { %v5420_v34 = vpop.f32.mrb[86].mxu0  ;;  %v5491_v53 = vpop.f32.mrb[86].mxu1 }
 0xe9a   :  { %v5424_v13 = vadd.f32 %v5420_v34, %v9440_v16  ;;  %v5495_v20 = vadd.f32 %v5491_v53, %v9442_v22  ;;  %v7682_v4 = vpop.f32.mrb[87].mxu0  ;;  %v7693_v42 = vpop.f32.mrb[87].mxu1 }
 0xe9b   :  { %v3399_v4 = vadd.f32 %v9422_v32, %v9450_v41 }
 0xe9c   :  { %v6511_v17 = vmul.f32 -1.442695, %v5495_v20 }
 0xe9e   :  { %8449 = vpow2.f32 %v6511_v17 }
 0xe9f   :  { %8451 = vtanh.f32 %v5424_v13  ;;  %v6145_v13 = vld [vmem:[%s9752_s7 + $0x18] sm:$0xff] }
 0xea0   :  { %v8446_v11 = vpop.eup %8445 }
 0xea1   :  { %v8448_v58 = vpop.eup %8447  ;;  %v5499_v45 = vadd.f32 1.0, %v8446_v11 }
 0xea2   :  { %v5505_v46 = vadd.f32 1.0, %v8448_v58 }
 0xea3   :  { %8453 = vrcp.f32 %v5499_v45 }
 0xea4   :  { %8455 = vrcp.f32 %v5505_v46 }
 0xea8   :  { %v8450_v0 = vpop.eup %8449 }
 0xea9   :  { %v8452_v37 = vpop.eup %8451  ;;  %v5512_v43 = vadd.f32 1.0, %v8450_v0 }
 0xeab   :  { %8457 = vrcp.f32 %v5512_v43 }
 0xead   :  { %v8454_v19 = vpop.eup %8453 }
 0xeae   :  { %v8456_v61 = vpop.eup %8455  ;;  %v5516_v10 = vmul.f32 %v8454_v19, %v8452_v37 }
 0xeaf   :  { %v5515_v16 = vmul.f32 %v8456_v61, %v9616_v24 }
 0xeb1   :  { %v9654_v22 = vadd.f32 %v5516_v10, %v5515_v16 }
 0xeb3   :  { %8459 = vtanh.f32 %v9654_v22 }
 0xeb5   :  { %v8458_v28 = vpop.eup %8457 }
 0xebd   :  { %v8460_v5 = vpop.eup %8459 }
 0xebe   :  { %v5519_v57 = vmul.f32 %v8460_v5, %v8458_v28 }
 0xec0   :  { %7703 = vmatmul.mubr.msk.f32.vlgmr.msra.gmra.mrb[88].mxu0 %vm639_vm2, %v5519_v57  ;;  %7714 = vmatmul.mubr.msk.f32.vlgmr.msra.gmra.mrb[88].mxu1 %vm639_vm2, %v5519_v57 }
 0xec1   :  { %8182 = vmatpush3.bf16.msra.mxu0 %v9384_v35  ;;  %8188 = vmatpush3.bf16.msra.mxu1 %v9386_v36 }
 0xec2   :  { %8183 = vmatprep.subr.bf16.mxu0 %v9761_v18  ;;  %8189 = vmatprep.subr.bf16.mxu1 %v9761_v18 }
 0xec3   :  { %7724 = vmatprep.mubr.msk.f32.mxu0 %vm8619_vm1, %v9762_v38  ;;  %7735 = vmatprep.mubr.msk.f32.mxu1 %vm8619_vm1, %v9762_v38 }
 0xec5   :  { %8185 = vmatpush3.bf16.msra.mxu0 %v9392_v6  ;;  %8191 = vmatpush3.bf16.msra.mxu1 %v9394_v44 }
 0xec6   :  { %8192 = vmatprep.subr.bf16.mxu0 %v9761_v18  ;;  %8198 = vmatprep.subr.bf16.mxu1 %v9761_v18 }
 0xec8   :  { %7725 = vmatmul.mubr.msk.f32.vlgmr.msra.gmra.mrb[90].mxu0 %vm639_vm2, %v5519_v57  ;;  %7736 = vmatmul.mubr.msk.f32.vlgmr.msra.gmra.mrb[90].mxu1 %vm639_vm2, %v5519_v57 }
 0xec9   :  { %8194 = vmatpush3.bf16.msra.mxu0 %v9338_v8  ;;  %8200 = vmatpush3.bf16.msra.mxu1 %v9340_v30  ;;  %v3276_v8 = vadd.f32 %v9448_v25, %v9424_v33  ;;  %v3394_v30 = vadd.f32 %v9450_v41, %v9426_v56 }
 0xeca   :  { %8195 = vmatprep.subr.bf16.mxu0 %v9761_v18  ;;  %8201 = vmatprep.subr.bf16.mxu1 %v9761_v18 }
 0xecb   :  { %7746 = vmatprep.mubr.msk.f32.mxu0 %vm8619_vm1, %v9762_v38  ;;  %7757 = vmatprep.mubr.msk.f32.mxu1 %vm8619_vm1, %v9762_v38 }
 0xecd   :  { %8197 = vmatpush3.bf16.msra.mxu0 %v9352_v23  ;;  %8203 = vmatpush3.bf16.msra.mxu1 %v9354_v27 }
 0xece   :  { %8204 = vmatprep.subr.bf16.mxu0 %v9761_v18  ;;  %8210 = vmatprep.subr.bf16.mxu1 %v9761_v18 }
 0xf93   :  { %v5589_v59 = vpop.f32.mrb[88].mxu0  ;;  %v5660_v7 = vpop.f32.mrb[88].mxu1 }
 0xf94   :  { %v5593_v63 = vadd.f32 %v5589_v59, %v3276_v8  ;;  %v5664_v60 = vadd.f32 %v5660_v7, %v3394_v30  ;;  %v7704_v47 = vpop.f32.mrb[89].mxu0  ;;  %v7715_v3 = vpop.f32.mrb[89].mxu1 }
 0xf95   :  { %v6227_v47 = vld [vmem:[%s9754_s9] sm:$0xff]  ;;  %v6228_v3 = vld [vmem:[%s9754_s9 + $0x8] sm:$0xff] }
 0xf96   :  { %v6516_v14 = vmul.f32 -1.442695, %v5593_v63  ;;  %v6517_v23 = vmul.f32 -1.442695, %v5664_v60 }
 0xf98   :  { %8461 = vpow2.f32 %v6516_v14  ;;  %v8223_v14 = vpack.c.bf16 %v6228_v3, %v6227_v47 }
 0xf99   :  { %8463 = vpow2.f32 %v6517_v23  ;;  %v6526_v23 = vld [vmem:[#allocation12] ss:$0 sm:$0xff] }
 0xf9b   :  { %v5731_v27 = vpop.f32.mrb[90].mxu0  ;;  %v5802_v21 = vpop.f32.mrb[90].mxu1 }
 0xf9c   :  { %v5735_v24 = vadd.f32 %v5731_v27, %v9456_v1  ;;  %v5806_v50 = vadd.f32 %v5802_v21, %v9458_v2  ;;  %v7726_v33 = vpop.f32.mrb[91].mxu0  ;;  %v7737_v49 = vpop.f32.mrb[91].mxu1 }
 0xf9d   :  { %v6528_v33 = vld [vmem:[#allocation4] ss:$0 sm:$0xff] }
 0xf9e   :  { %v6518_v9 = vmul.f32 -1.442695, %v5806_v50 }
 0xfa0   :  { %8465 = vpow2.f32 %v6518_v9 }
 0xfa1   :  { %8467 = vtanh.f32 %v5735_v24 }
 0xfa2   :  { %v8462_v56 = vpop.eup %8461 }
 0xfa3   :  { %v8464_v54 = vpop.eup %8463  ;;  %v5810_v29 = vadd.f32 1.0, %v8462_v56 }
 0xfa4   :  { %v5816_v52 = vadd.f32 1.0, %v8464_v54 }
 0xfa5   :  { %8469 = vrcp.f32 %v5810_v29 }
 0xfa6   :  { %8471 = vrcp.f32 %v5816_v52 }
 0xfaa   :  { %v8466_v62 = vpop.eup %8465 }
 0xfab   :  { %v8468_v51 = vpop.eup %8467  ;;  %v5823_v15 = vadd.f32 1.0, %v8466_v62 }
 0xfad   :  { %8473 = vrcp.f32 %v5823_v15 }
 0xfaf   :  { %v8470_v48 = vpop.eup %8469 }
 0xfb0   :  { %v8472_v39 = vpop.eup %8471  ;;  %v5827_v12 = vmul.f32 %v8470_v48, %v8468_v51 }
 0xfb1   :  { %v5826_v1 = vmul.f32 %v8472_v39, %v9654_v22 }
 0xfb3   :  { %v9692_v2 = vadd.f32 %v5827_v12, %v5826_v1 }
 0xfb5   :  { %8475 = vtanh.f32 %v9692_v2 }
 0xfb7   :  { %v8474_v40 = vpop.eup %8473 }
 0xfbf   :  { %v8476_v34 = vpop.eup %8475 }
 0xfc0   :  { %v5830_v53 = vmul.f32 %v8476_v34, %v8474_v40 }
 0xfc2   :  { %7747 = vmatmul.mubr.msk.f32.vlgmr.msra.gmra.mrb[92].mxu0 %vm639_vm2, %v5830_v53  ;;  %7758 = vmatmul.mubr.msk.f32.vlgmr.msra.gmra.mrb[92].mxu1 %vm639_vm2, %v5830_v53 }
 0xfc3   :  { %8206 = vmatpush3.bf16.msra.mxu0 %v9384_v35  ;;  %8212 = vmatpush3.bf16.msra.mxu1 %v9386_v36  ;;  %v6142_v35 = vld [vmem:[%s9752_s7] sm:$0xff]  ;;  %v6143_v36 = vld [vmem:[%s9752_s7 + $0x8] sm:$0xff] }
 0xfc4   :  { %8207 = vmatprep.subr.bf16.mxu0 %v9761_v18  ;;  %8213 = vmatprep.subr.bf16.mxu1 %v9761_v18 }
 0xfc5   :  { %7768 = vmatprep.mubr.msk.f32.mxu0 %vm8619_vm1, %v9762_v38  ;;  %7779 = vmatprep.mubr.msk.f32.mxu1 %vm8619_vm1, %v9762_v38 }
 0xfc7   :  { %8209 = vmatpush3.bf16.msra.mxu0 %v9392_v6  ;;  %8215 = vmatpush3.bf16.msra.mxu1 %v9394_v44  ;;  %v6144_v6 = vld [vmem:[%s9752_s7 + $0x10] sm:$0xff]  ;;  %v8217_v44 = vpack.c.bf16 %v6143_v36, %v6142_v35 }
 0xfc8   :  { %8216 = vmatprep.subr.bf16.mxu0 %v9761_v18  ;;  %8222 = vmatprep.subr.bf16.mxu1 %v9761_v18  ;;  %v8220_v20 = vpack.c.bf16 %v6145_v13, %v6144_v6 }
 0xfca   :  { %7769 = vmatmul.mubr.msk.f32.vlgmr.msra.gmra.mrb[94].mxu0 %vm639_vm2, %v5830_v53  ;;  %7780 = vmatmul.mubr.msk.f32.vlgmr.msra.gmra.mrb[94].mxu1 %vm639_vm2, %v5830_v53 }
 0xfcb   :  { %7790 = vmatprep.mubr.msk.f32.mxu0 %vm8619_vm1, %v9762_v38  ;;  %7797 = vmatprep.mubr.msk.f32.mxu1 %vm8619_vm1, %v9762_v38  ;;  %v3281_v38 = vadd.f32 %v9420_v55, %v9448_v25 }
 0xfcc   :  { %8218 = vmatpush3.bf16.msra.mxu0 %v8217_v44  ;;  %8224 = vmatpush3.bf16.msra.mxu1 %v8223_v14 }
 0xfcd   :  { %8219 = vmatprep.subr.bf16.mxu0 %v9761_v18 }
 0xfd0   :  { %8221 = vmatpush3.bf16.msra.mxu0 %v8220_v20 }
0x1095   :  { %v5900_v42 = vpop.f32.mrb[92].mxu0  ;;  %v5971_v17 = vpop.f32.mrb[92].mxu1 }
0x1096   :  { %v5904_v11 = vadd.f32 %v5900_v42, %v3281_v38  ;;  %v5975_v58 = vadd.f32 %v5971_v17, %v3399_v4  ;;  %v7748_v45 = vpop.f32.mrb[93].mxu0  ;;  %v7759_v46 = vpop.f32.mrb[93].mxu1 }
0x1098   :  { %v6523_v0 = vmul.f32 -1.442695, %v5904_v11  ;;  %v6524_v37 = vmul.f32 -1.442695, %v5975_v58 }
0x109a   :  { %8477 = vpow2.f32 %v6523_v0 }
0x109b   :  { %8479 = vpow2.f32 %v6524_v37 }
0x109d   :  { %v6042_v19 = vpop.f32.mrb[94].mxu0  ;;  %v6113_v61 = vpop.f32.mrb[94].mxu1 }
0x109e   :  { %v6046_v18 = vadd.f32 %v6042_v19, %v9452_v31  ;;  %v6117_v10 = vadd.f32 %v6113_v61, %v9454_v26  ;;  %v7770_v55 = vpop.f32.mrb[95].mxu0  ;;  %v7781_v25 = vpop.f32.mrb[95].mxu1 }
0x10a0   :  { %v6525_v43 = vmul.f32 -1.442695, %v6117_v10 }
0x10a2   :  { %8481 = vpow2.f32 %v6525_v43 }
0x10a3   :  { %8483 = vtanh.f32 %v6046_v18 }
0x10a4   :  { %v8478_v32 = vpop.eup %8477 }
0x10a5   :  { %v8480_v41 = vpop.eup %8479  ;;  %v6121_v16 = vadd.f32 1.0, %v8478_v32 }
0x10a6   :  { %v6127_v22 = vadd.f32 1.0, %v8480_v41 }
0x10a7   :  { %8485 = vrcp.f32 %v6121_v16 }
0x10a8   :  { %8487 = vrcp.f32 %v6127_v22 }
0x10ac   :  { %v8482_v28 = vpop.eup %8481 }
0x10ad   :  { %v8484_v5 = vpop.eup %8483  ;;  %v6134_v59 = vadd.f32 1.0, %v8482_v28 }
0x10af   :  { %8489 = vrcp.f32 %v6134_v59 }
0x10b1   :  { %v8486_v57 = vpop.eup %8485 }
0x10b2   :  { %v8488_v8 = vpop.eup %8487  ;;  %v6138_v30 = vmul.f32 %v8486_v57, %v8484_v5 }
0x10b3   :  { %v6137_v31 = vmul.f32 %v8488_v8, %v9692_v2 }
0x10b5   :  { %v6139_v26 = vadd.f32 %v6138_v30, %v6137_v31 }
0x10b7   :  { %8491 = vtanh.f32 %v6139_v26 }
0x10b9   :  { %v8490_v7 = vpop.eup %8489 }
0x10c1   :  { %v8492_v63 = vpop.eup %8491 }
0x10c2   :  { %v6141_v60 = vmul.f32 %v8492_v63, %v8490_v7 }
0x10c4   :  { %7791 = vmatmul.mubr.msk.f32.vlgmr.msra.gmra.mrb[96].mxu0 %vm639_vm2, %v6141_v60 }
0x1197   :  { %v6222_v27 = vpop.f32.mrb[96].mxu0 }
0x1198   :  { %v6223_v21 = vadd.f32 %v6526_v23, %v6222_v27  ;;  %v7792_v24 = vpop.f32.mrb[97].mxu0 }
0x119a   :  { %v6226_v50 = vmax.f32 %v6223_v21, 0.0 }
0x119c   :  { %7798 = vmatmul.mubr.msk.f32.vlgmr.msra.gmra.mrb[96].mxu1 %vm6236_vm3, %v6226_v50 }
0x126f   :  { %v6306_v49 = vpop.f32.mrb[96].mxu1 }
0x1270   :  { %v6307_v9 = vadd.f32 %v6528_v33, %v6306_v49  ;;  %v7799_v56 = vpop.f32.mrb[97].mxu1 }
0x1272   :  { %6311 = vst.msk [vmem:[%s9756_s11] sm:$0xff] %vm6310_vm4, %v6307_v9 }
0x1273   :  { %6316 = vsyncpa [#allocation6], 1 }
0x1274   :  { %6317 = vsyncpa [#allocation8], 1 }
0x1275   :  { %6318 = vsyncpa [#allocation11], 1 }

</bundles_post_ra>
